<compile_context>
chip_gen: v7x
topology: tpu7x:2x2x1
jax: 0.10.0
libtpu: 0.0.40
codegen_flags: <defaults>
</compile_context>

<pallas_src>
import functools

import jax
import jax.numpy as jnp
from jax.experimental import pallas as pl
from jax.experimental.pallas import tpu as pltpu

EPS = 1e-5


# --------------------------------------------------------------------------
# Kernel A/B: 3x3 conv (9 accumulated per-tap matmuls) + partial BN stats.
# If apply_in_act, the previous stage's folded BN affine + ReLU is applied to
# the input tile before the conv (fuses the intermediate normalization pass).
# --------------------------------------------------------------------------
def _conv_stats_kernel(*refs, apply_in_act):
    if apply_in_act:
        affine_ref, x_ref, w_ref, z_ref, stats_ref, xpad = refs
    else:
        x_ref, w_ref, z_ref, stats_ref, xpad = refs
        affine_ref = None

    H, W, Cout = z_ref.shape[1], z_ref.shape[2], z_ref.shape[3]
    Cin = x_ref.shape[3]
    HW = H * W
    conv_dtype = xpad.dtype

    xin = x_ref[0].astype(jnp.float32)                     # (H, W, Cin)
    if apply_in_act:
        aff = affine_ref[...]                              # (2, Cin) f32
        s = aff[0:1, :].reshape(1, 1, Cin)
        t = aff[1:2, :].reshape(1, 1, Cin)
        xin = jnp.maximum(xin * s + t, 0.0)                # folded BN + ReLU (f32)
    xin = xin.astype(conv_dtype)

    # Zero only the 1-pixel halo border (4 strips); interior is written once.
    zrow = jnp.zeros((1, W + 2, Cin), conv_dtype)
    zcol = jnp.zeros((H, 1, Cin), conv_dtype)
    xpad[0:1, :, :] = zrow
    xpad[H + 1:H + 2, :, :] = zrow
    xpad[1:H + 1, 0:1, :] = zcol
    xpad[1:H + 1, W + 1:W + 2, :] = zcol
    xpad[1:H + 1, 1:W + 1, :] = xin
    xp = xpad[...]                                         # (H+2, W+2, Cin)

    # 9 per-tap matmuls accumulated in f32 (no im2col patch materialization).
    acc = jnp.zeros((HW, Cout), jnp.float32)
    for kh in range(3):
        for kw in range(3):
            tap = xp[kh:kh + H, kw:kw + W, :].reshape(HW, Cin)
            acc = acc + jnp.dot(tap, w_ref[kh * 3 + kw],
                                preferred_element_type=jnp.float32)

    # Store only the Cout real channels (no 128-lane padding to HBM).
    z_ref[0] = acc.reshape(H, W, Cout).astype(z_ref.dtype)

    # Per-image partial BN statistics; reduced across the grid in the wrapper.
    # (Note: stats are from the f32 accumulator even if z is stored in bf16 —
    #  tiny stats/data mismatch, acceptable at the checked tolerances.)
    stats_ref[0] = jnp.concatenate(
        [jnp.sum(acc, axis=0, keepdims=True),
         jnp.sum(acc * acc, axis=0, keepdims=True)], axis=0)   # (2, Cout)


# --------------------------------------------------------------------------
# Kernel C: apply folded BN scale/shift + ReLU (final stage only).
# --------------------------------------------------------------------------
def _apply_bn_relu_kernel(affine_ref, z_ref, y_ref):
    C = y_ref.shape[3]
    aff = affine_ref[...]
    s = aff[0:1, :].reshape(1, 1, C)
    t = aff[1:2, :].reshape(1, 1, C)
    z = z_ref[0].astype(jnp.float32)
    y_ref[0] = jnp.maximum(z * s + t, 0.0).astype(y_ref.dtype)


# --------------------------------------------------------------------------
# Wrappers
# --------------------------------------------------------------------------
def _compiler_params():
    try:
        kind = jax.devices()[0].device_kind.lower()
    except Exception:
        kind = ""
    if "v7" in kind:
        vmem = 48 * 1024 * 1024          # v7x: 64 MiB physical, stay conservative
    elif "v5" in kind or "v6" in kind:
        vmem = 96 * 1024 * 1024          # v5e/v6e: 128 MiB physical
    else:
        vmem = 32 * 1024 * 1024          # unknown / older: safe default
    return pltpu.CompilerParams(
        dimension_semantics=("parallel",),   # shard batch across TensorCores
        vmem_limit_bytes=vmem)


def _conv_stage(x_nhwc, w9, affine_in, conv_dtype):
    """conv (+ optional fused input BN/ReLU) + partial BN stats for one stage."""
    N, H, W, Cin = x_nhwc.shape
    Cout = w9.shape[2]
    apply_in_act = affine_in is not None
    kernel = functools.partial(_conv_stats_kernel, apply_in_act=apply_in_act)

    in_specs = [
        pl.BlockSpec((1, H, W, Cin), lambda n: (n, 0, 0, 0)),   # input tile
        pl.BlockSpec((9, Cin, Cout), lambda n: (0, 0, 0)),      # packed taps (resident)
    ]
    args = [x_nhwc, w9]
    if apply_in_act:
        in_specs = [pl.BlockSpec((2, Cin), lambda n: (0, 0))] + in_specs
        args = [affine_in] + args

    return pl.pallas_call(
        kernel,
        out_shape=(jax.ShapeDtypeStruct((N, H, W, Cout), conv_dtype),
                   jax.ShapeDtypeStruct((N, 2, Cout), jnp.float32)),
        grid=(N,),
        in_specs=in_specs,
        out_specs=(
            pl.BlockSpec((1, H, W, Cout), lambda n: (n, 0, 0, 0)),
            pl.BlockSpec((1, 2, Cout), lambda n: (n, 0, 0)),
        ),
        scratch_shapes=[pltpu.VMEM((H + 2, W + 2, Cin), conv_dtype)],
        compiler_params=_compiler_params(),
    )(*args)


def _apply_stage(z, affine):
    N, H, W, C = z.shape
    return pl.pallas_call(
        _apply_bn_relu_kernel,
        out_shape=jax.ShapeDtypeStruct((N, H, W, C), jnp.float32),
        grid=(N,),
        in_specs=[pl.BlockSpec((2, C), lambda n: (0, 0)),
                  pl.BlockSpec((1, H, W, C), lambda n: (n, 0, 0, 0))],
        out_specs=pl.BlockSpec((1, H, W, C), lambda n: (n, 0, 0, 0)),
        compiler_params=_compiler_params(),
    )(affine, z)


def _pack_weights(w_oihw, dtype):
    """OIHW conv weights -> (9, Cin, Cout): one (Cin, Cout) matrix per tap."""
    cout, cin, _, _ = w_oihw.shape
    w = jnp.transpose(w_oihw, (2, 3, 1, 0))                 # (3, 3, Cin, Cout)
    return w.reshape(9, cin, cout).astype(dtype)


def _bn_affine(stats, gamma, beta, count):
    """Reduce per-image (sum, sumsq) and fold BN into per-channel scale/shift."""
    ssum = jnp.sum(stats[:, 0, :], axis=0)
    ssq = jnp.sum(stats[:, 1, :], axis=0)
    mean = ssum / count
    # E[x^2]-E[x]^2 (biased var, as PyTorch uses for normalization); clamp >= 0.
    # TODO(synk): switch to a shifted/two-pass reduction at large N*H*W to avoid
    # catastrophic cancellation.
    var = jnp.maximum(ssq / count - mean * mean, 0.0)
    s = gamma.astype(jnp.float32) * jax.lax.rsqrt(var + EPS)
    t = beta.astype(jnp.float32) - mean * s
    return jnp.stack([s, t], axis=0)                        # (2, Cout) f32


def double_conv_forward(x_nchw, params, conv_dtype=jnp.float32):
    """params = (w1_oihw, g1, b1, w2_oihw, g2, b2); x is NCHW like PyTorch."""
    w1, g1, b1, w2, g2, b2 = params
    N, Cin, H, W = x_nchw.shape
    Cout = w1.shape[0]
    count = N * H * W

    x = jnp.transpose(x_nchw, (0, 2, 3, 1)).astype(conv_dtype)   # NCHW -> NHWC
    w1p = _pack_weights(w1, conv_dtype)                  # (9, Cin, Cout)
    w2p = _pack_weights(w2, conv_dtype)                  # (9, Cout, Cout)  K = 9*Cout

    # Stage 1: conv1 + partial stats (no input activation, no dummy affine DMA).
    z1, st1 = _conv_stage(x, w1p, None, conv_dtype)
    aff1 = _bn_affine(st1, g1, b1, count)

    # Stage 2: bn1+relu fused into conv2's input path, conv2 + partial stats.
    z2, st2 = _conv_stage(z1, w2p, aff1, conv_dtype)
    aff2 = _bn_affine(st2, g2, b2, count)

    # Final: bn2 + relu (writes only the Cout real channels).
    y = _apply_stage(z2, aff2)                           # (N, H, W, Cout) f32
    return jnp.transpose(y, (0, 3, 1, 2))                # NHWC -> NCHW


# ---------------- pure-JAX reference (for correctness check) ----------------
def _ref_stage(x_nchw, w_oihw, gamma, beta):
    y = jax.lax.conv_general_dilated(
        x_nchw, w_oihw, window_strides=(1, 1), padding=((1, 1), (1, 1)),
        dimension_numbers=('NCHW', 'OIHW', 'NCHW'))
    mean = y.mean(axis=(0, 2, 3), keepdims=True)
    var = ((y - mean) ** 2).mean(axis=(0, 2, 3), keepdims=True)
    y = (y - mean) * jax.lax.rsqrt(var + EPS)
    y = y * gamma.reshape(1, -1, 1, 1) + beta.reshape(1, -1, 1, 1)
    return jnp.maximum(y, 0.0)


def double_conv_ref(x_nchw, params):
    w1, g1, b1, w2, g2, b2 = params
    y = _ref_stage(x_nchw, w1, g1, b1)
    return _ref_stage(y, w2, g2, b2)


if __name__ == "__main__":
    key = jax.random.PRNGKey(0)
    N, Cin, Cout, H, W = 2, 4, 8, 16, 16

    k = jax.random.split(key, 7)
    x = jax.random.normal(k[0], (N, Cin, H, W), jnp.float32)

    # Deterministic synthetic parameters (shapes match nn.Conv2d/BatchNorm2d).
    w1 = jax.random.normal(k[1], (Cout, Cin, 3, 3), jnp.float32) * 0.1
    w2 = jax.random.normal(k[2], (Cout, Cout, 3, 3), jnp.float32) * 0.1
    g1 = jax.random.uniform(k[3], (Cout,), jnp.float32, 0.5, 1.5)
    b1 = jax.random.normal(k[4], (Cout,), jnp.float32) * 0.1
    g2 = jax.random.uniform(k[5], (Cout,), jnp.float32, 0.5, 1.5)
    b2 = jax.random.normal(k[6], (Cout,), jnp.float32) * 0.1
    params = (w1, g1, b1, w2, g2, b2)

    ref = double_conv_ref(x, params)

    # f32 MXU feed: tight parity with the f32 reference.
    fwd_f32 = jax.jit(functools.partial(double_conv_forward, conv_dtype=jnp.float32))
    out_f32 = jax.block_until_ready(fwd_f32(x, params))
    assert out_f32.shape == (N, Cout, H, W), out_f32.shape
    err_f32 = float(jnp.max(jnp.abs(out_f32 - ref)))
    assert err_f32 < 1e-4, err_f32

    # bf16 MXU feed + bf16 intermediate z1 in HBM (the v5e/v6e/v7x production
    # config from the perf review); looser tolerance since inputs/weights/z1
    # are rounded to bf16 (accumulation and BN math stay f32).
    fwd_bf16 = jax.jit(functools.partial(double_conv_forward, conv_dtype=jnp.bfloat16))
    out_bf16 = jax.block_until_ready(fwd_bf16(x, params))
    err_bf16 = float(jnp.max(jnp.abs(out_bf16 - ref)))
    assert err_bf16 < 0.25, err_bf16

    print("KERNEL_OK")
</pallas_src>

<mosaic_0001>
module attributes {stable_mosaic.version = 11 : i64} {
  func.func @_conv_stats_kernel(%arg0: i32, %arg1: memref<1x16x16x4xf32, #tpu.memory_space<vmem>>, %arg2: memref<9x4x8xf32, #tpu.memory_space<vmem>>, %arg3: memref<1x16x16x8xf32, #tpu.memory_space<vmem>>, %arg4: memref<1x2x8xf32, #tpu.memory_space<vmem>>, %arg5: memref<18x18x4xf32, #tpu.memory_space<vmem>>) attributes {dimension_semantics = [#tpu.dimension_semantics<parallel>], iteration_bounds = array<i64: 2>, scalar_prefetch = 0 : i64, scratch_operands = 1 : i64, tpu.core_type = #tpu.core_type<tc>, window_params = [{transform_indices = @transform_0, window_bounds = array<i64: 1, 16, 16, 4>}, {pipeline_mode = #tpu.pipeline_mode<synchronous>, transform_indices = @transform_1, window_bounds = array<i64: 9, 4, 8>}, {transform_indices = @transform_2, window_bounds = array<i64: 1, 16, 16, 8>}, {transform_indices = @transform_3, window_bounds = array<i64: 1, 2, 8>}]} {
    %c0 = arith.constant 0 : index
    %c0_0 = arith.constant 0 : index
    %c0_1 = arith.constant 0 : index
    %c0_2 = arith.constant 0 : index
    %0 = vector.load %arg1[%c0, %c0_0, %c0_1, %c0_2] : memref<1x16x16x4xf32, #tpu.memory_space<vmem>>, vector<1x16x16x4xf32>
    %1 = vector.shape_cast %0 : vector<1x16x16x4xf32> to vector<16x16x4xf32>
    %cst = arith.constant 0.000000e+00 : f32
    %2 = vector.broadcast %cst : f32 to vector<1x18x4xf32>
    %cst_3 = arith.constant 0.000000e+00 : f32
    %3 = vector.broadcast %cst_3 : f32 to vector<16x1x4xf32>
    %c0_4 = arith.constant 0 : index
    %c0_5 = arith.constant 0 : index
    %c0_6 = arith.constant 0 : index
    %4 = vector.load %arg5[%c0_4, %c0_5, %c0_6] : memref<18x18x4xf32, #tpu.memory_space<vmem>>, vector<1x18x4xf32>
    tpu.vector_store %arg5[%c0_4, %c0_5, %c0_6], %2 {strides = array<i32>} : memref<18x18x4xf32, #tpu.memory_space<vmem>>, vector<1x18x4xf32>,
    %c17 = arith.constant 17 : index
    %c0_7 = arith.constant 0 : index
    %c0_8 = arith.constant 0 : index
    %5 = vector.load %arg5[%c17, %c0_7, %c0_8] : memref<18x18x4xf32, #tpu.memory_space<vmem>>, vector<1x18x4xf32>
    tpu.vector_store %arg5[%c17, %c0_7, %c0_8], %2 {strides = array<i32>} : memref<18x18x4xf32, #tpu.memory_space<vmem>>, vector<1x18x4xf32>,
    %c1 = arith.constant 1 : index
    %c0_9 = arith.constant 0 : index
    %c0_10 = arith.constant 0 : index
    %6 = vector.load %arg5[%c1, %c0_9, %c0_10] : memref<18x18x4xf32, #tpu.memory_space<vmem>>, vector<16x1x4xf32>
    tpu.vector_store %arg5[%c1, %c0_9, %c0_10], %3 {strides = array<i32>} : memref<18x18x4xf32, #tpu.memory_space<vmem>>, vector<16x1x4xf32>,
    %c1_11 = arith.constant 1 : index
    %c17_12 = arith.constant 17 : index
    %c0_13 = arith.constant 0 : index
    %7 = vector.load %arg5[%c1_11, %c17_12, %c0_13] : memref<18x18x4xf32, #tpu.memory_space<vmem>>, vector<16x1x4xf32>
    tpu.vector_store %arg5[%c1_11, %c17_12, %c0_13], %3 {strides = array<i32>} : memref<18x18x4xf32, #tpu.memory_space<vmem>>, vector<16x1x4xf32>,
    %c1_14 = arith.constant 1 : index
    %c1_15 = arith.constant 1 : index
    %c0_16 = arith.constant 0 : index
    %8 = vector.load %arg5[%c1_14, %c1_15, %c0_16] : memref<18x18x4xf32, #tpu.memory_space<vmem>>, vector<16x16x4xf32>
    tpu.vector_store %arg5[%c1_14, %c1_15, %c0_16], %1 {strides = array<i32>} : memref<18x18x4xf32, #tpu.memory_space<vmem>>, vector<16x16x4xf32>,
    %c0_17 = arith.constant 0 : index
    %c0_18 = arith.constant 0 : index
    %c0_19 = arith.constant 0 : index
    %9 = vector.load %arg5[%c0_17, %c0_18, %c0_19] : memref<18x18x4xf32, #tpu.memory_space<vmem>>, vector<18x18x4xf32>
    %cst_20 = arith.constant 0.000000e+00 : f32
    %10 = vector.broadcast %cst_20 : f32 to vector<256x8xf32>
    %11 = vector.extract_strided_slice %9 {offsets = [0, 0, 0], sizes = [16, 16, 4], strides = [1, 1, 1]} : vector<18x18x4xf32> to vector<16x16x4xf32>
    %12 = vector.shape_cast %11 : vector<16x16x4xf32> to vector<256x4xf32>
    %c0_21 = arith.constant 0 : index
    %c0_22 = arith.constant 0 : index
    %c0_23 = arith.constant 0 : index
    %13 = vector.load %arg2[%c0_21, %c0_22, %c0_23] : memref<9x4x8xf32, #tpu.memory_space<vmem>>, vector<1x4x8xf32>
    %14 = vector.shape_cast %13 : vector<1x4x8xf32> to vector<4x8xf32>
    %cst_24 = arith.constant dense<0.000000e+00> : vector<256x8xf32>
    %15 = tpu.matmul %12, %14, %cst_24 {dimension_numbers = #tpu.dot_dimension_numbers<[1], [0], [0], [1], [0, 0, 1, 1], [], []>} : vector<256x4xf32>, vector<4x8xf32>, vector<256x8xf32> -> vector<256x8xf32>
    %16 = arith.addf %10, %15 : vector<256x8xf32>
    %17 = vector.extract_strided_slice %9 {offsets = [0, 1, 0], sizes = [16, 16, 4], strides = [1, 1, 1]} : vector<18x18x4xf32> to vector<16x16x4xf32>
    %18 = vector.shape_cast %17 : vector<16x16x4xf32> to vector<256x4xf32>
    %c1_25 = arith.constant 1 : index
    %c0_26 = arith.constant 0 : index
    %c0_27 = arith.constant 0 : index
    %19 = vector.load %arg2[%c1_25, %c0_26, %c0_27] : memref<9x4x8xf32, #tpu.memory_space<vmem>>, vector<1x4x8xf32>
    %20 = vector.shape_cast %19 : vector<1x4x8xf32> to vector<4x8xf32>
    %cst_28 = arith.constant dense<0.000000e+00> : vector<256x8xf32>
    %21 = tpu.matmul %18, %20, %cst_28 {dimension_numbers = #tpu.dot_dimension_numbers<[1], [0], [0], [1], [0, 0, 1, 1], [], []>} : vector<256x4xf32>, vector<4x8xf32>, vector<256x8xf32> -> vector<256x8xf32>
    %22 = arith.addf %16, %21 : vector<256x8xf32>
    %23 = vector.extract_strided_slice %9 {offsets = [0, 2, 0], sizes = [16, 16, 4], strides = [1, 1, 1]} : vector<18x18x4xf32> to vector<16x16x4xf32>
    %24 = vector.shape_cast %23 : vector<16x16x4xf32> to vector<256x4xf32>
    %c2 = arith.constant 2 : index
    %c0_29 = arith.constant 0 : index
    %c0_30 = arith.constant 0 : index
    %25 = vector.load %arg2[%c2, %c0_29, %c0_30] : memref<9x4x8xf32, #tpu.memory_space<vmem>>, vector<1x4x8xf32>
    %26 = vector.shape_cast %25 : vector<1x4x8xf32> to vector<4x8xf32>
    %cst_31 = arith.constant dense<0.000000e+00> : vector<256x8xf32>
    %27 = tpu.matmul %24, %26, %cst_31 {dimension_numbers = #tpu.dot_dimension_numbers<[1], [0], [0], [1], [0, 0, 1, 1], [], []>} : vector<256x4xf32>, vector<4x8xf32>, vector<256x8xf32> -> vector<256x8xf32>
    %28 = arith.addf %22, %27 : vector<256x8xf32>
    %29 = vector.extract_strided_slice %9 {offsets = [1, 0, 0], sizes = [16, 16, 4], strides = [1, 1, 1]} : vector<18x18x4xf32> to vector<16x16x4xf32>
    %30 = vector.shape_cast %29 : vector<16x16x4xf32> to vector<256x4xf32>
    %c3 = arith.constant 3 : index
    %c0_32 = arith.constant 0 : index
    %c0_33 = arith.constant 0 : index
    %31 = vector.load %arg2[%c3, %c0_32, %c0_33] : memref<9x4x8xf32, #tpu.memory_space<vmem>>, vector<1x4x8xf32>
    %32 = vector.shape_cast %31 : vector<1x4x8xf32> to vector<4x8xf32>
    %cst_34 = arith.constant dense<0.000000e+00> : vector<256x8xf32>
    %33 = tpu.matmul %30, %32, %cst_34 {dimension_numbers = #tpu.dot_dimension_numbers<[1], [0], [0], [1], [0, 0, 1, 1], [], []>} : vector<256x4xf32>, vector<4x8xf32>, vector<256x8xf32> -> vector<256x8xf32>
    %34 = arith.addf %28, %33 : vector<256x8xf32>
    %35 = vector.extract_strided_slice %9 {offsets = [1, 1, 0], sizes = [16, 16, 4], strides = [1, 1, 1]} : vector<18x18x4xf32> to vector<16x16x4xf32>
    %36 = vector.shape_cast %35 : vector<16x16x4xf32> to vector<256x4xf32>
    %c4 = arith.constant 4 : index
    %c0_35 = arith.constant 0 : index
    %c0_36 = arith.constant 0 : index
    %37 = vector.load %arg2[%c4, %c0_35, %c0_36] : memref<9x4x8xf32, #tpu.memory_space<vmem>>, vector<1x4x8xf32>
    %38 = vector.shape_cast %37 : vector<1x4x8xf32> to vector<4x8xf32>
    %cst_37 = arith.constant dense<0.000000e+00> : vector<256x8xf32>
    %39 = tpu.matmul %36, %38, %cst_37 {dimension_numbers = #tpu.dot_dimension_numbers<[1], [0], [0], [1], [0, 0, 1, 1], [], []>} : vector<256x4xf32>, vector<4x8xf32>, vector<256x8xf32> -> vector<256x8xf32>
    %40 = arith.addf %34, %39 : vector<256x8xf32>
    %41 = vector.extract_strided_slice %9 {offsets = [1, 2, 0], sizes = [16, 16, 4], strides = [1, 1, 1]} : vector<18x18x4xf32> to vector<16x16x4xf32>
    %42 = vector.shape_cast %41 : vector<16x16x4xf32> to vector<256x4xf32>
    %c5 = arith.constant 5 : index
    %c0_38 = arith.constant 0 : index
    %c0_39 = arith.constant 0 : index
    %43 = vector.load %arg2[%c5, %c0_38, %c0_39] : memref<9x4x8xf32, #tpu.memory_space<vmem>>, vector<1x4x8xf32>
    %44 = vector.shape_cast %43 : vector<1x4x8xf32> to vector<4x8xf32>
    %cst_40 = arith.constant dense<0.000000e+00> : vector<256x8xf32>
    %45 = tpu.matmul %42, %44, %cst_40 {dimension_numbers = #tpu.dot_dimension_numbers<[1], [0], [0], [1], [0, 0, 1, 1], [], []>} : vector<256x4xf32>, vector<4x8xf32>, vector<256x8xf32> -> vector<256x8xf32>
    %46 = arith.addf %40, %45 : vector<256x8xf32>
    %47 = vector.extract_strided_slice %9 {offsets = [2, 0, 0], sizes = [16, 16, 4], strides = [1, 1, 1]} : vector<18x18x4xf32> to vector<16x16x4xf32>
    %48 = vector.shape_cast %47 : vector<16x16x4xf32> to vector<256x4xf32>
    %c6 = arith.constant 6 : index
    %c0_41 = arith.constant 0 : index
    %c0_42 = arith.constant 0 : index
    %49 = vector.load %arg2[%c6, %c0_41, %c0_42] : memref<9x4x8xf32, #tpu.memory_space<vmem>>, vector<1x4x8xf32>
    %50 = vector.shape_cast %49 : vector<1x4x8xf32> to vector<4x8xf32>
    %cst_43 = arith.constant dense<0.000000e+00> : vector<256x8xf32>
    %51 = tpu.matmul %48, %50, %cst_43 {dimension_numbers = #tpu.dot_dimension_numbers<[1], [0], [0], [1], [0, 0, 1, 1], [], []>} : vector<256x4xf32>, vector<4x8xf32>, vector<256x8xf32> -> vector<256x8xf32>
    %52 = arith.addf %46, %51 : vector<256x8xf32>
    %53 = vector.extract_strided_slice %9 {offsets = [2, 1, 0], sizes = [16, 16, 4], strides = [1, 1, 1]} : vector<18x18x4xf32> to vector<16x16x4xf32>
    %54 = vector.shape_cast %53 : vector<16x16x4xf32> to vector<256x4xf32>
    %c7 = arith.constant 7 : index
    %c0_44 = arith.constant 0 : index
    %c0_45 = arith.constant 0 : index
    %55 = vector.load %arg2[%c7, %c0_44, %c0_45] : memref<9x4x8xf32, #tpu.memory_space<vmem>>, vector<1x4x8xf32>
    %56 = vector.shape_cast %55 : vector<1x4x8xf32> to vector<4x8xf32>
    %cst_46 = arith.constant dense<0.000000e+00> : vector<256x8xf32>
    %57 = tpu.matmul %54, %56, %cst_46 {dimension_numbers = #tpu.dot_dimension_numbers<[1], [0], [0], [1], [0, 0, 1, 1], [], []>} : vector<256x4xf32>, vector<4x8xf32>, vector<256x8xf32> -> vector<256x8xf32>
    %58 = arith.addf %52, %57 : vector<256x8xf32>
    %59 = vector.extract_strided_slice %9 {offsets = [2, 2, 0], sizes = [16, 16, 4], strides = [1, 1, 1]} : vector<18x18x4xf32> to vector<16x16x4xf32>
    %60 = vector.shape_cast %59 : vector<16x16x4xf32> to vector<256x4xf32>
    %c8 = arith.constant 8 : index
    %c0_47 = arith.constant 0 : index
    %c0_48 = arith.constant 0 : index
    %61 = vector.load %arg2[%c8, %c0_47, %c0_48] : memref<9x4x8xf32, #tpu.memory_space<vmem>>, vector<1x4x8xf32>
    %62 = vector.shape_cast %61 : vector<1x4x8xf32> to vector<4x8xf32>
    %cst_49 = arith.constant dense<0.000000e+00> : vector<256x8xf32>
    %63 = tpu.matmul %60, %62, %cst_49 {dimension_numbers = #tpu.dot_dimension_numbers<[1], [0], [0], [1], [0, 0, 1, 1], [], []>} : vector<256x4xf32>, vector<4x8xf32>, vector<256x8xf32> -> vector<256x8xf32>
    %64 = arith.addf %58, %63 : vector<256x8xf32>
    %65 = vector.shape_cast %64 : vector<256x8xf32> to vector<16x16x8xf32>
    %c0_50 = arith.constant 0 : index
    %c0_51 = arith.constant 0 : index
    %c0_52 = arith.constant 0 : index
    %c0_53 = arith.constant 0 : index
    %66 = vector.load %arg3[%c0_50, %c0_51, %c0_52, %c0_53] : memref<1x16x16x8xf32, #tpu.memory_space<vmem>>, vector<1x16x16x8xf32>
    %67 = vector.shape_cast %66 : vector<1x16x16x8xf32> to vector<16x16x8xf32>
    %68 = vector.shape_cast %65 : vector<16x16x8xf32> to vector<1x16x16x8xf32>
    tpu.vector_store %arg3[%c0_50, %c0_51, %c0_52, %c0_53], %68 {strides = array<i32>} : memref<1x16x16x8xf32, #tpu.memory_space<vmem>>, vector<1x16x16x8xf32>,
    %cst_54 = arith.constant dense<0.000000e+00> : vector<8xf32>
    %69 = vector.multi_reduction <add>, %64, %cst_54 [0] : vector<256x8xf32> to vector<8xf32>
    %70 = vector.shape_cast %69 : vector<8xf32> to vector<1x8xf32>
    %71 = arith.mulf %64, %64 : vector<256x8xf32>
    %cst_55 = arith.constant dense<0.000000e+00> : vector<8xf32>
    %72 = vector.multi_reduction <add>, %71, %cst_55 [0] : vector<256x8xf32> to vector<8xf32>
    %73 = vector.shape_cast %72 : vector<8xf32> to vector<1x8xf32>
    %74 = tpu.concatenate %70, %73 in 0 : vector<1x8xf32>, vector<1x8xf32> -> vector<2x8xf32>
    %c0_56 = arith.constant 0 : index
    %c0_57 = arith.constant 0 : index
    %c0_58 = arith.constant 0 : index
    %75 = vector.load %arg4[%c0_56, %c0_57, %c0_58] : memref<1x2x8xf32, #tpu.memory_space<vmem>>, vector<1x2x8xf32>
    %76 = vector.shape_cast %75 : vector<1x2x8xf32> to vector<2x8xf32>
    %77 = vector.shape_cast %74 : vector<2x8xf32> to vector<1x2x8xf32>
    tpu.vector_store %arg4[%c0_56, %c0_57, %c0_58], %77 {strides = array<i32>} : memref<1x2x8xf32, #tpu.memory_space<vmem>>, vector<1x2x8xf32>,
    return
  }
  func.func @transform_0(%arg0: i32) -> (i32, i32, i32, i32) {
    %c0_i32 = arith.constant 0 : i32
    %c0_i32_0 = arith.constant 0 : i32
    %c0_i32_1 = arith.constant 0 : i32
    %c0_i32_2 = arith.constant 0 : i32
    return %arg0, %c0_i32, %c0_i32_0, %c0_i32_1 : i32, i32, i32, i32
  }
  func.func @transform_1(%arg0: i32) -> (i32, i32, i32) {
    %c0_i32 = arith.constant 0 : i32
    %c0_i32_0 = arith.constant 0 : i32
    %c0_i32_1 = arith.constant 0 : i32
    %c0_i32_2 = arith.constant 0 : i32
    return %c0_i32, %c0_i32_0, %c0_i32_1 : i32, i32, i32
  }
  func.func @transform_2(%arg0: i32) -> (i32, i32, i32, i32) {
    %c0_i32 = arith.constant 0 : i32
    %c0_i32_0 = arith.constant 0 : i32
    %c0_i32_1 = arith.constant 0 : i32
    %c0_i32_2 = arith.constant 0 : i32
    return %arg0, %c0_i32, %c0_i32_0, %c0_i32_1 : i32, i32, i32, i32
  }
  func.func @transform_3(%arg0: i32) -> (i32, i32, i32) {
    %c0_i32 = arith.constant 0 : i32
    %c0_i32_0 = arith.constant 0 : i32
    %c0_i32_1 = arith.constant 0 : i32
    return %arg0, %c0_i32, %c0_i32_0 : i32, i32, i32
  }
}

module attributes {stable_mosaic.version = 11 : i64} {
  func.func @_apply_bn_relu_kernel(%arg0: i32, %arg1: memref<2x8xf32, #tpu.memory_space<vmem>>, %arg2: memref<1x16x16x8xf32, #tpu.memory_space<vmem>>, %arg3: memref<1x16x16x8xf32, #tpu.memory_space<vmem>>) attributes {dimension_semantics = [#tpu.dimension_semantics<parallel>], iteration_bounds = array<i64: 2>, scalar_prefetch = 0 : i64, scratch_operands = 0 : i64, tpu.core_type = #tpu.core_type<tc>, window_params = [{pipeline_mode = #tpu.pipeline_mode<synchronous>, transform_indices = @transform_0, window_bounds = array<i64: 2, 8>}, {transform_indices = @transform_1, window_bounds = array<i64: 1, 16, 16, 8>}, {transform_indices = @transform_2, window_bounds = array<i64: 1, 16, 16, 8>}]} {
    %c0 = arith.constant 0 : index
    %c0_0 = arith.constant 0 : index
    %0 = vector.load %arg1[%c0, %c0_0] : memref<2x8xf32, #tpu.memory_space<vmem>>, vector<2x8xf32>
    %1 = vector.extract_strided_slice %0 {offsets = [0, 0], sizes = [1, 8], strides = [1, 1]} : vector<2x8xf32> to vector<1x8xf32>
    %2 = vector.shape_cast %1 : vector<1x8xf32> to vector<1x1x8xf32>
    %3 = vector.extract_strided_slice %0 {offsets = [1, 0], sizes = [1, 8], strides = [1, 1]} : vector<2x8xf32> to vector<1x8xf32>
    %4 = vector.shape_cast %3 : vector<1x8xf32> to vector<1x1x8xf32>
    %c0_1 = arith.constant 0 : index
    %c0_2 = arith.constant 0 : index
    %c0_3 = arith.constant 0 : index
    %c0_4 = arith.constant 0 : index
    %5 = vector.load %arg2[%c0_1, %c0_2, %c0_3, %c0_4] : memref<1x16x16x8xf32, #tpu.memory_space<vmem>>, vector<1x16x16x8xf32>
    %6 = vector.shape_cast %5 : vector<1x16x16x8xf32> to vector<16x16x8xf32>
    %7 = vector.broadcast %2 : vector<1x1x8xf32> to vector<16x16x8xf32>
    %8 = arith.mulf %6, %7 : vector<16x16x8xf32>
    %9 = vector.broadcast %4 : vector<1x1x8xf32> to vector<16x16x8xf32>
    %10 = arith.addf %8, %9 : vector<16x16x8xf32>
    %cst = arith.constant 0.000000e+00 : f32
    %11 = vector.broadcast %cst : f32 to vector<16x16x8xf32>
    %12 = arith.maximumf %10, %11 : vector<16x16x8xf32>
    %c0_5 = arith.constant 0 : index
    %c0_6 = arith.constant 0 : index
    %c0_7 = arith.constant 0 : index
    %c0_8 = arith.constant 0 : index
    %13 = vector.load %arg3[%c0_5, %c0_6, %c0_7, %c0_8] : memref<1x16x16x8xf32, #tpu.memory_space<vmem>>, vector<1x16x16x8xf32>
    %14 = vector.shape_cast %13 : vector<1x16x16x8xf32> to vector<16x16x8xf32>
    %15 = vector.shape_cast %12 : vector<16x16x8xf32> to vector<1x16x16x8xf32>
    tpu.vector_store %arg3[%c0_5, %c0_6, %c0_7, %c0_8], %15 {strides = array<i32>} : memref<1x16x16x8xf32, #tpu.memory_space<vmem>>, vector<1x16x16x8xf32>,
    return
  }
  func.func @transform_0(%arg0: i32) -> (i32, i32) {
    %c0_i32 = arith.constant 0 : i32
    %c0_i32_0 = arith.constant 0 : i32
    %c0_i32_1 = arith.constant 0 : i32
    return %c0_i32, %c0_i32_0 : i32, i32
  }
  func.func @transform_1(%arg0: i32) -> (i32, i32, i32, i32) {
    %c0_i32 = arith.constant 0 : i32
    %c0_i32_0 = arith.constant 0 : i32
    %c0_i32_1 = arith.constant 0 : i32
    %c0_i32_2 = arith.constant 0 : i32
    return %arg0, %c0_i32, %c0_i32_0, %c0_i32_1 : i32, i32, i32, i32
  }
  func.func @transform_2(%arg0: i32) -> (i32, i32, i32, i32) {
    %c0_i32 = arith.constant 0 : i32
    %c0_i32_0 = arith.constant 0 : i32
    %c0_i32_1 = arith.constant 0 : i32
    %c0_i32_2 = arith.constant 0 : i32
    return %arg0, %c0_i32, %c0_i32_0, %c0_i32_1 : i32, i32, i32, i32
  }
}

module attributes {stable_mosaic.version = 11 : i64} {
  func.func @_conv_stats_kernel(%arg0: i32, %arg1: memref<2x8xf32, #tpu.memory_space<vmem>>, %arg2: memref<1x16x16x8xf32, #tpu.memory_space<vmem>>, %arg3: memref<9x8x8xf32, #tpu.memory_space<vmem>>, %arg4: memref<1x16x16x8xf32, #tpu.memory_space<vmem>>, %arg5: memref<1x2x8xf32, #tpu.memory_space<vmem>>, %arg6: memref<18x18x8xf32, #tpu.memory_space<vmem>>) attributes {dimension_semantics = [#tpu.dimension_semantics<parallel>], iteration_bounds = array<i64: 2>, scalar_prefetch = 0 : i64, scratch_operands = 1 : i64, tpu.core_type = #tpu.core_type<tc>, window_params = [{pipeline_mode = #tpu.pipeline_mode<synchronous>, transform_indices = @transform_0, window_bounds = array<i64: 2, 8>}, {transform_indices = @transform_1, window_bounds = array<i64: 1, 16, 16, 8>}, {pipeline_mode = #tpu.pipeline_mode<synchronous>, transform_indices = @transform_2, window_bounds = array<i64: 9, 8, 8>}, {transform_indices = @transform_3, window_bounds = array<i64: 1, 16, 16, 8>}, {transform_indices = @transform_4, window_bounds = array<i64: 1, 2, 8>}]} {
    %c0 = arith.constant 0 : index
    %c0_0 = arith.constant 0 : index
    %c0_1 = arith.constant 0 : index
    %c0_2 = arith.constant 0 : index
    %0 = vector.load %arg2[%c0, %c0_0, %c0_1, %c0_2] : memref<1x16x16x8xf32, #tpu.memory_space<vmem>>, vector<1x16x16x8xf32>
    %1 = vector.shape_cast %0 : vector<1x16x16x8xf32> to vector<16x16x8xf32>
    %c0_3 = arith.constant 0 : index
    %c0_4 = arith.constant 0 : index
    %2 = vector.load %arg1[%c0_3, %c0_4] : memref<2x8xf32, #tpu.memory_space<vmem>>, vector<2x8xf32>
    %3 = vector.extract_strided_slice %2 {offsets = [0, 0], sizes = [1, 8], strides = [1, 1]} : vector<2x8xf32> to vector<1x8xf32>
    %4 = vector.shape_cast %3 : vector<1x8xf32> to vector<1x1x8xf32>
    %5 = vector.extract_strided_slice %2 {offsets = [1, 0], sizes = [1, 8], strides = [1, 1]} : vector<2x8xf32> to vector<1x8xf32>
    %6 = vector.shape_cast %5 : vector<1x8xf32> to vector<1x1x8xf32>
    %7 = vector.broadcast %4 : vector<1x1x8xf32> to vector<16x16x8xf32>
    %8 = arith.mulf %1, %7 : vector<16x16x8xf32>
    %9 = vector.broadcast %6 : vector<1x1x8xf32> to vector<16x16x8xf32>
    %10 = arith.addf %8, %9 : vector<16x16x8xf32>
    %cst = arith.constant 0.000000e+00 : f32
    %11 = vector.broadcast %cst : f32 to vector<16x16x8xf32>
    %12 = arith.maximumf %10, %11 : vector<16x16x8xf32>
    %cst_5 = arith.constant 0.000000e+00 : f32
    %13 = vector.broadcast %cst_5 : f32 to vector<1x18x8xf32>
    %cst_6 = arith.constant 0.000000e+00 : f32
    %14 = vector.broadcast %cst_6 : f32 to vector<16x1x8xf32>
    %c0_7 = arith.constant 0 : index
    %c0_8 = arith.constant 0 : index
    %c0_9 = arith.constant 0 : index
    %15 = vector.load %arg6[%c0_7, %c0_8, %c0_9] : memref<18x18x8xf32, #tpu.memory_space<vmem>>, vector<1x18x8xf32>
    tpu.vector_store %arg6[%c0_7, %c0_8, %c0_9], %13 {strides = array<i32>} : memref<18x18x8xf32, #tpu.memory_space<vmem>>, vector<1x18x8xf32>,
    %c17 = arith.constant 17 : index
    %c0_10 = arith.constant 0 : index
    %c0_11 = arith.constant 0 : index
    %16 = vector.load %arg6[%c17, %c0_10, %c0_11] : memref<18x18x8xf32, #tpu.memory_space<vmem>>, vector<1x18x8xf32>
    tpu.vector_store %arg6[%c17, %c0_10, %c0_11], %13 {strides = array<i32>} : memref<18x18x8xf32, #tpu.memory_space<vmem>>, vector<1x18x8xf32>,
    %c1 = arith.constant 1 : index
    %c0_12 = arith.constant 0 : index
    %c0_13 = arith.constant 0 : index
    %17 = vector.load %arg6[%c1, %c0_12, %c0_13] : memref<18x18x8xf32, #tpu.memory_space<vmem>>, vector<16x1x8xf32>
    tpu.vector_store %arg6[%c1, %c0_12, %c0_13], %14 {strides = array<i32>} : memref<18x18x8xf32, #tpu.memory_space<vmem>>, vector<16x1x8xf32>,
    %c1_14 = arith.constant 1 : index
    %c17_15 = arith.constant 17 : index
    %c0_16 = arith.constant 0 : index
    %18 = vector.load %arg6[%c1_14, %c17_15, %c0_16] : memref<18x18x8xf32, #tpu.memory_space<vmem>>, vector<16x1x8xf32>
    tpu.vector_store %arg6[%c1_14, %c17_15, %c0_16], %14 {strides = array<i32>} : memref<18x18x8xf32, #tpu.memory_space<vmem>>, vector<16x1x8xf32>,
    %c1_17 = arith.constant 1 : index
    %c1_18 = arith.constant 1 : index
    %c0_19 = arith.constant 0 : index
    %19 = vector.load %arg6[%c1_17, %c1_18, %c0_19] : memref<18x18x8xf32, #tpu.memory_space<vmem>>, vector<16x16x8xf32>
    tpu.vector_store %arg6[%c1_17, %c1_18, %c0_19], %12 {strides = array<i32>} : memref<18x18x8xf32, #tpu.memory_space<vmem>>, vector<16x16x8xf32>,
    %c0_20 = arith.constant 0 : index
    %c0_21 = arith.constant 0 : index
    %c0_22 = arith.constant 0 : index
    %20 = vector.load %arg6[%c0_20, %c0_21, %c0_22] : memref<18x18x8xf32, #tpu.memory_space<vmem>>, vector<18x18x8xf32>
    %cst_23 = arith.constant 0.000000e+00 : f32
    %21 = vector.broadcast %cst_23 : f32 to vector<256x8xf32>
    %22 = vector.extract_strided_slice %20 {offsets = [0, 0, 0], sizes = [16, 16, 8], strides = [1, 1, 1]} : vector<18x18x8xf32> to vector<16x16x8xf32>
    %23 = vector.shape_cast %22 : vector<16x16x8xf32> to vector<256x8xf32>
    %c0_24 = arith.constant 0 : index
    %c0_25 = arith.constant 0 : index
    %c0_26 = arith.constant 0 : index
    %24 = vector.load %arg3[%c0_24, %c0_25, %c0_26] : memref<9x8x8xf32, #tpu.memory_space<vmem>>, vector<1x8x8xf32>
    %25 = vector.shape_cast %24 : vector<1x8x8xf32> to vector<8x8xf32>
    %cst_27 = arith.constant dense<0.000000e+00> : vector<256x8xf32>
    %26 = tpu.matmul %23, %25, %cst_27 {dimension_numbers = #tpu.dot_dimension_numbers<[1], [0], [0], [1], [0, 0, 1, 1], [], []>} : vector<256x8xf32>, vector<8x8xf32>, vector<256x8xf32> -> vector<256x8xf32>
    %27 = arith.addf %21, %26 : vector<256x8xf32>
    %28 = vector.extract_strided_slice %20 {offsets = [0, 1, 0], sizes = [16, 16, 8], strides = [1, 1, 1]} : vector<18x18x8xf32> to vector<16x16x8xf32>
    %29 = vector.shape_cast %28 : vector<16x16x8xf32> to vector<256x8xf32>
    %c1_28 = arith.constant 1 : index
    %c0_29 = arith.constant 0 : index
    %c0_30 = arith.constant 0 : index
    %30 = vector.load %arg3[%c1_28, %c0_29, %c0_30] : memref<9x8x8xf32, #tpu.memory_space<vmem>>, vector<1x8x8xf32>
    %31 = vector.shape_cast %30 : vector<1x8x8xf32> to vector<8x8xf32>
    %cst_31 = arith.constant dense<0.000000e+00> : vector<256x8xf32>
    %32 = tpu.matmul %29, %31, %cst_31 {dimension_numbers = #tpu.dot_dimension_numbers<[1], [0], [0], [1], [0, 0, 1, 1], [], []>} : vector<256x8xf32>, vector<8x8xf32>, vector<256x8xf32> -> vector<256x8xf32>
    %33 = arith.addf %27, %32 : vector<256x8xf32>
    %34 = vector.extract_strided_slice %20 {offsets = [0, 2, 0], sizes = [16, 16, 8], strides = [1, 1, 1]} : vector<18x18x8xf32> to vector<16x16x8xf32>
    %35 = vector.shape_cast %34 : vector<16x16x8xf32> to vector<256x8xf32>
    %c2 = arith.constant 2 : index
    %c0_32 = arith.constant 0 : index
    %c0_33 = arith.constant 0 : index
    %36 = vector.load %arg3[%c2, %c0_32, %c0_33] : memref<9x8x8xf32, #tpu.memory_space<vmem>>, vector<1x8x8xf32>
    %37 = vector.shape_cast %36 : vector<1x8x8xf32> to vector<8x8xf32>
    %cst_34 = arith.constant dense<0.000000e+00> : vector<256x8xf32>
    %38 = tpu.matmul %35, %37, %cst_34 {dimension_numbers = #tpu.dot_dimension_numbers<[1], [0], [0], [1], [0, 0, 1, 1], [], []>} : vector<256x8xf32>, vector<8x8xf32>, vector<256x8xf32> -> vector<256x8xf32>
    %39 = arith.addf %33, %38 : vector<256x8xf32>
    %40 = vector.extract_strided_slice %20 {offsets = [1, 0, 0], sizes = [16, 16, 8], strides = [1, 1, 1]} : vector<18x18x8xf32> to vector<16x16x8xf32>
    %41 = vector.shape_cast %40 : vector<16x16x8xf32> to vector<256x8xf32>
    %c3 = arith.constant 3 : index
    %c0_35 = arith.constant 0 : index
    %c0_36 = arith.constant 0 : index
    %42 = vector.load %arg3[%c3, %c0_35, %c0_36] : memref<9x8x8xf32, #tpu.memory_space<vmem>>, vector<1x8x8xf32>
    %43 = vector.shape_cast %42 : vector<1x8x8xf32> to vector<8x8xf32>
    %cst_37 = arith.constant dense<0.000000e+00> : vector<256x8xf32>
    %44 = tpu.matmul %41, %43, %cst_37 {dimension_numbers = #tpu.dot_dimension_numbers<[1], [0], [0], [1], [0, 0, 1, 1], [], []>} : vector<256x8xf32>, vector<8x8xf32>, vector<256x8xf32> -> vector<256x8xf32>
    %45 = arith.addf %39, %44 : vector<256x8xf32>
    %46 = vector.extract_strided_slice %20 {offsets = [1, 1, 0], sizes = [16, 16, 8], strides = [1, 1, 1]} : vector<18x18x8xf32> to vector<16x16x8xf32>
    %47 = vector.shape_cast %46 : vector<16x16x8xf32> to vector<256x8xf32>
    %c4 = arith.constant 4 : index
    %c0_38 = arith.constant 0 : index
    %c0_39 = arith.constant 0 : index
    %48 = vector.load %arg3[%c4, %c0_38, %c0_39] : memref<9x8x8xf32, #tpu.memory_space<vmem>>, vector<1x8x8xf32>
    %49 = vector.shape_cast %48 : vector<1x8x8xf32> to vector<8x8xf32>
    %cst_40 = arith.constant dense<0.000000e+00> : vector<256x8xf32>
    %50 = tpu.matmul %47, %49, %cst_40 {dimension_numbers = #tpu.dot_dimension_numbers<[1], [0], [0], [1], [0, 0, 1, 1], [], []>} : vector<256x8xf32>, vector<8x8xf32>, vector<256x8xf32> -> vector<256x8xf32>
    %51 = arith.addf %45, %50 : vector<256x8xf32>
    %52 = vector.extract_strided_slice %20 {offsets = [1, 2, 0], sizes = [16, 16, 8], strides = [1, 1, 1]} : vector<18x18x8xf32> to vector<16x16x8xf32>
    %53 = vector.shape_cast %52 : vector<16x16x8xf32> to vector<256x8xf32>
    %c5 = arith.constant 5 : index
    %c0_41 = arith.constant 0 : index
    %c0_42 = arith.constant 0 : index
    %54 = vector.load %arg3[%c5, %c0_41, %c0_42] : memref<9x8x8xf32, #tpu.memory_space<vmem>>, vector<1x8x8xf32>
    %55 = vector.shape_cast %54 : vector<1x8x8xf32> to vector<8x8xf32>
    %cst_43 = arith.constant dense<0.000000e+00> : vector<256x8xf32>
    %56 = tpu.matmul %53, %55, %cst_43 {dimension_numbers = #tpu.dot_dimension_numbers<[1], [0], [0], [1], [0, 0, 1, 1], [], []>} : vector<256x8xf32>, vector<8x8xf32>, vector<256x8xf32> -> vector<256x8xf32>
    %57 = arith.addf %51, %56 : vector<256x8xf32>
    %58 = vector.extract_strided_slice %20 {offsets = [2, 0, 0], sizes = [16, 16, 8], strides = [1, 1, 1]} : vector<18x18x8xf32> to vector<16x16x8xf32>
    %59 = vector.shape_cast %58 : vector<16x16x8xf32> to vector<256x8xf32>
    %c6 = arith.constant 6 : index
    %c0_44 = arith.constant 0 : index
    %c0_45 = arith.constant 0 : index
    %60 = vector.load %arg3[%c6, %c0_44, %c0_45] : memref<9x8x8xf32, #tpu.memory_space<vmem>>, vector<1x8x8xf32>
    %61 = vector.shape_cast %60 : vector<1x8x8xf32> to vector<8x8xf32>
    %cst_46 = arith.constant dense<0.000000e+00> : vector<256x8xf32>
    %62 = tpu.matmul %59, %61, %cst_46 {dimension_numbers = #tpu.dot_dimension_numbers<[1], [0], [0], [1], [0, 0, 1, 1], [], []>} : vector<256x8xf32>, vector<8x8xf32>, vector<256x8xf32> -> vector<256x8xf32>
    %63 = arith.addf %57, %62 : vector<256x8xf32>
    %64 = vector.extract_strided_slice %20 {offsets = [2, 1, 0], sizes = [16, 16, 8], strides = [1, 1, 1]} : vector<18x18x8xf32> to vector<16x16x8xf32>
    %65 = vector.shape_cast %64 : vector<16x16x8xf32> to vector<256x8xf32>
    %c7 = arith.constant 7 : index
    %c0_47 = arith.constant 0 : index
    %c0_48 = arith.constant 0 : index
    %66 = vector.load %arg3[%c7, %c0_47, %c0_48] : memref<9x8x8xf32, #tpu.memory_space<vmem>>, vector<1x8x8xf32>
    %67 = vector.shape_cast %66 : vector<1x8x8xf32> to vector<8x8xf32>
    %cst_49 = arith.constant dense<0.000000e+00> : vector<256x8xf32>
    %68 = tpu.matmul %65, %67, %cst_49 {dimension_numbers = #tpu.dot_dimension_numbers<[1], [0], [0], [1], [0, 0, 1, 1], [], []>} : vector<256x8xf32>, vector<8x8xf32>, vector<256x8xf32> -> vector<256x8xf32>
    %69 = arith.addf %63, %68 : vector<256x8xf32>
    %70 = vector.extract_strided_slice %20 {offsets = [2, 2, 0], sizes = [16, 16, 8], strides = [1, 1, 1]} : vector<18x18x8xf32> to vector<16x16x8xf32>
    %71 = vector.shape_cast %70 : vector<16x16x8xf32> to vector<256x8xf32>
    %c8 = arith.constant 8 : index
    %c0_50 = arith.constant 0 : index
    %c0_51 = arith.constant 0 : index
    %72 = vector.load %arg3[%c8, %c0_50, %c0_51] : memref<9x8x8xf32, #tpu.memory_space<vmem>>, vector<1x8x8xf32>
    %73 = vector.shape_cast %72 : vector<1x8x8xf32> to vector<8x8xf32>
    %cst_52 = arith.constant dense<0.000000e+00> : vector<256x8xf32>
    %74 = tpu.matmul %71, %73, %cst_52 {dimension_numbers = #tpu.dot_dimension_numbers<[1], [0], [0], [1], [0, 0, 1, 1], [], []>} : vector<256x8xf32>, vector<8x8xf32>, vector<256x8xf32> -> vector<256x8xf32>
    %75 = arith.addf %69, %74 : vector<256x8xf32>
    %76 = vector.shape_cast %75 : vector<256x8xf32> to vector<16x16x8xf32>
    %c0_53 = arith.constant 0 : index
    %c0_54 = arith.constant 0 : index
    %c0_55 = arith.constant 0 : index
    %c0_56 = arith.constant 0 : index
    %77 = vector.load %arg4[%c0_53, %c0_54, %c0_55, %c0_56] : memref<1x16x16x8xf32, #tpu.memory_space<vmem>>, vector<1x16x16x8xf32>
    %78 = vector.shape_cast %77 : vector<1x16x16x8xf32> to vector<16x16x8xf32>
    %79 = vector.shape_cast %76 : vector<16x16x8xf32> to vector<1x16x16x8xf32>
    tpu.vector_store %arg4[%c0_53, %c0_54, %c0_55, %c0_56], %79 {strides = array<i32>} : memref<1x16x16x8xf32, #tpu.memory_space<vmem>>, vector<1x16x16x8xf32>,
    %cst_57 = arith.constant dense<0.000000e+00> : vector<8xf32>
    %80 = vector.multi_reduction <add>, %75, %cst_57 [0] : vector<256x8xf32> to vector<8xf32>
    %81 = vector.shape_cast %80 : vector<8xf32> to vector<1x8xf32>
    %82 = arith.mulf %75, %75 : vector<256x8xf32>
    %cst_58 = arith.constant dense<0.000000e+00> : vector<8xf32>
    %83 = vector.multi_reduction <add>, %82, %cst_58 [0] : vector<256x8xf32> to vector<8xf32>
    %84 = vector.shape_cast %83 : vector<8xf32> to vector<1x8xf32>
    %85 = tpu.concatenate %81, %84 in 0 : vector<1x8xf32>, vector<1x8xf32> -> vector<2x8xf32>
    %c0_59 = arith.constant 0 : index
    %c0_60 = arith.constant 0 : index
    %c0_61 = arith.constant 0 : index
    %86 = vector.load %arg5[%c0_59, %c0_60, %c0_61] : memref<1x2x8xf32, #tpu.memory_space<vmem>>, vector<1x2x8xf32>
    %87 = vector.shape_cast %86 : vector<1x2x8xf32> to vector<2x8xf32>
    %88 = vector.shape_cast %85 : vector<2x8xf32> to vector<1x2x8xf32>
    tpu.vector_store %arg5[%c0_59, %c0_60, %c0_61], %88 {strides = array<i32>} : memref<1x2x8xf32, #tpu.memory_space<vmem>>, vector<1x2x8xf32>,
    return
  }
  func.func @transform_0(%arg0: i32) -> (i32, i32) {
    %c0_i32 = arith.constant 0 : i32
    %c0_i32_0 = arith.constant 0 : i32
    %c0_i32_1 = arith.constant 0 : i32
    return %c0_i32, %c0_i32_0 : i32, i32
  }
  func.func @transform_1(%arg0: i32) -> (i32, i32, i32, i32) {
    %c0_i32 = arith.constant 0 : i32
    %c0_i32_0 = arith.constant 0 : i32
    %c0_i32_1 = arith.constant 0 : i32
    %c0_i32_2 = arith.constant 0 : i32
    return %arg0, %c0_i32, %c0_i32_0, %c0_i32_1 : i32, i32, i32, i32
  }
  func.func @transform_2(%arg0: i32) -> (i32, i32, i32) {
    %c0_i32 = arith.constant 0 : i32
    %c0_i32_0 = arith.constant 0 : i32
    %c0_i32_1 = arith.constant 0 : i32
    %c0_i32_2 = arith.constant 0 : i32
    return %c0_i32, %c0_i32_0, %c0_i32_1 : i32, i32, i32
  }
  func.func @transform_3(%arg0: i32) -> (i32, i32, i32, i32) {
    %c0_i32 = arith.constant 0 : i32
    %c0_i32_0 = arith.constant 0 : i32
    %c0_i32_1 = arith.constant 0 : i32
    %c0_i32_2 = arith.constant 0 : i32
    return %arg0, %c0_i32, %c0_i32_0, %c0_i32_1 : i32, i32, i32, i32
  }
  func.func @transform_4(%arg0: i32) -> (i32, i32, i32) {
    %c0_i32 = arith.constant 0 : i32
    %c0_i32_0 = arith.constant 0 : i32
    %c0_i32_1 = arith.constant 0 : i32
    return %arg0, %c0_i32, %c0_i32_0 : i32, i32, i32
  }
}

</mosaic_0001>

<bundles_post_ra>
// kernel: double_conv_forward.5
= control target key start
LH: loop header
LB: loop body
LE: loop exit
PB: predicated region body
PF: predicated region fallthrough
CT: control target
= control target key end

     0   :  { %s413_s9 = smov 0   ;;  %s608_s0 = inlined_call_operand.vmem [shape: f32[2,8], index: 0, kind: input, shape index: {}]   ;;  %s609_s1 = inlined_call_operand.vmem [shape: f32[2,16,16,8], index: 1, kind: input, shape index: {}]   ;;  %s610_s2 = inlined_call_operand.vmem [shape: f32[2,16,16,8], index: 2, kind: output, shape index: {}]  }
   0x1 LB: > { %s369_s10 = sadd.s32 4294967295, %s396_s9   ;;  %p373_p0 = scmp.ge.s32.totalorder %s396_s9, 1  ;;  %s396_s9 = sphi %s413_s9, %s12_s9  }
   0x2   : > { %p112_p1 = scmp.lt.s32.totalorder %s396_s9, 3 }
   0x4   : > { %p113_p2 = pnand %p373_p0, %p112_p1 }
   0x5   : > { %p134_p3 = scmp.lt.s32.totalorder (!%p113_p2), %s369_s10, 1  ;;  %v177_v0 = vlaneseq (!%p113_p2)  ;;  %v144_v2 = vld [vmem:[%s608_s0] sm:$0x3] (!%p113_p2)  ;;  %vm281_vm0 = vcmask (!%p113_p2), 64512  }
   0x6   : > { %116 = sbr.rel (%p113_p2) target bundleno = 48 (0x30), region = 28 }
   0x7   : > { %v178_v1 = vshrl.u32 (!%p113_p2), %v177_v0, 7 }
   0x9   : > { %v179_v3 = vsub.s32 (!%p113_p2), 0, %v178_v1  ;;  %v215_v4 = vsub.s32 (!%p113_p2), 1, %v178_v1 }
   0xb   : > { %v435_v6 = vrot.slane (!%p113_p2), %v144_v2, %v179_v3  ;;  %v437_v7 = vrot.slane (!%p113_p2), %v144_v2, %v215_v4 }
   0xd   : > { %s612_s10 = smov (!%p134_p3, %s369_s10), 1 }
   0xe   : > { %s380_s13 = sshll.u32 %s612_s10, 8 }
   0xf   : > { %s432_s16 = scalar_lea.vmem %s609_s1, %s380_s13  ;;  %s466_s19 = scalar_lea.vmem %s610_s2, %s380_s13 }
  0x10   : > { %v145_v5 = vld [vmem:[%s432_s16] sm:$0xff]  ;;  %v146_v8 = vld [vmem:[%s432_s16 + $0x8] sm:$0xff]  ;;  %v147_v9 = vld [vmem:[%s432_s16 + $0x10] sm:$0xff] }
  0x11   : > { %v148_v10 = vld [vmem:[%s432_s16 + $0x18] sm:$0xff]  ;;  %v149_v11 = vld [vmem:[%s432_s16 + $0x20] sm:$0xff]  ;;  %v150_v12 = vld [vmem:[%s432_s16 + $0x28] sm:$0xff]  ;;  %v181_v13 = vmul.f32 %v435_v6, %v145_v5  ;;  %v182_v14 = vmul.f32 %v435_v6, %v146_v8  ;;  %v183_v15 = vmul.f32 %v435_v6, %v147_v9 }
  0x12   : > { %v184_v16 = vmul.f32 %v435_v6, %v148_v10  ;;  %v151_v17 = vld [vmem:[%s432_s16 + $0x30] sm:$0xff]  ;;  %v152_v18 = vld [vmem:[%s432_s16 + $0x38] sm:$0xff]  ;;  %v185_v19 = vmul.f32 %v435_v6, %v149_v11  ;;  %v186_v20 = vmul.f32 %v435_v6, %v150_v12  ;;  %v153_v27 = vld [vmem:[%s432_s16 + $0x40] sm:$0xff] }
  0x13   : > { %v187_v21 = vmul.f32 %v435_v6, %v151_v17  ;;  %v188_v22 = vmul.f32 %v435_v6, %v152_v18  ;;  %v217_v23 = vadd.f32 %v437_v7, %v181_v13  ;;  %v218_v24 = vadd.f32 %v437_v7, %v182_v14  ;;  %v154_v28 = vld [vmem:[%s432_s16 + $0x48] sm:$0xff]  ;;  %v155_v29 = vld [vmem:[%s432_s16 + $0x50] sm:$0xff]  ;;  %v156_v34 = vld [vmem:[%s432_s16 + $0x58] sm:$0xff] }
  0x14   : > { %v219_v25 = vadd.f32 %v437_v7, %v183_v15  ;;  %v220_v26 = vadd.f32 %v437_v7, %v184_v16  ;;  %v221_v30 = vadd.f32 %v437_v7, %v185_v19  ;;  %v222_v31 = vadd.f32 %v437_v7, %v186_v20  ;;  %v157_v35 = vld [vmem:[%s432_s16 + $0x60] sm:$0xff]  ;;  %v158_v36 = vld [vmem:[%s432_s16 + $0x68] sm:$0xff]  ;;  %v159_v41 = vld [vmem:[%s432_s16 + $0x70] sm:$0xff] }
  0x15   : > { %v223_v32 = vadd.f32 %v437_v7, %v187_v21  ;;  %v224_v33 = vadd.f32 %v437_v7, %v188_v22  ;;  %v249_v37 = vmax.f32 %v217_v23, 0.0  ;;  %v250_v38 = vmax.f32 %v218_v24, 0.0  ;;  %v160_v42 = vld [vmem:[%s432_s16 + $0x78] sm:$0xff]  ;;  %v161_v59 = vld [vmem:[%s432_s16 + $0x80] sm:$0xff]  ;;  %v162_v60 = vld [vmem:[%s432_s16 + $0x88] sm:$0xff] }
  0x16   : > { %v251_v39 = vmax.f32 %v219_v25, 0.0  ;;  %v252_v40 = vmax.f32 %v220_v26, 0.0  ;;  %v253_v43 = vmax.f32 %v221_v30, 0.0  ;;  %v254_v44 = vmax.f32 %v222_v31, 0.0  ;;  %v163_v61 = vld [vmem:[%s432_s16 + $0x90] sm:$0xff]  ;;  %v164_v2 = vld [vmem:[%s432_s16 + $0x98] sm:$0xff] }
  0x17   : > { %v255_v45 = vmax.f32 %v223_v32, 0.0  ;;  %v256_v46 = vmax.f32 %v224_v33, 0.0  ;;  %282 = vst.msk [vmem:[%s466_s19] sm:$0xff] %vm281_vm0, %v249_v37  ;;  %283 = vst.msk [vmem:[%s466_s19 + $0x8] sm:$0xff] %vm281_vm0, %v250_v38  ;;  %v189_v47 = vmul.f32 %v435_v6, %v153_v27  ;;  %v190_v48 = vmul.f32 %v435_v6, %v154_v28  ;;  %v165_v3 = vld [vmem:[%s432_s16 + $0xa0] sm:$0xff]  ;;  %v166_v4 = vld [vmem:[%s432_s16 + $0xa8] sm:$0xff] }
  0x18   : > { %284 = vst.msk [vmem:[%s466_s19 + $0x10] sm:$0xff] %vm281_vm0, %v251_v39  ;;  %285 = vst.msk [vmem:[%s466_s19 + $0x18] sm:$0xff] %vm281_vm0, %v252_v40  ;;  %v191_v49 = vmul.f32 %v435_v6, %v155_v29  ;;  %v192_v50 = vmul.f32 %v435_v6, %v156_v34  ;;  %v193_v51 = vmul.f32 %v435_v6, %v157_v35  ;;  %v167_v11 = vld [vmem:[%s432_s16 + $0xb0] sm:$0xff]  ;;  %v168_v12 = vld [vmem:[%s432_s16 + $0xb8] sm:$0xff] }
  0x19   : > { %286 = vst.msk [vmem:[%s466_s19 + $0x20] sm:$0xff] %vm281_vm0, %v253_v43  ;;  %287 = vst.msk [vmem:[%s466_s19 + $0x28] sm:$0xff] %vm281_vm0, %v254_v44  ;;  %v194_v52 = vmul.f32 %v435_v6, %v158_v36  ;;  %v195_v53 = vmul.f32 %v435_v6, %v159_v41  ;;  %v196_v54 = vmul.f32 %v435_v6, %v160_v42  ;;  %v169_v29 = vld [vmem:[%s432_s16 + $0xc0] sm:$0xff]  ;;  %v170_v30 = vld [vmem:[%s432_s16 + $0xc8] sm:$0xff] }
  0x1a   : > { %288 = vst.msk [vmem:[%s466_s19 + $0x30] sm:$0xff] %vm281_vm0, %v255_v45  ;;  %289 = vst.msk [vmem:[%s466_s19 + $0x38] sm:$0xff] %vm281_vm0, %v256_v46  ;;  %v225_v55 = vadd.f32 %v437_v7, %v189_v47  ;;  %v226_v56 = vadd.f32 %v437_v7, %v190_v48  ;;  %v227_v57 = vadd.f32 %v437_v7, %v191_v49  ;;  %v171_v31 = vld [vmem:[%s432_s16 + $0xd0] sm:$0xff]  ;;  %v172_v36 = vld [vmem:[%s432_s16 + $0xd8] sm:$0xff] }
  0x1b   : > { %v228_v58 = vadd.f32 %v437_v7, %v192_v50  ;;  %v229_v62 = vadd.f32 %v437_v7, %v193_v51  ;;  %v230_v63 = vadd.f32 %v437_v7, %v194_v52  ;;  %v231_v0 = vadd.f32 %v437_v7, %v195_v53  ;;  %v173_v37 = vld [vmem:[%s432_s16 + $0xe0] sm:$0xff]  ;;  %v174_v38 = vld [vmem:[%s432_s16 + $0xe8] sm:$0xff]  ;;  %v175_v43 = vld [vmem:[%s432_s16 + $0xf0] sm:$0xff] }
  0x1c   : > { %v232_v1 = vadd.f32 %v437_v7, %v196_v54  ;;  %v257_v5 = vmax.f32 %v225_v55, 0.0  ;;  %v258_v8 = vmax.f32 %v226_v56, 0.0  ;;  %v259_v9 = vmax.f32 %v227_v57, 0.0  ;;  %v176_v44 = vld [vmem:[%s432_s16 + $0xf8] sm:$0xff] }
  0x1d   : > { %v260_v10 = vmax.f32 %v228_v58, 0.0  ;;  %v261_v13 = vmax.f32 %v229_v62, 0.0  ;;  %v262_v14 = vmax.f32 %v230_v63, 0.0  ;;  %v263_v15 = vmax.f32 %v231_v0, 0.0 }
  0x1e   : > { %v264_v16 = vmax.f32 %v232_v1, 0.0  ;;  %290 = vst.msk [vmem:[%s466_s19 + $0x40] sm:$0xff] %vm281_vm0, %v257_v5  ;;  %291 = vst.msk [vmem:[%s466_s19 + $0x48] sm:$0xff] %vm281_vm0, %v258_v8  ;;  %v197_v17 = vmul.f32 %v435_v6, %v161_v59  ;;  %v198_v18 = vmul.f32 %v435_v6, %v162_v60  ;;  %v199_v19 = vmul.f32 %v435_v6, %v163_v61 }
  0x1f   : > { %292 = vst.msk [vmem:[%s466_s19 + $0x50] sm:$0xff] %vm281_vm0, %v259_v9  ;;  %293 = vst.msk [vmem:[%s466_s19 + $0x58] sm:$0xff] %vm281_vm0, %v260_v10  ;;  %v200_v20 = vmul.f32 %v435_v6, %v164_v2  ;;  %v201_v21 = vmul.f32 %v435_v6, %v165_v3  ;;  %v202_v22 = vmul.f32 %v435_v6, %v166_v4 }
  0x20   : > { %294 = vst.msk [vmem:[%s466_s19 + $0x60] sm:$0xff] %vm281_vm0, %v261_v13  ;;  %295 = vst.msk [vmem:[%s466_s19 + $0x68] sm:$0xff] %vm281_vm0, %v262_v14  ;;  %v203_v23 = vmul.f32 %v435_v6, %v167_v11  ;;  %v204_v24 = vmul.f32 %v435_v6, %v168_v12  ;;  %v233_v25 = vadd.f32 %v437_v7, %v197_v17 }
  0x21   : > { %296 = vst.msk [vmem:[%s466_s19 + $0x70] sm:$0xff] %vm281_vm0, %v263_v15  ;;  %297 = vst.msk [vmem:[%s466_s19 + $0x78] sm:$0xff] %vm281_vm0, %v264_v16  ;;  %v234_v26 = vadd.f32 %v437_v7, %v198_v18  ;;  %v235_v27 = vadd.f32 %v437_v7, %v199_v19  ;;  %v236_v28 = vadd.f32 %v437_v7, %v200_v20 }
  0x22   : > { %v237_v32 = vadd.f32 %v437_v7, %v201_v21  ;;  %v238_v33 = vadd.f32 %v437_v7, %v202_v22  ;;  %v239_v34 = vadd.f32 %v437_v7, %v203_v23  ;;  %v240_v35 = vadd.f32 %v437_v7, %v204_v24 }
  0x23   : > { %v265_v39 = vmax.f32 %v233_v25, 0.0  ;;  %v266_v40 = vmax.f32 %v234_v26, 0.0  ;;  %v267_v41 = vmax.f32 %v235_v27, 0.0  ;;  %v268_v42 = vmax.f32 %v236_v28, 0.0 }
  0x24   : > { %v269_v45 = vmax.f32 %v237_v32, 0.0  ;;  %v270_v46 = vmax.f32 %v238_v33, 0.0  ;;  %v271_v47 = vmax.f32 %v239_v34, 0.0  ;;  %v272_v48 = vmax.f32 %v240_v35, 0.0 }
  0x25   : > { %298 = vst.msk [vmem:[%s466_s19 + $0x80] sm:$0xff] %vm281_vm0, %v265_v39  ;;  %299 = vst.msk [vmem:[%s466_s19 + $0x88] sm:$0xff] %vm281_vm0, %v266_v40  ;;  %v205_v49 = vmul.f32 %v435_v6, %v169_v29  ;;  %v206_v50 = vmul.f32 %v435_v6, %v170_v30  ;;  %v207_v51 = vmul.f32 %v435_v6, %v171_v31 }
  0x26   : > { %300 = vst.msk [vmem:[%s466_s19 + $0x90] sm:$0xff] %vm281_vm0, %v267_v41  ;;  %301 = vst.msk [vmem:[%s466_s19 + $0x98] sm:$0xff] %vm281_vm0, %v268_v42  ;;  %v208_v52 = vmul.f32 %v435_v6, %v172_v36  ;;  %v209_v53 = vmul.f32 %v435_v6, %v173_v37  ;;  %v210_v54 = vmul.f32 %v435_v6, %v174_v38 }
  0x27   : > { %302 = vst.msk [vmem:[%s466_s19 + $0xa0] sm:$0xff] %vm281_vm0, %v269_v45  ;;  %303 = vst.msk [vmem:[%s466_s19 + $0xa8] sm:$0xff] %vm281_vm0, %v270_v46  ;;  %v211_v55 = vmul.f32 %v435_v6, %v175_v43  ;;  %v212_v56 = vmul.f32 %v435_v6, %v176_v44  ;;  %v241_v57 = vadd.f32 %v437_v7, %v205_v49 }
  0x28   : > { %304 = vst.msk [vmem:[%s466_s19 + $0xb0] sm:$0xff] %vm281_vm0, %v271_v47  ;;  %305 = vst.msk [vmem:[%s466_s19 + $0xb8] sm:$0xff] %vm281_vm0, %v272_v48  ;;  %v242_v58 = vadd.f32 %v437_v7, %v206_v50  ;;  %v243_v59 = vadd.f32 %v437_v7, %v207_v51  ;;  %v244_v60 = vadd.f32 %v437_v7, %v208_v52 }
  0x29   : > { %v245_v61 = vadd.f32 %v437_v7, %v209_v53  ;;  %v246_v62 = vadd.f32 %v437_v7, %v210_v54  ;;  %v247_v6 = vadd.f32 %v437_v7, %v211_v55  ;;  %v248_v63 = vadd.f32 %v437_v7, %v212_v56 }
  0x2a   : > { %v273_v0 = vmax.f32 %v241_v57, 0.0  ;;  %v274_v1 = vmax.f32 %v242_v58, 0.0  ;;  %v275_v2 = vmax.f32 %v243_v59, 0.0  ;;  %v276_v3 = vmax.f32 %v244_v60, 0.0 }
  0x2b   : > { %v277_v4 = vmax.f32 %v245_v61, 0.0  ;;  %v278_v5 = vmax.f32 %v246_v62, 0.0  ;;  %v279_v8 = vmax.f32 %v247_v6, 0.0  ;;  %v280_v9 = vmax.f32 %v248_v63, 0.0 }
  0x2c   : > { %306 = vst.msk [vmem:[%s466_s19 + $0xc0] sm:$0xff] %vm281_vm0, %v273_v0  ;;  %307 = vst.msk [vmem:[%s466_s19 + $0xc8] sm:$0xff] %vm281_vm0, %v274_v1 }
  0x2d   : > { %308 = vst.msk [vmem:[%s466_s19 + $0xd0] sm:$0xff] %vm281_vm0, %v275_v2  ;;  %309 = vst.msk [vmem:[%s466_s19 + $0xd8] sm:$0xff] %vm281_vm0, %v276_v3 }
  0x2e   : > { %310 = vst.msk [vmem:[%s466_s19 + $0xe0] sm:$0xff] %vm281_vm0, %v277_v4  ;;  %311 = vst.msk [vmem:[%s466_s19 + $0xe8] sm:$0xff] %vm281_vm0, %v278_v5 }
  0x2f   : > { %312 = vst.msk [vmem:[%s466_s19 + $0xf0] sm:$0xff] %vm281_vm0, %v279_v8  ;;  %313 = vst.msk [vmem:[%s466_s19 + $0xf8] sm:$0xff] %vm281_vm0, %v280_v9 }
  0x30 PF: > { %s12_s9 = sadd.s32 1, %s396_s9  }
  0x31   : > { %p9_p4 = scmp.ge.s32.totalorder %s12_s9, 4  }
  0x33   :  { %11 = sbr.rel (!%p9_p4) target bundleno = 1 (0x1), region = 58 }

// kernel: double_conv_forward.3
= control target key start
LH: loop header
LB: loop body
LE: loop exit
PB: predicated region body
PF: predicated region fallthrough
CT: control target
= control target key end

     0   :  { %s4745_s12 = smov 0   ;;  %s6094_s0 = inlined_call_operand.vmem [shape: f32[2,16,16,4], index: 0, kind: input, shape index: {}]   ;;  %s6095_s1 = inlined_call_operand.vmem [shape: f32[9,4,8], index: 1, kind: input, shape index: {}]   ;;  %s6096_s2 = inlined_call_operand.vmem [shape: f32[2,16,16,8], index: 2, kind: output, shape index: {0}]   ;;  %s6097_s3 = inlined_call_operand.vmem [shape: f32[2,2,8], index: 3, kind: output, shape index: {1}]  }
   0x1 LB: > { %s3382_s13 = sadd.s32 4294967295, %s4722_s12   ;;  %p3386_p0 = scmp.ge.s32.totalorder %s4722_s12, 1  ;;  %s4722_s12 = sphi %s4745_s12, %s14_s12  }
   0x2   : > { %p140_p1 = scmp.lt.s32.totalorder %s4722_s12, 3 }
   0x4   : > { %p141_p2 = pnand %p3386_p0, %p140_p1 }
   0x6   : > { %144 = sbr.rel (%p141_p2) target bundleno = 565 (0x235), region = 28 }
   0xd   : > { %v3392_v0 = vld [vmem:[%s6095_s1 + $0x4] sm:$0xf]  ;;  %vm539_vm0 = vcmask 1043456   ;;  %vm214_vm1 = vcmask 31744   ;;  %v4724_v1 = vmov 0.0   ;;  %vm217_vm2 = vcmask 25600  }
   0xe   : > { %3998 = vmatprep.subr.msk.mxu1 %vm539_vm0, %v3392_v0  ;;  %215 = vst.msk [vmem:[#allocation2] sm:$0xff] %vm214_vm1, %v4724_v1  ;;  %216 = vst.msk [vmem:[#allocation2 + $0x8] sm:$0xff] %vm214_vm1, %v4724_v1  ;;  %v4764_v2 = vld [vmem:[%s6095_s1 + $0x10] sm:$0xf]  ;;  %p4768_p3 = scmp.lt.s32.totalorder %s3382_s13, 1  ;;  %vm224_vm3 = vcmask 24576  }
   0xf   : > { %220 = vst.msk [vmem:[#allocation2 + $0x198] sm:$0xff] %vm214_vm1, %v4724_v1  ;;  %221 = vst.msk [vmem:[#allocation2 + $0x1a0] sm:$0xff] %vm214_vm1, %v4724_v1  ;;  %3999 = vmatpush3.msk.msra.mxu1 %vm539_vm0, %v3392_v0  ;;  %4198 = vmatprep.subr.msk.mxu0 %vm539_vm0, %v4764_v2  ;;  %v343_v3 = vld [vmem:[%s6095_s1] sm:$0xf]  ;;  %v4813_v4 = vld [vmem:[%s6095_s1 + $0x14] sm:$0xf] }
  0x10   : > { %218 = vst.msk [vmem:[#allocation2 + $0x10] sm:$0x3] %vm217_vm2, %v4724_v1  ;;  %222 = vst.msk [vmem:[#allocation2 + $0x1a8] sm:$0x3] %vm217_vm2, %v4724_v1  ;;  %4199 = vmatpush3.msk.msra.mxu0 %vm539_vm0, %v4764_v2  ;;  %s6270_s13 = smov (!%p4768_p3, %s3382_s13), 1  ;;  %4048 = vmatprep.subr.msk.mxu1 %vm539_vm0, %v343_v3  ;;  %vm392_vm4 = vcmask 1046528  }
  0x11   : > { %225 = vst.msk [vmem:[#allocation2 + $0x18] sm:$0x1] %vm224_vm3, %v4724_v1  ;;  %226 = vst.msk [vmem:[#allocation2 + $0x30] sm:$0x1] %vm224_vm3, %v4724_v1  ;;  %4248 = vmatprep.subr.msk.mxu0 %vm539_vm0, %v4813_v4  ;;  %s3699_s23 = sshll.u32 %s6270_s13, 8  ;;  %vm1060_vm5 = vcmask 1045504  }
  0x12   : > { %227 = vst.msk [vmem:[#allocation2 + $0x48] sm:$0x1] %vm224_vm3, %v4724_v1  ;;  %228 = vst.msk [vmem:[#allocation2 + $0x60] sm:$0x1] %vm224_vm3, %v4724_v1  ;;  %s4832_s26 = scalar_lea.vmem %s6094_s0, %s3699_s23  ;;  %v4861_v20 = vld [vmem:[%s6095_s1 + $0x8] sm:$0xf]  ;;  %s5949_s16 = scalar_lea.vmem %s6096_s2, %s3699_s23 }
  0x13   : > { %229 = vst.msk [vmem:[#allocation2 + $0x78] sm:$0x1] %vm224_vm3, %v4724_v1  ;;  %230 = vst.msk [vmem:[#allocation2 + $0x90] sm:$0x1] %vm224_vm3, %v4724_v1  ;;  %v182_v5 = vld [vmem:[%s4832_s26] sm:$0xff]  ;;  %v183_v6 = vld [vmem:[%s4832_s26 + $0x8] sm:$0xff] }
  0x14   : > { %231 = vst.msk [vmem:[#allocation2 + $0xa8] sm:$0x1] %vm224_vm3, %v4724_v1  ;;  %232 = vst.msk [vmem:[#allocation2 + $0xc0] sm:$0x1] %vm224_vm3, %v4724_v1  ;;  %v184_v7 = vld [vmem:[%s4832_s26 + $0x10] sm:$0xff]  ;;  %v185_v10 = vld [vmem:[%s4832_s26 + $0x18] sm:$0xff] }
  0x15   : > { %233 = vst.msk [vmem:[#allocation2 + $0xd8] sm:$0x1] %vm224_vm3, %v4724_v1  ;;  %234 = vst.msk [vmem:[#allocation2 + $0xf0] sm:$0x1] %vm224_vm3, %v4724_v1  ;;  %v4837_v8 = vld [vmem:[#allocation2] sm:$0xff]  ;;  %v4839_v9 = vld [vmem:[#allocation2 + $0x8] sm:$0xff] }
  0x16   : > { %235 = vst.msk [vmem:[#allocation2 + $0x108] sm:$0x1] %vm224_vm3, %v4724_v1  ;;  %236 = vst.msk [vmem:[#allocation2 + $0x120] sm:$0x1] %vm224_vm3, %v4724_v1  ;;  %v393_v11 = vrot.slane %v4837_v8, 1  ;;  %v394_v12 = vrot.slane %v4839_v9, 1 }
  0x17   : > { %237 = vst.msk [vmem:[#allocation2 + $0x138] sm:$0x1] %vm224_vm3, %v4724_v1  ;;  %238 = vst.msk [vmem:[#allocation2 + $0x150] sm:$0x1] %vm224_vm3, %v4724_v1  ;;  %v4847_v13 = vld [vmem:[#allocation2 + $0x10] sm:$0x3] }
  0x18   : > { %239 = vst.msk [vmem:[#allocation2 + $0x168] sm:$0x1] %vm224_vm3, %v4724_v1  ;;  %240 = vst.msk [vmem:[#allocation2 + $0x180] sm:$0x1] %vm224_vm3, %v4724_v1  ;;  %v186_v14 = vld [vmem:[%s4832_s26 + $0x20] sm:$0xff]  ;;  %v187_v15 = vld [vmem:[%s4832_s26 + $0x28] sm:$0xff]  ;;  %v395_v21 = vsel %vm392_vm4, %v393_v11, %v394_v12 }
  0x19   : > { %241 = vst.msk [vmem:[#allocation2 + $0x29] sm:$0x1] %vm224_vm3, %v4724_v1  ;;  %242 = vst.msk [vmem:[#allocation2 + $0x41] sm:$0x1] %vm224_vm3, %v4724_v1  ;;  %v396_v16 = vrot.slane %v4847_v13, 1  ;;  %v188_v17 = vld [vmem:[%s4832_s26 + $0x30] sm:$0xff]  ;;  %4000 = vmatprep.mubr.msk.f32.mxu1 %vm214_vm1, %v395_v21 }
  0x1a   : > { %243 = vst.msk [vmem:[#allocation2 + $0x59] sm:$0x1] %vm224_vm3, %v4724_v1  ;;  %244 = vst.msk [vmem:[#allocation2 + $0x71] sm:$0x1] %vm224_vm3, %v4724_v1  ;;  %v189_v18 = vld [vmem:[%s4832_s26 + $0x38] sm:$0xff]  ;;  %v190_v19 = vld [vmem:[%s4832_s26 + $0x40] sm:$0xff] }
  0x1b   : > { %245 = vst.msk [vmem:[#allocation2 + $0x89] sm:$0x1] %vm224_vm3, %v4724_v1  ;;  %246 = vst.msk [vmem:[#allocation2 + $0xa1] sm:$0x1] %vm224_vm3, %v4724_v1  ;;  %v191_v22 = vld [vmem:[%s4832_s26 + $0x48] sm:$0xff]  ;;  %v192_v23 = vld [vmem:[%s4832_s26 + $0x50] sm:$0xff]  ;;  %v397_v25 = vsel %vm392_vm4, %v394_v12, %v396_v16 }
  0x1c   : > { %247 = vst.msk [vmem:[#allocation2 + $0xb9] sm:$0x1] %vm224_vm3, %v4724_v1  ;;  %248 = vst.msk [vmem:[#allocation2 + $0xd1] sm:$0x1] %vm224_vm3, %v4724_v1  ;;  %v193_v24 = vld [vmem:[%s4832_s26 + $0x58] sm:$0xff]  ;;  %v194_v26 = vld [vmem:[%s4832_s26 + $0x60] sm:$0xff]  ;;  %4001 = vmatmul.mubr.msk.f32.vlgmr.msra.gmra.mrb[0].mxu1 %vm214_vm1, %v397_v25 }
  0x1d   : > { %249 = vst.msk [vmem:[#allocation2 + $0xe9] sm:$0x1] %vm224_vm3, %v4724_v1  ;;  %250 = vst.msk [vmem:[#allocation2 + $0x101] sm:$0x1] %vm224_vm3, %v4724_v1  ;;  %v195_v27 = vld [vmem:[%s4832_s26 + $0x68] sm:$0xff]  ;;  %v196_v28 = vld [vmem:[%s4832_s26 + $0x70] sm:$0xff]  ;;  %4049 = vmatpush3.msk.msra.mxu1 %vm539_vm0, %v343_v3 }
  0x1e   : > { %251 = vst.msk [vmem:[#allocation2 + $0x119] sm:$0x1] %vm224_vm3, %v4724_v1  ;;  %252 = vst.msk [vmem:[#allocation2 + $0x131] sm:$0x1] %vm224_vm3, %v4724_v1  ;;  %v197_v29 = vld [vmem:[%s4832_s26 + $0x78] sm:$0xff]  ;;  %v198_v30 = vld [vmem:[%s4832_s26 + $0x80] sm:$0xff]  ;;  %4098 = vmatprep.subr.msk.mxu1 %vm539_vm0, %v4861_v20 }
  0x1f   : > { %253 = vst.msk [vmem:[#allocation2 + $0x149] sm:$0x1] %vm224_vm3, %v4724_v1  ;;  %254 = vst.msk [vmem:[#allocation2 + $0x161] sm:$0x1] %vm224_vm3, %v4724_v1  ;;  %v199_v31 = vld [vmem:[%s4832_s26 + $0x88] sm:$0xff]  ;;  %v200_v32 = vld [vmem:[%s4832_s26 + $0x90] sm:$0xff] }
  0x20   : > { %255 = vst.msk [vmem:[#allocation2 + $0x179] sm:$0x1] %vm224_vm3, %v4724_v1  ;;  %256 = vst.msk [vmem:[#allocation2 + $0x191] sm:$0x1] %vm224_vm3, %v4724_v1  ;;  %v201_v33 = vld [vmem:[%s4832_s26 + $0x98] sm:$0xff]  ;;  %v202_v34 = vld [vmem:[%s4832_s26 + $0xa0] sm:$0xff] }
  0x21   : > { %257 = vst.msk [vmem:[#allocation2 + $0x19] sm:$0xff] %vm214_vm1, %v182_v5  ;;  %258 = vst.msk [vmem:[#allocation2 + $0x21] sm:$0xff] %vm214_vm1, %v183_v6  ;;  %v4937_v57 = vld [vmem:[%s6095_s1 + $0x18] sm:$0xf]  ;;  %v211_v25 = vld [vmem:[%s4832_s26 + $0xe8] sm:$0xff]  ;;  %vm3089_vm6 = vcmask 64512  }
  0x22   : > { %259 = vst.msk [vmem:[#allocation2 + $0x31] sm:$0xff] %vm214_vm1, %v184_v7  ;;  %260 = vst.msk [vmem:[#allocation2 + $0x39] sm:$0xff] %vm214_vm1, %v185_v10  ;;  %v205_v16 = vld [vmem:[%s4832_s26 + $0xb8] sm:$0xff]  ;;  %s3391_s17 = sshll.u32 %s6270_s13, 1  ;;  %vm3292_vm7 = vcmask 1040384   ;;  %vm3294_vm8 = vcmask 58368  }
  0x23   : > { %261 = vst.msk [vmem:[#allocation2 + $0x49] sm:$0xff] %vm214_vm1, %v186_v14  ;;  %262 = vst.msk [vmem:[#allocation2 + $0x51] sm:$0xff] %vm214_vm1, %v187_v15  ;;  %v203_v14 = vld [vmem:[%s4832_s26 + $0xa8] sm:$0xff]  ;;  %v204_v15 = vld [vmem:[%s4832_s26 + $0xb0] sm:$0xff]  ;;  %s181_s20 = scalar_lea.vmem %s6097_s3, %s3391_s17 }
  0x24   : > { %263 = vst.msk [vmem:[#allocation2 + $0x61] sm:$0xff] %vm214_vm1, %v188_v17  ;;  %264 = vst.msk [vmem:[#allocation2 + $0x69] sm:$0xff] %vm214_vm1, %v189_v18  ;;  %v206_v17 = vld [vmem:[%s4832_s26 + $0xc0] sm:$0xff]  ;;  %v207_v18 = vld [vmem:[%s4832_s26 + $0xc8] sm:$0xff] }
  0x25   : > { %265 = vst.msk [vmem:[#allocation2 + $0x79] sm:$0xff] %vm214_vm1, %v190_v19  ;;  %266 = vst.msk [vmem:[#allocation2 + $0x81] sm:$0xff] %vm214_vm1, %v191_v22  ;;  %v208_v19 = vld [vmem:[%s4832_s26 + $0xd0] sm:$0xff]  ;;  %v209_v21 = vld [vmem:[%s4832_s26 + $0xd8] sm:$0xff] }
  0x26   : > { %267 = vst.msk [vmem:[#allocation2 + $0x91] sm:$0xff] %vm214_vm1, %v192_v23  ;;  %268 = vst.msk [vmem:[#allocation2 + $0x99] sm:$0xff] %vm214_vm1, %v193_v24  ;;  %v210_v24 = vld [vmem:[%s4832_s26 + $0xe0] sm:$0xff] }
  0x27   : > { %269 = vst.msk [vmem:[#allocation2 + $0xa9] sm:$0xff] %vm214_vm1, %v194_v26  ;;  %270 = vst.msk [vmem:[#allocation2 + $0xb1] sm:$0xff] %vm214_vm1, %v195_v27  ;;  %v212_v26 = vld [vmem:[%s4832_s26 + $0xf0] sm:$0xff] }
  0x28   : > { %271 = vst.msk [vmem:[#allocation2 + $0xc1] sm:$0xff] %vm214_vm1, %v196_v28  ;;  %272 = vst.msk [vmem:[#allocation2 + $0xc9] sm:$0xff] %vm214_vm1, %v197_v29  ;;  %v4892_v35 = vld [vmem:[#allocation2 + $0x18] sm:$0xff]  ;;  %v4894_v36 = vld [vmem:[#allocation2 + $0x20] sm:$0xff] }
  0x29   : > { %273 = vst.msk [vmem:[#allocation2 + $0xd9] sm:$0xff] %vm214_vm1, %v198_v30  ;;  %274 = vst.msk [vmem:[#allocation2 + $0xe1] sm:$0xff] %vm214_vm1, %v199_v31  ;;  %v4896_v37 = vld [vmem:[#allocation2 + $0x28] sm:$0x3]  ;;  %v398_v38 = vrot.slane %v4892_v35, 1  ;;  %v399_v39 = vrot.slane %v4894_v36, 1 }
  0x2a   : > { %6171 = vst [vmem:[#allocation3_spill] sm:$0xff] %v4892_v35  ;;  %6172 = vst [vmem:[#allocation4_spill] sm:$0xff] %v4894_v36  ;;  %v401_v40 = vrot.slane %v4896_v37, 1  ;;  %v4906_v41 = vld [vmem:[#allocation2 + $0x30] sm:$0xff]  ;;  %v4908_v42 = vld [vmem:[#allocation2 + $0x38] sm:$0xff] }
  0x2b   : > { %275 = vst.msk [vmem:[#allocation2 + $0xf1] sm:$0xff] %vm214_vm1, %v200_v32  ;;  %276 = vst.msk [vmem:[#allocation2 + $0xf9] sm:$0xff] %vm214_vm1, %v201_v33  ;;  %v403_v43 = vrot.slane %v4906_v41, 1  ;;  %v404_v44 = vrot.slane %v4908_v42, 1  ;;  %v4912_v45 = vld [vmem:[#allocation2 + $0x40] sm:$0x3]  ;;  %v400_v48 = vsel %vm392_vm4, %v398_v38, %v399_v39 }
  0x2c   : > { %277 = vst.msk [vmem:[#allocation2 + $0x109] sm:$0xff] %vm214_vm1, %v202_v34  ;;  %v4914_v46 = vld [vmem:[#allocation2 + $0x48] sm:$0xff]  ;;  %v4916_v47 = vld [vmem:[#allocation2 + $0x50] sm:$0xff]  ;;  %v402_v49 = vsel %vm392_vm4, %v399_v39, %v401_v40  ;;  %v406_v50 = vrot.slane %v4912_v45, 1  ;;  %v4922_v52 = vld [vmem:[#allocation2 + $0x58] sm:$0x3]  ;;  %4003 = vmatprep.mubr.msk.f32.mxu1 %vm214_vm1, %v400_v48  ;;  %4200 = vmatprep.mubr.msk.f32.mxu0 %vm214_vm1, %v400_v48 }
  0x2d   : > { %v408_v51 = vrot.slane %v4914_v46, 1  ;;  %v4927_v53 = vsel %vm392_vm4, %v403_v43, %v404_v44  ;;  %v409_v54 = vrot.slane %v4916_v47, 1  ;;  %v4930_v55 = vld [vmem:[#allocation2 + $0x60] sm:$0xff]  ;;  %v4932_v56 = vld [vmem:[#allocation2 + $0x68] sm:$0xff]  ;;  %4004 = vmatmul.mubr.msk.f32.gmra.mrb[2].mxu1 %vm214_vm1, %v402_v49  ;;  %4201 = vmatmul.mubr.msk.f32.vlgmr.msra.gmra.mrb[0].mxu0 %vm214_vm1, %v402_v49  ;;  %v411_v59 = vrot.slane %v4922_v52, 1  ;;  %v4960_v0 = vld [vmem:[#allocation2 + $0x78] sm:$0xff] }
  0x2e   : > { %6173 = vst [vmem:[#allocation5_spill] sm:$0xff] %v4927_v53  ;;  %4249 = vmatpush3.msk.msra.mxu0 %vm539_vm0, %v4813_v4  ;;  %4006 = vmatprep.mubr.msk.f32.mxu1 %vm214_vm1, %v4927_v53  ;;  %v4946_v58 = vsel %vm392_vm4, %v404_v44, %v406_v50  ;;  %v413_v61 = vrot.slane %v4930_v55, 1  ;;  %v414_v62 = vrot.slane %v4932_v56, 1  ;;  %v4956_v63 = vld [vmem:[#allocation2 + $0x70] sm:$0x3]  ;;  %v4962_v1 = vld [vmem:[#allocation2 + $0x80] sm:$0xff] }
  0x2f   : > { %6174 = vst [vmem:[#allocation6_spill] sm:$0xff] %v4946_v58  ;;  %4203 = vmatprep.mubr.msk.f32.mxu0 %vm214_vm1, %v4927_v53  ;;  %v4952_v60 = vsel %vm392_vm4, %v408_v51, %v409_v54  ;;  %4298 = vmatprep.subr.msk.mxu0 %vm539_vm0, %v4937_v57  ;;  %v4973_v3 = vsel %vm392_vm4, %v409_v54, %v411_v59  ;;  %v416_v4 = vrot.slane %v4956_v63, 1  ;;  %v4976_v5 = vld [vmem:[#allocation2 + $0x88] sm:$0x3]  ;;  %v418_v7 = vrot.slane %v4960_v0, 1  ;;  %v4983_v11 = vld [vmem:[#allocation2 + $0x90] sm:$0xff] }
  0x30   : > { %6175 = vst [vmem:[#allocation7_spill] sm:$0xff] %v4952_v60  ;;  %6176 = vst [vmem:[#allocation8_spill] sm:$0xff] %v4973_v3  ;;  %v4979_v6 = vsel %vm392_vm4, %v413_v61, %v414_v62  ;;  %v419_v10 = vrot.slane %v4962_v1, 1  ;;  %v4985_v12 = vld [vmem:[#allocation2 + $0x98] sm:$0xff]  ;;  %v421_v23 = vrot.slane %v4976_v5, 1  ;;  %v423_v28 = vrot.slane %v4983_v11, 1 }
  0x31   : > { %4007 = vmatmul.mubr.msk.f32.gmra.mrb[4].mxu1 %vm214_vm1, %v4946_v58  ;;  %4204 = vmatmul.mubr.msk.f32.gmra.mrb[2].mxu0 %vm214_vm1, %v4946_v58  ;;  %6177 = vst [vmem:[#allocation9_spill] sm:$0xff] %v4979_v6  ;;  %278 = vst.msk [vmem:[#allocation2 + $0x111] sm:$0xff] %vm214_vm1, %v203_v14  ;;  %v5007_v22 = vsel %vm392_vm4, %v414_v62, %v416_v4  ;;  %v424_v29 = vrot.slane %v4985_v12, 1  ;;  %v5021_v30 = vld [vmem:[#allocation2 + $0xa0] sm:$0x3]  ;;  %v213_v31 = vld [vmem:[%s4832_s26 + $0xf8] sm:$0xff] }
  0x32   : > { %4009 = vmatprep.mubr.msk.f32.mxu1 %vm214_vm1, %v4952_v60  ;;  %4206 = vmatprep.mubr.msk.f32.mxu0 %vm214_vm1, %v4952_v60  ;;  %279 = vst.msk [vmem:[#allocation2 + $0x121] sm:$0xff] %vm214_vm1, %v204_v15  ;;  %280 = vst.msk [vmem:[#allocation2 + $0x129] sm:$0xff] %vm214_vm1, %v205_v16  ;;  %v5017_v27 = vsel %vm392_vm4, %v418_v7, %v419_v10  ;;  %v5027_v32 = vld [vmem:[#allocation2 + $0xa8] sm:$0xff]  ;;  %v5029_v33 = vld [vmem:[#allocation2 + $0xb0] sm:$0xff]  ;;  %v5041_v34 = vsel %vm392_vm4, %v419_v10, %v421_v23  ;;  %v426_v38 = vrot.slane %v5021_v30, 1 }
  0x33   : > { %281 = vst.msk [vmem:[#allocation2 + $0x139] sm:$0xff] %vm214_vm1, %v206_v17  ;;  %6178 = vst [vmem:[#allocation10_spill] sm:$0xff] %v5007_v22  ;;  %v5045_v39 = vsel %vm392_vm4, %v423_v28, %v424_v29  ;;  %v428_v40 = vrot.slane %v5027_v32, 1  ;;  %v429_v43 = vrot.slane %v5029_v33, 1  ;;  %v5049_v44 = vld [vmem:[#allocation2 + $0xb8] sm:$0x3] }
  0x34   : > { %282 = vst.msk [vmem:[#allocation2 + $0x141] sm:$0xff] %vm214_vm1, %v207_v18  ;;  %283 = vst.msk [vmem:[#allocation2 + $0x151] sm:$0xff] %vm214_vm1, %v208_v19  ;;  %v5051_v48 = vld [vmem:[#allocation2 + $0xc0] sm:$0xff]  ;;  %v5053_v49 = vld [vmem:[#allocation2 + $0xc8] sm:$0xff]  ;;  %v5064_v50 = vsel %vm392_vm4, %v424_v29, %v426_v38  ;;  %v431_v51 = vrot.slane %v5049_v44, 1  ;;  %v1066_v19 = vrot.slane %v4892_v35, 2 }
  0x35   : > { %4010 = vmatmul.mubr.msk.f32.gmra.mrb[6].mxu1 %vm214_vm1, %v4973_v3  ;;  %4207 = vmatmul.mubr.msk.f32.gmra.mrb[4].mxu0 %vm214_vm1, %v4973_v3  ;;  %284 = vst.msk [vmem:[#allocation2 + $0x159] sm:$0xff] %vm214_vm1, %v209_v21  ;;  %6179 = vst [vmem:[#allocation11_spill] sm:$0xff] %v5017_v27  ;;  %v5068_v54 = vsel %vm392_vm4, %v428_v40, %v429_v43  ;;  %v433_v59 = vrot.slane %v5051_v48, 1  ;;  %v434_v61 = vrot.slane %v5053_v49, 1  ;;  %v5072_v62 = vld [vmem:[#allocation2 + $0xd0] sm:$0x3] }
  0x36   : > { %4012 = vmatprep.mubr.msk.f32.mxu1 %vm214_vm1, %v4979_v6  ;;  %4209 = vmatprep.mubr.msk.f32.mxu0 %vm214_vm1, %v4979_v6  ;;  %285 = vst.msk [vmem:[#allocation2 + $0x169] sm:$0xff] %vm214_vm1, %v210_v24  ;;  %286 = vst.msk [vmem:[#allocation2 + $0x171] sm:$0xff] %vm214_vm1, %v211_v25  ;;  %v5074_v4 = vld [vmem:[#allocation2 + $0xd8] sm:$0xff]  ;;  %v5076_v7 = vld [vmem:[#allocation2 + $0xe0] sm:$0xff]  ;;  %v5087_v10 = vsel %vm392_vm4, %v429_v43, %v431_v51  ;;  %v436_v14 = vrot.slane %v5072_v62, 1  ;;  %v1067_v21 = vrot.slane %v4894_v36, 2 }
  0x37   : > { %287 = vst.msk [vmem:[#allocation2 + $0x181] sm:$0xff] %vm214_vm1, %v212_v26  ;;  %288 = vst.msk [vmem:[#allocation2 + $0x189] sm:$0xff] %vm214_vm1, %v213_v31  ;;  %v438_v15 = vrot.slane %v5074_v4, 1  ;;  %v5091_v16 = vld [vmem:[#allocation2 + $0xf0] sm:$0xff]  ;;  %v5094_v17 = vsel %vm392_vm4, %v433_v59, %v434_v61  ;;  %v439_v18 = vrot.slane %v5076_v7, 1  ;;  %v5101_v24 = vld [vmem:[#allocation2 + $0xf8] sm:$0xff] }
  0x38   : > { %6180 = vst [vmem:[#allocation12_spill] sm:$0xff] %v5041_v34  ;;  %6181 = vst [vmem:[#allocation13_spill] sm:$0xff] %v5045_v39  ;;  %v5099_v23 = vld [vmem:[#allocation2 + $0xe8] sm:$0x3]  ;;  %v1069_v25 = vrot.slane %v4896_v37, 2  ;;  %v5113_v26 = vsel %vm392_vm4, %v434_v61, %v436_v14  ;;  %v443_v29 = vrot.slane %v5091_v16, 1  ;;  %v5124_v40 = vsel %vm1060_vm5, %v1066_v19, %v1067_v21 }
  0x39   : > { %4013 = vmatmul.mubr.msk.f32.gmra.mrb[8].mxu1 %vm214_vm1, %v5007_v22  ;;  %4210 = vmatmul.mubr.msk.f32.gmra.mrb[6].mxu0 %vm214_vm1, %v5007_v22  ;;  %6182 = vst [vmem:[#allocation14_spill] sm:$0xff] %v5064_v50  ;;  %6183 = vst [vmem:[#allocation15_spill] sm:$0xff] %v5068_v54  ;;  %v441_v28 = vrot.slane %v5099_v23, 1  ;;  %v444_v37 = vrot.slane %v5101_v24, 1  ;;  %v5118_v31 = vld [vmem:[#allocation2 + $0x100] sm:$0x3]  ;;  %v5121_v38 = vsel %vm392_vm4, %v438_v15, %v439_v18 }
  0x3a   : > { %4015 = vmatprep.mubr.msk.f32.mxu1 %vm214_vm1, %v5017_v27  ;;  %4212 = vmatprep.mubr.msk.f32.mxu0 %vm214_vm1, %v5017_v27  ;;  %6184 = vst [vmem:[#allocation16_spill] sm:$0xff] %v5087_v10  ;;  %6185 = vst [vmem:[#allocation17_spill] sm:$0xff] %v5094_v17  ;;  %v1071_v43 = vrot.slane %v4906_v41, 2  ;;  %v1072_v51 = vrot.slane %v4908_v42, 2  ;;  %v5128_v59 = vld [vmem:[#allocation2 + $0x108] sm:$0xff]  ;;  %v5130_v61 = vld [vmem:[#allocation2 + $0x110] sm:$0xff]  ;;  %v5145_v19 = vsel %vm1060_vm5, %v1067_v21, %v1069_v25 }
  0x3b   : > { %6186 = vst [vmem:[#allocation18_spill] sm:$0xff] %v5113_v26  ;;  %6187 = vst [vmem:[#allocation19_spill] sm:$0xff] %v5121_v38  ;;  %v446_v14 = vrot.slane %v5118_v31, 1  ;;  %v5142_v15 = vsel %vm392_vm4, %v439_v18, %v441_v28  ;;  %v5160_v21 = vld [vmem:[#allocation2 + $0x120] sm:$0xff]  ;;  %v5162_v25 = vld [vmem:[#allocation2 + $0x128] sm:$0xff]  ;;  %v1082_v27 = vrot.slane %v4932_v56, 2 }
  0x3c   : > { %6188 = vst [vmem:[#allocation20_spill] sm:$0xff] %v5142_v15  ;;  %v5158_v18 = vsel %vm1060_vm5, %v1071_v43, %v1072_v51  ;;  %v1086_v3 = vrot.slane %v4960_v0, 2  ;;  %v1087_v60 = vrot.slane %v4962_v1, 2 }
  0x3d   : > { %4016 = vmatmul.mubr.msk.f32.gmra.mrb[10].mxu1 %vm214_vm1, %v5041_v34  ;;  %4213 = vmatmul.mubr.msk.f32.gmra.mrb[8].mxu0 %vm214_vm1, %v5041_v34  ;;  %v5174_v28 = vsel %vm392_vm4, %v444_v37, %v446_v14  ;;  %v5201_v14 = vld [vmem:[#allocation2 + $0x138] sm:$0xff] }
  0x3e   : > { %4018 = vmatprep.mubr.msk.f32.mxu1 %vm214_vm1, %v5045_v39  ;;  %4215 = vmatprep.mubr.msk.f32.mxu0 %vm214_vm1, %v5045_v39  ;;  %v5155_v39 = vld [vmem:[#allocation2 + $0x118] sm:$0x3]  ;;  %6190 = vst [vmem:[#allocation22_spill] sm:$0xff] %v5174_v28 }
  0x3f   : > { %v451_v34 = vrot.slane %v5155_v39, 1 }
  0x41   : > { %4019 = vmatmul.mubr.msk.f32.gmra.mrb[12].mxu1 %vm214_vm1, %v5064_v50  ;;  %4216 = vmatmul.mubr.msk.f32.gmra.mrb[10].mxu0 %vm214_vm1, %v5064_v50  ;;  %v1077_v50 = vrot.slane %v4916_v47, 2 }
  0x42   : > { %4021 = vmatprep.mubr.msk.f32.mxu1 %vm214_vm1, %v5068_v54  ;;  %4218 = vmatprep.mubr.msk.f32.mxu0 %vm214_vm1, %v5068_v54  ;;  %v449_v54 = vrot.slane %v5130_v61, 1 }
  0x44   : > { %v5218_v22 = vsel %vm392_vm4, %v449_v54, %v451_v34  ;;  %v5233_v34 = vld [vmem:[#allocation2 + $0x150] sm:$0xff] }
  0x45   : > { %4022 = vmatmul.mubr.msk.f32.gmra.mrb[14].mxu1 %vm214_vm1, %v5087_v10  ;;  %4219 = vmatmul.mubr.msk.f32.gmra.mrb[12].mxu0 %vm214_vm1, %v5087_v10  ;;  %v1074_v10 = vrot.slane %v4912_v45, 2  ;;  %v5167_v45 = vld [vmem:[%s6095_s1 + $0x1c] sm:$0xf]  ;;  %6195 = vst [vmem:[#allocation27_spill] sm:$0xff] %v5218_v22 }
  0x46   : > { %4024 = vmatprep.mubr.msk.f32.mxu1 %vm214_vm1, %v5094_v17  ;;  %4221 = vmatprep.mubr.msk.f32.mxu0 %vm214_vm1, %v5094_v17  ;;  %v5148_v17 = vsel %vm392_vm4, %v443_v29, %v444_v37  ;;  %v1079_v29 = vrot.slane %v4922_v52, 2  ;;  %v453_v37 = vrot.slane %v5160_v21, 1 }
  0x47   : > { %6189 = vst [vmem:[#allocation21_spill] sm:$0xff] %v5148_v17  ;;  %v5182_v43 = vsel %vm1060_vm5, %v1072_v51, %v1074_v10  ;;  %v454_v10 = vrot.slane %v5162_v25, 1  ;;  %v5197_v51 = vld [vmem:[#allocation2 + $0x130] sm:$0x3] }
  0x48   : > { %6191 = vst [vmem:[#allocation23_spill] sm:$0xff] %v5182_v43 }
  0x49   : > { %4025 = vmatmul.mubr.msk.f32.gmra.mrb[16].mxu1 %vm214_vm1, %v5113_v26  ;;  %4222 = vmatmul.mubr.msk.f32.gmra.mrb[14].mxu0 %vm214_vm1, %v5113_v26  ;;  %v448_v26 = vrot.slane %v5128_v59, 1 }
  0x4a   : > { %4027 = vmatprep.mubr.msk.f32.mxu1 %vm214_vm1, %v5121_v38  ;;  %4250 = vmatprep.mubr.msk.f32.mxu0 %vm214_vm1, %v5124_v40  ;;  %v1076_v38 = vrot.slane %v4914_v46, 2 }
  0x4b   : > { %v5190_v52 = vsel %vm392_vm4, %v448_v26, %v449_v54  ;;  %v5210_v26 = vsel %vm1060_vm5, %v1077_v50, %v1079_v29  ;;  %v458_v29 = vrot.slane %v5201_v14, 1  ;;  %v5235_v54 = vld [vmem:[#allocation2 + $0x158] sm:$0xff] }
  0x4c   : > { %6192 = vst [vmem:[#allocation24_spill] sm:$0xff] %v5190_v52  ;;  %6194 = vst [vmem:[#allocation26_spill] sm:$0xff] %v5210_v26 }
  0x4d   : > { %4028 = vmatmul.mubr.msk.f32.gmra.mrb[18].mxu1 %vm214_vm1, %v5142_v15  ;;  %4251 = vmatmul.mubr.msk.f32.vlgmr.msra.gmra.mrb[0].mxu0 %vm214_vm1, %v5145_v19  ;;  %v1081_v15 = vrot.slane %v4930_v55, 2 }
  0x4e   : > { %4299 = vmatpush3.msk.msra.mxu0 %vm539_vm0, %v4937_v57  ;;  %4030 = vmatprep.mubr.msk.f32.mxu1 %vm214_vm1, %v5148_v17  ;;  %v5193_v57 = vsel %vm1060_vm5, %v1076_v38, %v1077_v50  ;;  %v5203_v17 = vld [vmem:[#allocation2 + $0x140] sm:$0xff]  ;;  %v1084_v38 = vrot.slane %v4956_v63, 2  ;;  %v5225_v50 = vld [vmem:[#allocation2 + $0x148] sm:$0x3]  ;;  %v5228_v63 = vsel %vm392_vm4, %v453_v37, %v454_v10  ;;  %v1089_v37 = vrot.slane %v4976_v5, 2 }
  0x4f   : > { %4253 = vmatprep.mubr.msk.f32.mxu0 %vm214_vm1, %v5158_v18  ;;  %6193 = vst [vmem:[#allocation25_spill] sm:$0xff] %v5193_v57  ;;  %4348 = vmatprep.subr.msk.mxu0 %vm539_vm0, %v5167_v45  ;;  %v5221_v6 = vsel %vm1060_vm5, %v1081_v15, %v1082_v27  ;;  %6197 = vst [vmem:[#allocation29_spill] sm:$0xff] %v5228_v63  ;;  %v461_v15 = vrot.slane %v5225_v50, 1  ;;  %v5259_v5 = vsel %vm1060_vm5, %v1086_v3, %v1087_v60 }
  0x50   : > { %6196 = vst [vmem:[#allocation28_spill] sm:$0xff] %v5221_v6  ;;  %v5251_v53 = vsel %vm1060_vm5, %v1082_v27, %v1084_v38  ;;  %6201 = vst [vmem:[#allocation33_spill] sm:$0xff] %v5259_v5  ;;  %v5267_v27 = vld [vmem:[#allocation2 + $0x170] sm:$0xff]  ;;  %v5277_v3 = vsel %vm1060_vm5, %v1087_v60, %v1089_v37  ;;  %v1097_v37 = vrot.slane %v5029_v33, 2 }
  0x51   : > { %4031 = vmatmul.mubr.msk.f32.gmra.mrb[20].mxu1 %vm214_vm1, %v5174_v28  ;;  %4254 = vmatmul.mubr.msk.f32.gmra.mrb[2].mxu0 %vm214_vm1, %v5182_v43  ;;  %v456_v28 = vrot.slane %v5197_v51, 1  ;;  %6199 = vst [vmem:[#allocation31_spill] sm:$0xff] %v5251_v53  ;;  %v5263_v43 = vld [vmem:[#allocation2 + $0x160] sm:$0x3]  ;;  %6203 = vst [vmem:[#allocation35_spill] sm:$0xff] %v5277_v3  ;;  %v469_v60 = vrot.slane %v5267_v27, 1 }
  0x52   : > { %4033 = vmatprep.mubr.msk.f32.mxu1 %vm214_vm1, %v5190_v52  ;;  %4256 = vmatprep.mubr.msk.f32.mxu0 %vm214_vm1, %v5193_v57  ;;  %v459_v52 = vrot.slane %v5203_v17, 1 }
  0x53   : > { %v5248_v58 = vsel %vm392_vm4, %v454_v10, %v456_v28  ;;  %v5265_v28 = vld [vmem:[#allocation2 + $0x168] sm:$0xff] }
  0x54   : > { %6198 = vst [vmem:[#allocation30_spill] sm:$0xff] %v5248_v58  ;;  %v5256_v57 = vsel %vm392_vm4, %v458_v29, %v459_v52  ;;  %v5274_v10 = vsel %vm392_vm4, %v459_v52, %v461_v15  ;;  %v466_v29 = vrot.slane %v5263_v43, 1  ;;  %v1096_v15 = vrot.slane %v5027_v32, 2 }
  0x55   : > { %4034 = vmatmul.mubr.msk.f32.gmra.mrb[22].mxu1 %vm214_vm1, %v5218_v22  ;;  %4257 = vmatmul.mubr.msk.f32.gmra.mrb[4].mxu0 %vm214_vm1, %v5210_v26  ;;  %v463_v22 = vrot.slane %v5233_v34, 1  ;;  %v464_v26 = vrot.slane %v5235_v54, 1  ;;  %6200 = vst [vmem:[#allocation32_spill] sm:$0xff] %v5256_v57  ;;  %6202 = vst [vmem:[#allocation34_spill] sm:$0xff] %v5274_v10 }
  0x56   : > { %4036 = vmatprep.mubr.msk.f32.mxu1 %vm214_vm1, %v5228_v63  ;;  %4259 = vmatprep.mubr.msk.f32.mxu0 %vm214_vm1, %v5221_v6  ;;  %v1091_v63 = vrot.slane %v4983_v11, 2  ;;  %v1092_v6 = vrot.slane %v4985_v12, 2 }
  0x57   : > { %v5284_v38 = vsel %vm392_vm4, %v463_v22, %v464_v26  ;;  %v5306_v22 = vsel %vm392_vm4, %v464_v26, %v466_v29  ;;  %v1106_v26 = vrot.slane %v5074_v4, 2  ;;  %v1107_v29 = vrot.slane %v5076_v7, 2 }
  0x58   : > { %6204 = vst [vmem:[#allocation36_spill] sm:$0xff] %v5284_v38  ;;  %v5290_v52 = vsel %vm1060_vm5, %v1091_v63, %v1092_v6  ;;  %6206 = vst [vmem:[#allocation38_spill] sm:$0xff] %v5306_v22 }
  0x59   : > { %4037 = vmatmul.mubr.msk.f32.gmra.mrb[24].mxu1 %vm214_vm1, %v5248_v58  ;;  %4260 = vmatmul.mubr.msk.f32.gmra.mrb[6].mxu0 %vm214_vm1, %v5251_v53  ;;  %v1094_v58 = vrot.slane %v5021_v30, 2  ;;  %v468_v53 = vrot.slane %v5265_v28, 1  ;;  %6205 = vst [vmem:[#allocation37_spill] sm:$0xff] %v5290_v52 }
  0x5a   : > { %4039 = vmatprep.mubr.msk.f32.mxu1 %vm214_vm1, %v5256_v57  ;;  %4262 = vmatprep.mubr.msk.f32.mxu0 %vm214_vm1, %v5259_v5  ;;  %v5295_v57 = vld [vmem:[#allocation2 + $0x178] sm:$0x3]  ;;  %v1099_v5 = vrot.slane %v5049_v44, 2 }
  0x5b   : > { %v5309_v30 = vsel %vm1060_vm5, %v1092_v6, %v1094_v58  ;;  %v471_v63 = vrot.slane %v5295_v57, 1  ;;  %v1104_v6 = vrot.slane %v5072_v62, 2 }
  0x5c   : > { %v5333_v58 = vsel %vm1060_vm5, %v1097_v37, %v1099_v5  ;;  %v1109_v5 = vrot.slane %v5099_v23, 2 }
  0x5d   : > { %4040 = vmatmul.mubr.msk.f32.gmra.mrb[26].mxu1 %vm214_vm1, %v5274_v10  ;;  %4263 = vmatmul.mubr.msk.f32.gmra.mrb[8].mxu0 %vm214_vm1, %v5277_v3  ;;  %v5314_v10 = vsel %vm392_vm4, %v468_v53, %v469_v60  ;;  %v5317_v3 = vsel %vm1060_vm5, %v1096_v15, %v1097_v37  ;;  %v5330_v53 = vsel %vm392_vm4, %v469_v60, %v471_v63  ;;  %v1111_v60 = vrot.slane %v5091_v16, 2 }
  0x5e   : > { %4042 = vmatprep.mubr.msk.f32.mxu1 %vm214_vm1, %v5284_v38  ;;  %4265 = vmatprep.mubr.msk.f32.mxu0 %vm214_vm1, %v5290_v52  ;;  %6207 = vst [vmem:[#allocation39_spill] sm:$0xff] %v5314_v10  ;;  %v1101_v38 = vrot.slane %v5051_v48, 2  ;;  %v1102_v52 = vrot.slane %v5053_v49, 2  ;;  %6208 = vst [vmem:[#allocation40_spill] sm:$0xff] %v5330_v53  ;;  %v1112_v15 = vrot.slane %v5101_v24, 2  ;;  %v5372_v23 = vsel %vm1060_vm5, %v1107_v29, %v1109_v5 }
  0x5f   : > { %v1114_v37 = vrot.slane %v5118_v31, 2  ;;  %v1119_v31 = vrot.slane %v5155_v39, 2  ;;  %v1121_v5 = vrot.slane %v5160_v21, 2 }
  0x60   : > { %v5337_v44 = vsel %vm1060_vm5, %v1101_v38, %v1102_v52  ;;  %v5350_v62 = vsel %vm1060_vm5, %v1102_v52, %v1104_v6  ;;  %v5354_v38 = vsel %vm1060_vm5, %v1106_v26, %v1107_v29  ;;  %v5365_v52 = vld [vmem:[%s6095_s1 + $0xc] sm:$0xf]  ;;  %v5378_v63 = vsel %vm1060_vm5, %v1111_v60, %v1112_v15 }
  0x61   : > { %4043 = vmatmul.mubr.msk.f32.gmra.mrb[28].mxu1 %vm214_vm1, %v5306_v22  ;;  %4266 = vmatmul.mubr.msk.f32.gmra.mrb[10].mxu0 %vm214_vm1, %v5309_v30  ;;  %v1116_v6 = vrot.slane %v5128_v59, 2  ;;  %v1117_v26 = vrot.slane %v5130_v61, 2  ;;  %v1122_v60 = vrot.slane %v5162_v25, 2  ;;  %v1137_v22 = vrot.slane %v5267_v27, 2 }
  0x62   : > { %4045 = vmatprep.mubr.msk.f32.mxu1 %vm214_vm1, %v5314_v10  ;;  %4268 = vmatprep.mubr.msk.f32.mxu0 %vm214_vm1, %v5317_v3  ;;  %v1132_v10 = vrot.slane %v5235_v54, 2 }
  0x63   : > { %v5397_v29 = vsel %vm1060_vm5, %v1116_v6, %v1117_v26  ;;  %v5410_v39 = vsel %vm1060_vm5, %v1117_v26, %v1119_v31  ;;  %v1126_v6 = vrot.slane %v5201_v14, 2  ;;  %v1129_v26 = vrot.slane %v5225_v50, 2 }
  0x64   : > { %6209 = vst [vmem:[#allocation41_spill] sm:$0xff] %v5397_v29 }
  0x65   : > { %4046 = vmatmul.mubr.msk.f32.gmra.mrb[30].mxu1 %vm214_vm1, %v5330_v53  ;;  %4269 = vmatmul.mubr.msk.f32.gmra.mrb[12].mxu0 %vm214_vm1, %v5333_v58  ;;  %v1127_v53 = vrot.slane %v5203_v17, 2 }
  0x66   : > { %4050 = vmatprep.mubr.msk.f32.mxu1 %vm214_vm1, %v4837_v8  ;;  %4271 = vmatprep.mubr.msk.f32.mxu0 %vm214_vm1, %v5337_v44 }
  0x67   : > { %v5431_v31 = vsel %vm1060_vm5, %v1126_v6, %v1127_v53  ;;  %v5444_v50 = vsel %vm1060_vm5, %v1127_v53, %v1129_v26  ;;  %v1136_v6 = vrot.slane %v5265_v28, 2  ;;  %v1139_v53 = vrot.slane %v5295_v57, 2 }
  0x68   : > { %6211 = vst [vmem:[#allocation43_spill] sm:$0xff] %v5431_v31  ;;  %6212 = vst [vmem:[#allocation44_spill] sm:$0xff] %v5444_v50 }
  0x69   : > { %4051 = vmatmul.mubr.msk.f32.vlgmr.msra.gmra.mrb[0].mxu1 %vm214_vm1, %v4839_v9  ;;  %4272 = vmatmul.mubr.msk.f32.gmra.mrb[14].mxu0 %vm214_vm1, %v5350_v62  ;;  %v5469_v26 = vsel %vm1060_vm5, %v1136_v6, %v1137_v22  ;;  %v5484_v57 = vsel %vm1060_vm5, %v1137_v22, %v1139_v53  ;;  %v5512_v6 = vld [vmem:[%s6095_s1 + $0x20] sm:$0xf]  ;;  %v1064_v53 = vrot.slane %v4847_v13, 2 }
  0x6a   : > { %4053 = vmatprep.mubr.msk.f32.mxu1 %vm214_vm1, %v4892_v35  ;;  %4274 = vmatprep.mubr.msk.f32.mxu0 %vm214_vm1, %v5354_v38  ;;  %v5454_v35 = vld [vmem:[#allocation2 + $0x188] sm:$0xff]  ;;  %6215 = vst [vmem:[#allocation47_spill] sm:$0xff] %v5469_v26  ;;  %6216 = vst [vmem:[#allocation48_spill] sm:$0xff] %v5484_v57  ;;  %v6220_v13 = vld [vmem:[#allocation25_spill] sm:$0xff] }
  0x6b   : > { %4099 = vmatpush3.msk.msra.mxu1 %vm539_vm0, %v4861_v20  ;;  %v5393_v20 = vsel %vm1060_vm5, %v1112_v15, %v1114_v37  ;;  %v1124_v15 = vrot.slane %v5197_v51, 2  ;;  %v5414_v37 = vsel %vm1060_vm5, %v1121_v5, %v1122_v60  ;;  %v1131_v5 = vrot.slane %v5233_v34, 2 }
  0x6c   : > { %4148 = vmatprep.subr.msk.mxu1 %vm539_vm0, %v5365_v52 }
  0x6d   : > { %4054 = vmatmul.mubr.msk.f32.gmra.mrb[2].mxu1 %vm214_vm1, %v4894_v36  ;;  %4275 = vmatmul.mubr.msk.f32.gmra.mrb[16].mxu0 %vm214_vm1, %v5372_v23  ;;  %v5427_v51 = vsel %vm1060_vm5, %v1122_v60, %v1124_v15  ;;  %v1134_v60 = vrot.slane %v5263_v43, 2  ;;  %v5448_v15 = vsel %vm1060_vm5, %v1131_v5, %v1132_v10  ;;  %v5452_v36 = vld [vmem:[#allocation2 + $0x180] sm:$0xff] }
  0x6e   : > { %4056 = vmatprep.mubr.msk.f32.mxu1 %vm214_vm1, %v4906_v41  ;;  %4277 = vmatprep.mubr.msk.f32.mxu0 %vm214_vm1, %v5378_v63  ;;  %6210 = vst [vmem:[#allocation42_spill] sm:$0xff] %v5427_v51  ;;  %6213 = vst [vmem:[#allocation45_spill] sm:$0xff] %v5448_v15  ;;  %v2007_v5 = vrot.slane %v5452_v36, 2 }
  0x6f   : > { %v5465_v43 = vsel %vm1060_vm5, %v1132_v10, %v1134_v60 }
  0x70   : > { %6214 = vst [vmem:[#allocation46_spill] sm:$0xff] %v5465_v43 }
  0x71   : > { %4057 = vmatmul.mubr.msk.f32.gmra.mrb[4].mxu1 %vm214_vm1, %v4908_v42  ;;  %4278 = vmatmul.mubr.msk.f32.gmra.mrb[18].mxu0 %vm214_vm1, %v5393_v20 }
  0x72   : > { %4059 = vmatprep.mubr.msk.f32.mxu1 %vm214_vm1, %v4914_v46  ;;  %4280 = vmatprep.mubr.msk.f32.mxu0 %vm214_vm1, %v5397_v29 }
  0x75   : > { %4060 = vmatmul.mubr.msk.f32.gmra.mrb[6].mxu1 %vm214_vm1, %v4916_v47  ;;  %4281 = vmatmul.mubr.msk.f32.gmra.mrb[20].mxu0 %vm214_vm1, %v5410_v39 }
  0x76   : > { %4062 = vmatprep.mubr.msk.f32.mxu1 %vm214_vm1, %v4930_v55  ;;  %4283 = vmatprep.mubr.msk.f32.mxu0 %vm214_vm1, %v5414_v37 }
  0x79   : > { %4063 = vmatmul.mubr.msk.f32.gmra.mrb[8].mxu1 %vm214_vm1, %v4932_v56  ;;  %4284 = vmatmul.mubr.msk.f32.gmra.mrb[22].mxu0 %vm214_vm1, %v5427_v51  ;;  %v5473_v51 = vld [vmem:[#allocation2 + $0x190] sm:$0x3] }
  0x7a   : > { %4065 = vmatprep.mubr.msk.f32.mxu1 %vm214_vm1, %v4960_v0  ;;  %4286 = vmatprep.mubr.msk.f32.mxu0 %vm214_vm1, %v5431_v31  ;;  %v2008_v31 = vrot.slane %v5454_v35, 2  ;;  %v2010_v10 = vrot.slane %v5473_v51, 2 }
  0x7c   : > { %v5488_v60 = vsel %vm1060_vm5, %v2007_v5, %v2008_v31  ;;  %v5499_v22 = vsel %vm1060_vm5, %v2008_v31, %v2010_v10  ;;  %v1062_v31 = vrot.slane %v4839_v9, 2  ;;  %v6219_v9 = vld [vmem:[#allocation23_spill] sm:$0xff] }
  0x7d   : > { %4066 = vmatmul.mubr.msk.f32.gmra.mrb[10].mxu1 %vm214_vm1, %v4962_v1  ;;  %4287 = vmatmul.mubr.msk.f32.gmra.mrb[24].mxu0 %vm214_vm1, %v5444_v50  ;;  %6217 = vst [vmem:[#allocation49_spill] sm:$0xff] %v5488_v60  ;;  %6218 = vst [vmem:[#allocation50_spill] sm:$0xff] %v5499_v22  ;;  %v6225_v10 = vld [vmem:[#allocation35_spill] sm:$0xff] }
  0x7e   : > { %4068 = vmatprep.mubr.msk.f32.mxu1 %vm214_vm1, %v4983_v11  ;;  %4289 = vmatprep.mubr.msk.f32.mxu0 %vm214_vm1, %v5448_v15 }
  0x81   : > { %4069 = vmatmul.mubr.msk.f32.gmra.mrb[12].mxu1 %vm214_vm1, %v4985_v12  ;;  %4290 = vmatmul.mubr.msk.f32.gmra.mrb[26].mxu0 %vm214_vm1, %v5465_v43 }
  0x82   : > { %4071 = vmatprep.mubr.msk.f32.mxu1 %vm214_vm1, %v5027_v32  ;;  %4292 = vmatprep.mubr.msk.f32.mxu0 %vm214_vm1, %v5469_v26 }
  0x85   : > { %4072 = vmatmul.mubr.msk.f32.gmra.mrb[14].mxu1 %vm214_vm1, %v5029_v33  ;;  %4293 = vmatmul.mubr.msk.f32.gmra.mrb[28].mxu0 %vm214_vm1, %v5484_v57 }
  0x86   : > { %4074 = vmatprep.mubr.msk.f32.mxu1 %vm214_vm1, %v5051_v48  ;;  %4295 = vmatprep.mubr.msk.f32.mxu0 %vm214_vm1, %v5488_v60  ;;  %v6230_v60 = vld [vmem:[#allocation8_spill] sm:$0xff] }
  0x89   : > { %4075 = vmatmul.mubr.msk.f32.gmra.mrb[16].mxu1 %vm214_vm1, %v5053_v49  ;;  %4296 = vmatmul.mubr.msk.f32.gmra.mrb[30].mxu0 %vm214_vm1, %v5499_v22  ;;  %v6229_v22 = vld [vmem:[#allocation7_spill] sm:$0xff] }
  0x8a   : > { %4077 = vmatprep.mubr.msk.f32.mxu1 %vm214_vm1, %v5074_v4  ;;  %4300 = vmatprep.mubr.msk.f32.mxu0 %vm214_vm1, %v4906_v41 }
  0x8d   : > { %4078 = vmatmul.mubr.msk.f32.gmra.mrb[18].mxu1 %vm214_vm1, %v5076_v7  ;;  %4301 = vmatmul.mubr.msk.f32.vlgmr.msra.gmra.mrb[0].mxu0 %vm214_vm1, %v4908_v42 }
  0x8e   : > { %4349 = vmatpush3.msk.msra.mxu0 %vm539_vm0, %v5167_v45  ;;  %4080 = vmatprep.mubr.msk.f32.mxu1 %vm214_vm1, %v5091_v16  ;;  %v1061_v45 = vrot.slane %v4837_v8, 2  ;;  %v1065_v8 = vsel %vm1060_vm5, %v1062_v31, %v1064_v53  ;;  %v5647_v53 = vld [vmem:[#allocation2 + $0x1a0] sm:$0xff] }
  0x8f   : > { %4303 = vmatprep.mubr.msk.f32.mxu0 %vm214_vm1, %v4914_v46  ;;  %4398 = vmatprep.subr.msk.mxu0 %vm539_vm0, %v5512_v6 }
  0x90   : > { %v1063_v5 = vsel %vm1060_vm5, %v1061_v45, %v1062_v31  ;;  %v6226_v45 = vld [vmem:[#allocation37_spill] sm:$0xff]  ;;  %v5637_v31 = vld [vmem:[#allocation2 + $0x198] sm:$0xff] }
  0x91   : > { %4081 = vmatmul.mubr.msk.f32.gmra.mrb[20].mxu1 %vm214_vm1, %v5101_v24  ;;  %4304 = vmatmul.mubr.msk.f32.gmra.mrb[2].mxu0 %vm214_vm1, %v4916_v47 }
  0x92   : > { %4083 = vmatprep.mubr.msk.f32.mxu1 %vm214_vm1, %v5128_v59  ;;  %4306 = vmatprep.mubr.msk.f32.mxu0 %vm214_vm1, %v4930_v55 }
  0x95   : > { %4084 = vmatmul.mubr.msk.f32.gmra.mrb[22].mxu1 %vm214_vm1, %v5130_v61  ;;  %4307 = vmatmul.mubr.msk.f32.gmra.mrb[4].mxu0 %vm214_vm1, %v4932_v56 }
  0x96   : > { %4086 = vmatprep.mubr.msk.f32.mxu1 %vm214_vm1, %v5160_v21  ;;  %4309 = vmatprep.mubr.msk.f32.mxu0 %vm214_vm1, %v4960_v0 }
  0x99   : > { %4087 = vmatmul.mubr.msk.f32.gmra.mrb[24].mxu1 %vm214_vm1, %v5162_v25  ;;  %4310 = vmatmul.mubr.msk.f32.gmra.mrb[6].mxu0 %vm214_vm1, %v4962_v1 }
  0x9a   : > { %4089 = vmatprep.mubr.msk.f32.mxu1 %vm214_vm1, %v5201_v14  ;;  %4312 = vmatprep.mubr.msk.f32.mxu0 %vm214_vm1, %v4983_v11 }
  0x9d   : > { %4090 = vmatmul.mubr.msk.f32.gmra.mrb[26].mxu1 %vm214_vm1, %v5203_v17  ;;  %4313 = vmatmul.mubr.msk.f32.gmra.mrb[8].mxu0 %vm214_vm1, %v4985_v12 }
  0x9e   : > { %4092 = vmatprep.mubr.msk.f32.mxu1 %vm214_vm1, %v5233_v34  ;;  %4315 = vmatprep.mubr.msk.f32.mxu0 %vm214_vm1, %v5027_v32 }
  0xa1   : > { %4093 = vmatmul.mubr.msk.f32.gmra.mrb[28].mxu1 %vm214_vm1, %v5235_v54  ;;  %4316 = vmatmul.mubr.msk.f32.gmra.mrb[10].mxu0 %vm214_vm1, %v5029_v33 }
  0xa2   : > { %4095 = vmatprep.mubr.msk.f32.mxu1 %vm214_vm1, %v5265_v28  ;;  %4318 = vmatprep.mubr.msk.f32.mxu0 %vm214_vm1, %v5051_v48 }
  0xa5   : > { %4096 = vmatmul.mubr.msk.f32.gmra.mrb[30].mxu1 %vm214_vm1, %v5267_v27  ;;  %4319 = vmatmul.mubr.msk.f32.gmra.mrb[12].mxu0 %vm214_vm1, %v5053_v49 }
  0xa6   : > { %4100 = vmatprep.mubr.msk.f32.mxu1 %vm214_vm1, %v1063_v5  ;;  %4321 = vmatprep.mubr.msk.f32.mxu0 %vm214_vm1, %v5074_v4  ;;  %v6227_v5 = vld [vmem:[#allocation5_spill] sm:$0xff] }
  0xa9   : > { %4101 = vmatmul.mubr.msk.f32.vlgmr.msra.gmra.mrb[0].mxu1 %vm214_vm1, %v1065_v8  ;;  %4322 = vmatmul.mubr.msk.f32.gmra.mrb[14].mxu0 %vm214_vm1, %v5076_v7  ;;  %v6228_v8 = vld [vmem:[#allocation6_spill] sm:$0xff] }
  0xaa   : > { %4103 = vmatprep.mubr.msk.f32.mxu1 %vm214_vm1, %v5124_v40  ;;  %4324 = vmatprep.mubr.msk.f32.mxu0 %vm214_vm1, %v5091_v16  ;;  %v6222_v40 = vld [vmem:[#allocation28_spill] sm:$0xff] }
  0xab   : > { %4149 = vmatpush3.msk.msra.mxu1 %vm539_vm0, %v5365_v52  ;;  %v6224_v52 = vld [vmem:[#allocation33_spill] sm:$0xff] }
  0xac   : > { %4448 = vmatprep.subr.msk.mxu1 %vm539_vm0, %v4764_v2  ;;  %v6221_v2 = vld [vmem:[#allocation26_spill] sm:$0xff] }
  0xad   : > { %4104 = vmatmul.mubr.msk.f32.gmra.mrb[2].mxu1 %vm214_vm1, %v5145_v19  ;;  %4325 = vmatmul.mubr.msk.f32.gmra.mrb[16].mxu0 %vm214_vm1, %v5101_v24  ;;  %v6223_v19 = vld [vmem:[#allocation31_spill] sm:$0xff] }
  0xae   : > { %4106 = vmatprep.mubr.msk.f32.mxu1 %vm214_vm1, %v5158_v18  ;;  %4327 = vmatprep.mubr.msk.f32.mxu0 %vm214_vm1, %v5128_v59 }
  0xb1   : > { %4107 = vmatmul.mubr.msk.f32.gmra.mrb[4].mxu1 %vm214_vm1, %v6219_v9  ;;  %4328 = vmatmul.mubr.msk.f32.gmra.mrb[18].mxu0 %vm214_vm1, %v5130_v61 }
  0xb2   : > { %4109 = vmatprep.mubr.msk.f32.mxu1 %vm214_vm1, %v6220_v13  ;;  %4330 = vmatprep.mubr.msk.f32.mxu0 %vm214_vm1, %v5160_v21 }
  0xb5   : > { %4110 = vmatmul.mubr.msk.f32.gmra.mrb[6].mxu1 %vm214_vm1, %v6221_v2  ;;  %4331 = vmatmul.mubr.msk.f32.gmra.mrb[20].mxu0 %vm214_vm1, %v5162_v25 }
  0xb6   : > { %4112 = vmatprep.mubr.msk.f32.mxu1 %vm214_vm1, %v6222_v40  ;;  %4333 = vmatprep.mubr.msk.f32.mxu0 %vm214_vm1, %v5201_v14 }
  0xb9   : > { %4113 = vmatmul.mubr.msk.f32.gmra.mrb[8].mxu1 %vm214_vm1, %v6223_v19  ;;  %4334 = vmatmul.mubr.msk.f32.gmra.mrb[22].mxu0 %vm214_vm1, %v5203_v17 }
  0xba   : > { %4115 = vmatprep.mubr.msk.f32.mxu1 %vm214_vm1, %v6224_v52  ;;  %4336 = vmatprep.mubr.msk.f32.mxu0 %vm214_vm1, %v5233_v34 }
  0xbd   : > { %4116 = vmatmul.mubr.msk.f32.gmra.mrb[10].mxu1 %vm214_vm1, %v6225_v10  ;;  %4337 = vmatmul.mubr.msk.f32.gmra.mrb[24].mxu0 %vm214_vm1, %v5235_v54 }
  0xbe   : > { %4118 = vmatprep.mubr.msk.f32.mxu1 %vm214_vm1, %v6226_v45  ;;  %4339 = vmatprep.mubr.msk.f32.mxu0 %vm214_vm1, %v5265_v28 }
  0xc1   : > { %4119 = vmatmul.mubr.msk.f32.gmra.mrb[12].mxu1 %vm214_vm1, %v5309_v30  ;;  %4340 = vmatmul.mubr.msk.f32.gmra.mrb[26].mxu0 %vm214_vm1, %v5267_v27 }
  0xc2   : > { %4121 = vmatprep.mubr.msk.f32.mxu1 %vm214_vm1, %v5317_v3  ;;  %4342 = vmatprep.mubr.msk.f32.mxu0 %vm214_vm1, %v5452_v36 }
  0xc5   : > { %4122 = vmatmul.mubr.msk.f32.gmra.mrb[14].mxu1 %vm214_vm1, %v5333_v58  ;;  %4343 = vmatmul.mubr.msk.f32.gmra.mrb[28].mxu0 %vm214_vm1, %v5454_v35 }
  0xc6   : > { %4124 = vmatprep.mubr.msk.f32.mxu1 %vm214_vm1, %v5337_v44  ;;  %4345 = vmatprep.mubr.msk.f32.mxu0 %vm214_vm1, %v5637_v31 }
  0xc9   : > { %4125 = vmatmul.mubr.msk.f32.gmra.mrb[16].mxu1 %vm214_vm1, %v5350_v62  ;;  %4346 = vmatmul.mubr.msk.f32.gmra.mrb[30].mxu0 %vm214_vm1, %v5647_v53 }
  0xca   : > { %4127 = vmatprep.mubr.msk.f32.mxu1 %vm214_vm1, %v5354_v38  ;;  %4350 = vmatprep.mubr.msk.f32.mxu0 %vm214_vm1, %v6227_v5  ;;  %v6231_v5 = vld [vmem:[#allocation9_spill] sm:$0xff] }
  0xcd   : > { %4128 = vmatmul.mubr.msk.f32.gmra.mrb[18].mxu1 %vm214_vm1, %v5372_v23  ;;  %4351 = vmatmul.mubr.msk.f32.vlgmr.msra.gmra.mrb[0].mxu0 %vm214_vm1, %v6228_v8  ;;  %v6234_v8 = vld [vmem:[#allocation42_spill] sm:$0xff] }
  0xce   : > { %4399 = vmatpush3.msk.msra.mxu0 %vm539_vm0, %v5512_v6  ;;  %4130 = vmatprep.mubr.msk.f32.mxu1 %vm214_vm1, %v5378_v63  ;;  %v6232_v6 = vld [vmem:[#allocation10_spill] sm:$0xff] }
  0xcf   : > { %4353 = vmatprep.mubr.msk.f32.mxu0 %vm214_vm1, %v6229_v22  ;;  %v6233_v22 = vld [vmem:[#allocation11_spill] sm:$0xff] }
  0xd1   : > { %4131 = vmatmul.mubr.msk.f32.gmra.mrb[20].mxu1 %vm214_vm1, %v5393_v20  ;;  %4354 = vmatmul.mubr.msk.f32.gmra.mrb[2].mxu0 %vm214_vm1, %v6230_v60  ;;  %v6235_v60 = vld [vmem:[#allocation12_spill] sm:$0xff] }
  0xd2   : > { %4133 = vmatprep.mubr.msk.f32.mxu1 %vm214_vm1, %v5397_v29  ;;  %4356 = vmatprep.mubr.msk.f32.mxu0 %vm214_vm1, %v6231_v5  ;;  %v6236_v29 = vld [vmem:[#allocation43_spill] sm:$0xff]  ;;  %v6237_v5 = vld [vmem:[#allocation13_spill] sm:$0xff] }
  0xd5   : > { %4134 = vmatmul.mubr.msk.f32.gmra.mrb[22].mxu1 %vm214_vm1, %v5410_v39  ;;  %4357 = vmatmul.mubr.msk.f32.gmra.mrb[4].mxu0 %vm214_vm1, %v6232_v6  ;;  %v6238_v6 = vld [vmem:[#allocation14_spill] sm:$0xff] }
  0xd6   : > { %4136 = vmatprep.mubr.msk.f32.mxu1 %vm214_vm1, %v5414_v37  ;;  %4359 = vmatprep.mubr.msk.f32.mxu0 %vm214_vm1, %v6233_v22  ;;  %v6239_v22 = vld [vmem:[#allocation15_spill] sm:$0xff] }
  0xd9   : > { %4137 = vmatmul.mubr.msk.f32.gmra.mrb[24].mxu1 %vm214_vm1, %v6234_v8  ;;  %4360 = vmatmul.mubr.msk.f32.gmra.mrb[6].mxu0 %vm214_vm1, %v6235_v60  ;;  %v6240_v60 = vld [vmem:[#allocation16_spill] sm:$0xff] }
  0xda   : > { %4139 = vmatprep.mubr.msk.f32.mxu1 %vm214_vm1, %v6236_v29  ;;  %4362 = vmatprep.mubr.msk.f32.mxu0 %vm214_vm1, %v6237_v5  ;;  %v6241_v5 = vld [vmem:[#allocation17_spill] sm:$0xff] }
  0xdd   : > { %4140 = vmatmul.mubr.msk.f32.gmra.mrb[26].mxu1 %vm214_vm1, %v5444_v50  ;;  %4363 = vmatmul.mubr.msk.f32.gmra.mrb[8].mxu0 %vm214_vm1, %v6238_v6  ;;  %v6242_v6 = vld [vmem:[#allocation18_spill] sm:$0xff] }
  0xde   : > { %4142 = vmatprep.mubr.msk.f32.mxu1 %vm214_vm1, %v5448_v15  ;;  %4365 = vmatprep.mubr.msk.f32.mxu0 %vm214_vm1, %v6239_v22  ;;  %v6243_v15 = vld [vmem:[#allocation3_spill] sm:$0xff] }
  0xdf   : > { %v6244_v22 = vld [vmem:[#allocation19_spill] sm:$0xff] }
  0xe1   : > { %4143 = vmatmul.mubr.msk.f32.gmra.mrb[28].mxu1 %vm214_vm1, %v5465_v43  ;;  %4366 = vmatmul.mubr.msk.f32.gmra.mrb[10].mxu0 %vm214_vm1, %v6240_v60  ;;  %v6245_v43 = vld [vmem:[#allocation4_spill] sm:$0xff] }
  0xe2   : > { %4145 = vmatprep.mubr.msk.f32.mxu1 %vm214_vm1, %v5469_v26  ;;  %4368 = vmatprep.mubr.msk.f32.mxu0 %vm214_vm1, %v6241_v5  ;;  %v6246_v60 = vld [vmem:[#allocation20_spill] sm:$0xff]  ;;  %v6247_v5 = vld [vmem:[#allocation21_spill] sm:$0xff]  ;;  %v2547_v26 = vrot.slane %v5637_v31, 1 }
  0xe5   : > { %4146 = vmatmul.mubr.msk.f32.gmra.mrb[30].mxu1 %vm214_vm1, %v5484_v57  ;;  %4369 = vmatmul.mubr.msk.f32.gmra.mrb[12].mxu0 %vm214_vm1, %v6242_v6  ;;  %v4715_v6 = vld [vmem:[%s6095_s1 + $0x10] sm:$0xf]  ;;  %v1737_v57 = vrot.slane %v5454_v35, 1 }
  0xe6   : > { %4150 = vmatprep.mubr.msk.f32.mxu1 %vm214_vm1, %v6243_v15  ;;  %4371 = vmatprep.mubr.msk.f32.mxu0 %vm214_vm1, %v6244_v22  ;;  %v6248_v15 = vld [vmem:[#allocation22_spill] sm:$0xff] }
  0xe9   : > { %4151 = vmatmul.mubr.msk.f32.vlgmr.msra.gmra.mrb[0].mxu1 %vm214_vm1, %v6245_v43  ;;  %4372 = vmatmul.mubr.msk.f32.gmra.mrb[14].mxu0 %vm214_vm1, %v6246_v60  ;;  %v6249_v43 = vld [vmem:[#allocation24_spill] sm:$0xff] }
  0xea   : > { %4153 = vmatprep.mubr.msk.f32.mxu1 %vm214_vm1, %v4906_v41  ;;  %4374 = vmatprep.mubr.msk.f32.mxu0 %vm214_vm1, %v6247_v5  ;;  %v6250_v41 = vld [vmem:[#allocation27_spill] sm:$0xff] }
  0xeb   : > { %4449 = vmatpush3.msk.msra.mxu1 %vm539_vm0, %v4715_v6  ;;  %v6251_v6 = vld [vmem:[#allocation29_spill] sm:$0xff] }
  0xed   : > { %4154 = vmatmul.mubr.msk.f32.gmra.mrb[2].mxu1 %vm214_vm1, %v4908_v42  ;;  %4375 = vmatmul.mubr.msk.f32.gmra.mrb[16].mxu0 %vm214_vm1, %v6248_v15  ;;  %v6252_v42 = vld [vmem:[#allocation30_spill] sm:$0xff] }
  0xee   : > { %4156 = vmatprep.mubr.msk.f32.mxu1 %vm214_vm1, %v4914_v46  ;;  %4377 = vmatprep.mubr.msk.f32.mxu0 %vm214_vm1, %v6249_v43  ;;  %v6253_v46 = vld [vmem:[#allocation32_spill] sm:$0xff] }
  0xf1   : > { %4157 = vmatmul.mubr.msk.f32.gmra.mrb[4].mxu1 %vm214_vm1, %v4916_v47  ;;  %4378 = vmatmul.mubr.msk.f32.gmra.mrb[18].mxu0 %vm214_vm1, %v6250_v41  ;;  %v6254_v47 = vld [vmem:[#allocation34_spill] sm:$0xff] }
  0xf2   : > { %4159 = vmatprep.mubr.msk.f32.mxu1 %vm214_vm1, %v4930_v55  ;;  %4380 = vmatprep.mubr.msk.f32.mxu0 %vm214_vm1, %v6251_v6  ;;  %v6255_v55 = vld [vmem:[#allocation36_spill] sm:$0xff] }
  0xf5   : > { %4160 = vmatmul.mubr.msk.f32.gmra.mrb[6].mxu1 %vm214_vm1, %v4932_v56  ;;  %4381 = vmatmul.mubr.msk.f32.gmra.mrb[20].mxu0 %vm214_vm1, %v6252_v42  ;;  %v1736_v56 = vrot.slane %v5452_v36, 1 }
  0xf6   : > { %4162 = vmatprep.mubr.msk.f32.mxu1 %vm214_vm1, %v4960_v0  ;;  %4383 = vmatprep.mubr.msk.f32.mxu0 %vm214_vm1, %v6253_v46  ;;  %v6256_v0 = vld [vmem:[#allocation38_spill] sm:$0xff] }
  0xf7   : > { %v5773_v50 = vsel %vm392_vm4, %v1736_v56, %v1737_v57 }
  0xf9   : > { %4163 = vmatmul.mubr.msk.f32.gmra.mrb[8].mxu1 %vm214_vm1, %v4962_v1  ;;  %4384 = vmatmul.mubr.msk.f32.gmra.mrb[22].mxu0 %vm214_vm1, %v6254_v47  ;;  %v6257_v1 = vld [vmem:[#allocation39_spill] sm:$0xff]  ;;  %v5775_v47 = vld [vmem:[#allocation2 + $0x1a8] sm:$0x3] }
  0xfa   : > { %4165 = vmatprep.mubr.msk.f32.mxu1 %vm214_vm1, %v4983_v11  ;;  %4386 = vmatprep.mubr.msk.f32.mxu0 %vm214_vm1, %v6255_v55  ;;  %v1739_v11 = vrot.slane %v5473_v51, 1  ;;  %v2548_v55 = vrot.slane %v5647_v53, 1  ;;  %v2550_v51 = vrot.slane %v5775_v47, 1 }
  0xfc   : > { %v2549_v56 = vsel %vm392_vm4, %v2547_v26, %v2548_v55 }
  0xfd   : > { %4166 = vmatmul.mubr.msk.f32.gmra.mrb[10].mxu1 %vm214_vm1, %v4985_v12  ;;  %4387 = vmatmul.mubr.msk.f32.gmra.mrb[24].mxu0 %vm214_vm1, %v6256_v0  ;;  %v6258_v12 = vld [vmem:[#allocation40_spill] sm:$0xff] }
  0xfe   : > { %4168 = vmatprep.mubr.msk.f32.mxu1 %vm214_vm1, %v5027_v32  ;;  %4389 = vmatprep.mubr.msk.f32.mxu0 %vm214_vm1, %v6257_v1  ;;  %v5786_v32 = vsel %vm392_vm4, %v1737_v57, %v1739_v11 }
 0x101   : > { %4169 = vmatmul.mubr.msk.f32.gmra.mrb[12].mxu1 %vm214_vm1, %v5029_v33  ;;  %4390 = vmatmul.mubr.msk.f32.gmra.mrb[26].mxu0 %vm214_vm1, %v6258_v12  ;;  %v2551_v33 = vsel %vm392_vm4, %v2548_v55, %v2550_v51 }
 0x102   : > { %4171 = vmatprep.mubr.msk.f32.mxu1 %vm214_vm1, %v5051_v48  ;;  %4392 = vmatprep.mubr.msk.f32.mxu0 %vm214_vm1, %v5773_v50  ;;  %v6261_v48 = vld [vmem:[#allocation44_spill] sm:$0xff] }
 0x105   : > { %4172 = vmatmul.mubr.msk.f32.gmra.mrb[14].mxu1 %vm214_vm1, %v5053_v49  ;;  %4393 = vmatmul.mubr.msk.f32.gmra.mrb[28].mxu0 %vm214_vm1, %v5786_v32  ;;  %v6262_v49 = vld [vmem:[#allocation36_spill] sm:$0xff] }
 0x106   : > { %4174 = vmatprep.mubr.msk.f32.mxu1 %vm214_vm1, %v5074_v4  ;;  %4395 = vmatprep.mubr.msk.f32.mxu0 %vm214_vm1, %v2549_v56  ;;  %v6263_v4 = vld [vmem:[#allocation45_spill] sm:$0xff] }
 0x109   : > { %4175 = vmatmul.mubr.msk.f32.gmra.mrb[16].mxu1 %vm214_vm1, %v5076_v7  ;;  %4396 = vmatmul.mubr.msk.f32.gmra.mrb[30].mxu0 %vm214_vm1, %v2551_v33  ;;  %v6264_v7 = vld [vmem:[#allocation46_spill] sm:$0xff] }
 0x10a   : > { %4177 = vmatprep.mubr.msk.f32.mxu1 %vm214_vm1, %v5091_v16  ;;  %4400 = vmatprep.mubr.msk.f32.mxu0 %vm214_vm1, %v5158_v18  ;;  %v6265_v16 = vld [vmem:[#allocation47_spill] sm:$0xff]  ;;  %v2821_v18 = vrot.slane %v5775_v47, 2 }
 0x10d   : > { %4178 = vmatmul.mubr.msk.f32.gmra.mrb[18].mxu1 %vm214_vm1, %v5101_v24  ;;  %4401 = vmatmul.mubr.msk.f32.vlgmr.msra.gmra.mrb[0].mxu0 %vm214_vm1, %v6219_v9  ;;  %v2819_v24 = vrot.slane %v5647_v53, 2 }
 0x10e   : > { %4180 = vmatprep.mubr.msk.f32.mxu1 %vm214_vm1, %v5128_v59  ;;  %4403 = vmatprep.mubr.msk.f32.mxu0 %vm214_vm1, %v6220_v13  ;;  %v6266_v59 = vld [vmem:[#allocation48_spill] sm:$0xff] }
 0x111   : > { %4181 = vmatmul.mubr.msk.f32.gmra.mrb[20].mxu1 %vm214_vm1, %v5130_v61  ;;  %4404 = vmatmul.mubr.msk.f32.gmra.mrb[2].mxu0 %vm214_vm1, %v6221_v2  ;;  %v6267_v61 = vld [vmem:[#allocation49_spill] sm:$0xff] }
 0x112   : > { %4183 = vmatprep.mubr.msk.f32.mxu1 %vm214_vm1, %v5160_v21  ;;  %4406 = vmatprep.mubr.msk.f32.mxu0 %vm214_vm1, %v6222_v40 }
 0x115   : > { %4184 = vmatmul.mubr.msk.f32.gmra.mrb[22].mxu1 %vm214_vm1, %v5162_v25  ;;  %4407 = vmatmul.mubr.msk.f32.gmra.mrb[4].mxu0 %vm214_vm1, %v6223_v19  ;;  %v6268_v25 = vld [vmem:[#allocation50_spill] sm:$0xff] }
 0x116   : > { %4186 = vmatprep.mubr.msk.f32.mxu1 %vm214_vm1, %v5201_v14  ;;  %4409 = vmatprep.mubr.msk.f32.mxu0 %vm214_vm1, %v6224_v52  ;;  %v2822_v14 = vsel %vm1060_vm5, %v2819_v24, %v2821_v18 }
 0x119   : > { %4187 = vmatmul.mubr.msk.f32.gmra.mrb[24].mxu1 %vm214_vm1, %v5203_v17  ;;  %4410 = vmatmul.mubr.msk.f32.gmra.mrb[6].mxu0 %vm214_vm1, %v6225_v10  ;;  %v2818_v17 = vrot.slane %v5637_v31, 2 }
 0x11a   : > { %4189 = vmatprep.mubr.msk.f32.mxu1 %vm214_vm1, %v5233_v34  ;;  %4412 = vmatprep.mubr.msk.f32.mxu0 %vm214_vm1, %v6226_v45 }
 0x11b   : > { %v2820_v21 = vsel %vm1060_vm5, %v2818_v17, %v2819_v24 }
 0x11d   : > { %4190 = vmatmul.mubr.msk.f32.gmra.mrb[26].mxu1 %vm214_vm1, %v5235_v54  ;;  %4413 = vmatmul.mubr.msk.f32.gmra.mrb[8].mxu0 %vm214_vm1, %v5309_v30 }
 0x11e   : > { %4192 = vmatprep.mubr.msk.f32.mxu1 %vm214_vm1, %v5265_v28  ;;  %4415 = vmatprep.mubr.msk.f32.mxu0 %vm214_vm1, %v5317_v3 }
 0x121   : > { %4193 = vmatmul.mubr.msk.f32.gmra.mrb[28].mxu1 %vm214_vm1, %v5267_v27  ;;  %4416 = vmatmul.mubr.msk.f32.gmra.mrb[10].mxu0 %vm214_vm1, %v5333_v58 }
 0x122   : > { %4195 = vmatprep.mubr.msk.f32.mxu1 %vm214_vm1, %v5452_v36  ;;  %4418 = vmatprep.mubr.msk.f32.mxu0 %vm214_vm1, %v5337_v44  ;;  %v6260_v36 = vld [vmem:[#allocation34_spill] sm:$0xff] }
 0x125   : > { %4196 = vmatmul.mubr.msk.f32.gmra.mrb[30].mxu1 %vm214_vm1, %v5454_v35  ;;  %4419 = vmatmul.mubr.msk.f32.gmra.mrb[12].mxu0 %vm214_vm1, %v5350_v62  ;;  %v6259_v35 = vld [vmem:[#allocation41_spill] sm:$0xff] }
 0x126   : > { %4224 = vmatprep.mubr.msk.f32.mxu1 %vm214_vm1, %v6244_v22  ;;  %4421 = vmatprep.mubr.msk.f32.mxu0 %vm214_vm1, %v5354_v38 }
 0x129   : > { %4225 = vmatmul.mubr.msk.f32.vlgmr.msra.gmra.mrb[16].mxu1 %vm214_vm1, %v6246_v60  ;;  %4422 = vmatmul.mubr.msk.f32.gmra.mrb[14].mxu0 %vm214_vm1, %v5372_v23 }
 0x12a   : > { %4227 = vmatprep.mubr.msk.f32.mxu1 %vm214_vm1, %v6247_v5  ;;  %4424 = vmatprep.mubr.msk.f32.mxu0 %vm214_vm1, %v5378_v63 }
 0x12d   : > { %4228 = vmatmul.mubr.msk.f32.gmra.mrb[18].mxu1 %vm214_vm1, %v6248_v15  ;;  %4425 = vmatmul.mubr.msk.f32.gmra.mrb[16].mxu0 %vm214_vm1, %v5393_v20 }
 0x12e   : > { %4230 = vmatprep.mubr.msk.f32.mxu1 %vm214_vm1, %v6249_v43  ;;  %4427 = vmatprep.mubr.msk.f32.mxu0 %vm214_vm1, %v6259_v35 }
 0x131   : > { %4231 = vmatmul.mubr.msk.f32.gmra.mrb[20].mxu1 %vm214_vm1, %v6250_v41  ;;  %4428 = vmatmul.mubr.msk.f32.gmra.mrb[18].mxu0 %vm214_vm1, %v5410_v39 }
 0x132   : > { %4233 = vmatprep.mubr.msk.f32.mxu1 %vm214_vm1, %v6251_v6  ;;  %4430 = vmatprep.mubr.msk.f32.mxu0 %vm214_vm1, %v5414_v37 }
 0x135   : > { %4234 = vmatmul.mubr.msk.f32.gmra.mrb[22].mxu1 %vm214_vm1, %v6252_v42  ;;  %4431 = vmatmul.mubr.msk.f32.gmra.mrb[20].mxu0 %vm214_vm1, %v6234_v8 }
 0x136   : > { %4236 = vmatprep.mubr.msk.f32.mxu1 %vm214_vm1, %v6253_v46  ;;  %4433 = vmatprep.mubr.msk.f32.mxu0 %vm214_vm1, %v6236_v29 }
 0x139   : > { %4237 = vmatmul.mubr.msk.f32.gmra.mrb[24].mxu1 %vm214_vm1, %v6260_v36  ;;  %4434 = vmatmul.mubr.msk.f32.gmra.mrb[22].mxu0 %vm214_vm1, %v6261_v48 }
 0x13a   : > { %4239 = vmatprep.mubr.msk.f32.mxu1 %vm214_vm1, %v6262_v49  ;;  %4436 = vmatprep.mubr.msk.f32.mxu0 %vm214_vm1, %v6263_v4 }
 0x13d   : > { %4240 = vmatmul.mubr.msk.f32.gmra.mrb[26].mxu1 %vm214_vm1, %v6256_v0  ;;  %4437 = vmatmul.mubr.msk.f32.gmra.mrb[24].mxu0 %vm214_vm1, %v6264_v7 }
 0x13e   : > { %4242 = vmatprep.mubr.msk.f32.mxu1 %vm214_vm1, %v6257_v1  ;;  %4439 = vmatprep.mubr.msk.f32.mxu0 %vm214_vm1, %v6265_v16 }
 0x141   : > { %4243 = vmatmul.mubr.msk.f32.gmra.mrb[28].mxu1 %vm214_vm1, %v6258_v12  ;;  %4440 = vmatmul.mubr.msk.f32.gmra.mrb[26].mxu0 %vm214_vm1, %v6266_v59 }
 0x142   : > { %4245 = vmatprep.mubr.msk.f32.mxu1 %vm214_vm1, %v5773_v50  ;;  %4442 = vmatprep.mubr.msk.f32.mxu0 %vm214_vm1, %v6267_v61 }
 0x145   : > { %4246 = vmatmul.mubr.msk.f32.gmra.mrb[30].mxu1 %vm214_vm1, %v5786_v32  ;;  %4443 = vmatmul.mubr.msk.f32.gmra.mrb[28].mxu0 %vm214_vm1, %v6268_v25 }
 0x146   : > { %4445 = vmatprep.mubr.msk.f32.mxu0 %vm214_vm1, %v2820_v21 }
 0x149   : > { %4446 = vmatmul.mubr.msk.f32.gmra.mrb[30].mxu0 %vm214_vm1, %v2822_v14 }
 0x1bc   : > { %v4152_v34 = vpop.f32.mrb[0].mxu1 }
 0x1bd   : > { %v1544_v54 = vpop.f32.mrb[1].mxu1 }
 0x1c0   : > { %v4155_v28 = vpop.f32.mrb[2].mxu1 }
 0x1c1   : > { %v1554_v27 = vpop.f32.mrb[3].mxu1 }
 0x1c4   : > { %v4158_v3 = vpop.f32.mrb[4].mxu1 }
 0x1c5   : > { %v1564_v30 = vpop.f32.mrb[5].mxu1 }
 0x1c8   : > { %v4161_v58 = vpop.f32.mrb[6].mxu1 }
 0x1c9   : > { %v1574_v44 = vpop.f32.mrb[7].mxu1 }
 0x1cc   : > { %v5928_v62 = vpop.f32.mrb[8].mxu1 }
 0x1cd   : > { %v5930_v38 = vpop.f32.mrb[9].mxu1 }
 0x1d0   : > { %v5932_v23 = vpop.f32.mrb[10].mxu1 }
 0x1d1   : > { %v5934_v63 = vpop.f32.mrb[11].mxu1 }
 0x1d4   : > { %v5936_v20 = vpop.f32.mrb[12].mxu1 }
 0x1d5   : > { %v5938_v29 = vpop.f32.mrb[13].mxu1 }
 0x1d8   : > { %v5940_v39 = vpop.f32.mrb[14].mxu1 }
 0x1d9   : > { %v5942_v37 = vpop.f32.mrb[15].mxu1 }
 0x1e0   : > { %v4402_v50 = vpop.f32.mrb[0].mxu0 }
 0x1e1   : > { %v4450_v26 = vadd.f32 %v4402_v50, %v4152_v34  ;;  %v2898_v57 = vpop.f32.mrb[1].mxu0 }
 0x1e2   : > { %v4451_v9 = vadd.f32 %v2898_v57, %v1544_v54 }
 0x1e3   : > { %3091 = vst.msk [vmem:[%s5949_s16 + $0x8] sm:$0xff] %vm3089_vm6, %v4450_v26  ;;  %v3123_v13 = vsel %vm3089_vm6, %v4450_v26, 0.0  ;;  %v3192_v2 = vmul.f32 %v4450_v26, %v4450_v26 }
 0x1e4   : > { %3090 = vst.msk [vmem:[%s5949_s16] sm:$0xff] %vm3089_vm6, %v4451_v9  ;;  %v3122_v40 = vsel %vm3089_vm6, %v4451_v9, 0.0  ;;  %v3191_v19 = vmul.f32 %v4451_v9, %v4451_v9  ;;  %v4405_v52 = vpop.f32.mrb[2].mxu0 }
 0x1e5   : > { %v3224_v10 = vsel %vm3089_vm6, %v3192_v2, 0.0  ;;  %v3124_v45 = vadd.f32 %v3123_v13, %v3122_v40  ;;  %v4452_v31 = vadd.f32 %v4405_v52, %v4155_v28  ;;  %v2908_v53 = vpop.f32.mrb[3].mxu0 }
 0x1e6   : > { %v3223_v8 = vsel %vm3089_vm6, %v3191_v19, 0.0  ;;  %v4453_v22 = vadd.f32 %v2908_v53, %v1554_v27 }
 0x1e7   : > { %v3225_v60 = vadd.f32 %v3224_v10, %v3223_v8  ;;  %3093 = vst.msk [vmem:[%s5949_s16 + $0x18] sm:$0xff] %vm3089_vm6, %v4452_v31  ;;  %v3194_v5 = vmul.f32 %v4452_v31, %v4452_v31  ;;  %v3127_v47 = vsel %vm3089_vm6, %v4452_v31, 0.0 }
 0x1e8   : > { %3092 = vst.msk [vmem:[%s5949_s16 + $0x10] sm:$0xff] %vm3089_vm6, %v4453_v22  ;;  %v3125_v15 = vsel %vm3089_vm6, %v4453_v22, 0.0  ;;  %v3193_v43 = vmul.f32 %v4453_v22, %v4453_v22  ;;  %v4408_v41 = vpop.f32.mrb[4].mxu0 }
 0x1e9   : > { %v3126_v6 = vadd.f32 %v3125_v15, %v3124_v45  ;;  %v4454_v42 = vadd.f32 %v4408_v41, %v4158_v3  ;;  %v2918_v46 = vpop.f32.mrb[5].mxu0  ;;  %v3228_v12 = vsel %vm3089_vm6, %v3194_v5, 0.0 }
 0x1ea   : > { %v3226_v55 = vsel %vm3089_vm6, %v3193_v43, 0.0  ;;  %v4455_v0 = vadd.f32 %v2918_v46, %v1564_v30 }
 0x1eb   : > { %v3227_v1 = vadd.f32 %v3226_v55, %v3225_v60  ;;  %3095 = vst.msk [vmem:[%s5949_s16 + $0x28] sm:$0xff] %vm3089_vm6, %v4454_v42  ;;  %v3128_v11 = vadd.f32 %v3127_v47, %v3126_v6  ;;  %v3196_v32 = vmul.f32 %v4454_v42, %v4454_v42  ;;  %v3131_v4 = vsel %vm3089_vm6, %v4454_v42, 0.0 }
 0x1ec   : > { %3094 = vst.msk [vmem:[%s5949_s16 + $0x20] sm:$0xff] %vm3089_vm6, %v4455_v0  ;;  %v3129_v51 = vsel %vm3089_vm6, %v4455_v0, 0.0  ;;  %v3195_v56 = vmul.f32 %v4455_v0, %v4455_v0  ;;  %v4411_v33 = vpop.f32.mrb[6].mxu0 }
 0x1ed   : > { %v3130_v35 = vadd.f32 %v3129_v51, %v3128_v11  ;;  %v3229_v36 = vadd.f32 %v3228_v12, %v3227_v1  ;;  %v4456_v48 = vadd.f32 %v4411_v33, %v4161_v58  ;;  %v2928_v49 = vpop.f32.mrb[7].mxu0  ;;  %v3232_v59 = vsel %vm3089_vm6, %v3196_v32, 0.0 }
 0x1ee   : > { %v3230_v7 = vsel %vm3089_vm6, %v3195_v56, 0.0  ;;  %v4457_v16 = vadd.f32 %v2928_v49, %v1574_v44 }
 0x1ef   : > { %v3231_v17 = vadd.f32 %v3230_v7, %v3229_v36  ;;  %3097 = vst.msk [vmem:[%s5949_s16 + $0x38] sm:$0xff] %vm3089_vm6, %v4456_v48  ;;  %v3132_v24 = vadd.f32 %v3131_v4, %v3130_v35  ;;  %v3198_v61 = vmul.f32 %v4456_v48, %v4456_v48  ;;  %v3135_v27 = vsel %vm3089_vm6, %v4456_v48, 0.0 }
 0x1f0   : > { %3096 = vst.msk [vmem:[%s5949_s16 + $0x30] sm:$0xff] %vm3089_vm6, %v4457_v16  ;;  %v3133_v18 = vsel %vm3089_vm6, %v4457_v16, 0.0  ;;  %v3197_v21 = vmul.f32 %v4457_v16, %v4457_v16  ;;  %v4414_v25 = vpop.f32.mrb[8].mxu0 }
 0x1f1   : > { %v3134_v14 = vadd.f32 %v3133_v18, %v3132_v24  ;;  %v3233_v34 = vadd.f32 %v3232_v59, %v3231_v17  ;;  %v4458_v54 = vadd.f32 %v4414_v25, %v5928_v62  ;;  %v2938_v28 = vpop.f32.mrb[9].mxu0  ;;  %v3236_v50 = vsel %vm3089_vm6, %v3198_v61, 0.0 }
 0x1f2   : > { %v3234_v3 = vsel %vm3089_vm6, %v3197_v21, 0.0  ;;  %v4459_v30 = vadd.f32 %v2938_v28, %v5930_v38 }
 0x1f3   : > { %v3235_v58 = vadd.f32 %v3234_v3, %v3233_v34  ;;  %3099 = vst.msk [vmem:[%s5949_s16 + $0x48] sm:$0xff] %vm3089_vm6, %v4458_v54  ;;  %v3136_v44 = vadd.f32 %v3135_v27, %v3134_v14  ;;  %v3200_v26 = vmul.f32 %v4458_v54, %v4458_v54  ;;  %v3139_v19 = vsel %vm3089_vm6, %v4458_v54, 0.0 }
 0x1f4   : > { %3098 = vst.msk [vmem:[%s5949_s16 + $0x40] sm:$0xff] %vm3089_vm6, %v4459_v30  ;;  %v3137_v62 = vsel %vm3089_vm6, %v4459_v30, 0.0  ;;  %v3199_v57 = vmul.f32 %v4459_v30, %v4459_v30  ;;  %v4417_v9 = vpop.f32.mrb[10].mxu0 }
 0x1f5   : > { %v3138_v13 = vadd.f32 %v3137_v62, %v3136_v44  ;;  %v3237_v2 = vadd.f32 %v3236_v50, %v3235_v58  ;;  %v4460_v40 = vadd.f32 %v4417_v9, %v5932_v23  ;;  %v2948_v38 = vpop.f32.mrb[11].mxu0  ;;  %v3240_v53 = vsel %vm3089_vm6, %v3200_v26, 0.0 }
 0x1f6   : > { %v3238_v52 = vsel %vm3089_vm6, %v3199_v57, 0.0  ;;  %v4461_v10 = vadd.f32 %v2948_v38, %v5934_v63 }
 0x1f7   : > { %v3239_v45 = vadd.f32 %v3238_v52, %v3237_v2  ;;  %3101 = vst.msk [vmem:[%s5949_s16 + $0x58] sm:$0xff] %vm3089_vm6, %v4460_v40  ;;  %v3140_v31 = vadd.f32 %v3139_v19, %v3138_v13  ;;  %v3202_v8 = vmul.f32 %v4460_v40, %v4460_v40  ;;  %v3143_v41 = vsel %vm3089_vm6, %v4460_v40, 0.0 }
 0x1f8   : > { %3100 = vst.msk [vmem:[%s5949_s16 + $0x50] sm:$0xff] %vm3089_vm6, %v4461_v10  ;;  %v3141_v23 = vsel %vm3089_vm6, %v4461_v10, 0.0  ;;  %v3201_v22 = vmul.f32 %v4461_v10, %v4461_v10  ;;  %v4420_v60 = vpop.f32.mrb[12].mxu0 }
 0x1f9   : > { %v3142_v5 = vadd.f32 %v3141_v23, %v3140_v31  ;;  %v3241_v15 = vadd.f32 %v3240_v53, %v3239_v45  ;;  %v4462_v43 = vadd.f32 %v4420_v60, %v5936_v20  ;;  %v2958_v63 = vpop.f32.mrb[13].mxu0  ;;  %v3244_v55 = vsel %vm3089_vm6, %v3202_v8, 0.0 }
 0x1fa   : > { %v3242_v6 = vsel %vm3089_vm6, %v3201_v22, 0.0  ;;  %v4463_v42 = vadd.f32 %v2958_v63, %v5938_v29 }
 0x1fb   : > { %v3243_v46 = vadd.f32 %v3242_v6, %v3241_v15  ;;  %3103 = vst.msk [vmem:[%s5949_s16 + $0x68] sm:$0xff] %vm3089_vm6, %v4462_v43  ;;  %v3144_v47 = vadd.f32 %v3143_v41, %v3142_v5  ;;  %v3204_v0 = vmul.f32 %v4462_v43, %v4462_v43  ;;  %v3147_v35 = vsel %vm3089_vm6, %v4462_v43, 0.0 }
 0x1fc   : > { %3102 = vst.msk [vmem:[%s5949_s16 + $0x60] sm:$0xff] %vm3089_vm6, %v4463_v42  ;;  %v3145_v1 = vsel %vm3089_vm6, %v4463_v42, 0.0  ;;  %v3203_v20 = vmul.f32 %v4463_v42, %v4463_v42  ;;  %v4226_v11 = vpop.f32.mrb[16].mxu1  ;;  %v4423_v12 = vpop.f32.mrb[14].mxu0 }
 0x1fd   : > { %v3146_v32 = vadd.f32 %v3145_v1, %v3144_v47  ;;  %v3245_v51 = vadd.f32 %v3244_v55, %v3243_v46  ;;  %v4464_v29 = vadd.f32 %v4423_v12, %v5940_v39  ;;  %v1896_v56 = vpop.f32.mrb[17].mxu1  ;;  %v2968_v33 = vpop.f32.mrb[15].mxu0  ;;  %v3248_v7 = vsel %vm3089_vm6, %v3204_v0, 0.0 }
 0x1fe   : > { %v3246_v36 = vsel %vm3089_vm6, %v3203_v20, 0.0  ;;  %v4465_v48 = vadd.f32 %v2968_v33, %v5942_v37 }
 0x1ff   : > { %v3247_v49 = vadd.f32 %v3246_v36, %v3245_v51  ;;  %3105 = vst.msk [vmem:[%s5949_s16 + $0x78] sm:$0xff] %vm3089_vm6, %v4464_v29  ;;  %v3148_v4 = vadd.f32 %v3147_v35, %v3146_v32  ;;  %v3206_v16 = vmul.f32 %v4464_v29, %v4464_v29  ;;  %v3151_v14 = vsel %vm3089_vm6, %v4464_v29, 0.0 }
 0x200   : > { %3104 = vst.msk [vmem:[%s5949_s16 + $0x70] sm:$0xff] %vm3089_vm6, %v4465_v48  ;;  %v3149_v39 = vsel %vm3089_vm6, %v4465_v48, 0.0  ;;  %v3205_v17 = vmul.f32 %v4465_v48, %v4465_v48  ;;  %v4229_v24 = vpop.f32.mrb[18].mxu1  ;;  %v4426_v59 = vpop.f32.mrb[16].mxu0 }
 0x201   : > { %v3150_v61 = vadd.f32 %v3149_v39, %v3148_v4  ;;  %v3249_v18 = vadd.f32 %v3248_v7, %v3247_v49  ;;  %v4466_v21 = vadd.f32 %v4426_v59, %v4226_v11  ;;  %v1906_v37 = vpop.f32.mrb[19].mxu1  ;;  %v2978_v25 = vpop.f32.mrb[17].mxu0  ;;  %v3252_v3 = vsel %vm3089_vm6, %v3206_v16, 0.0 }
 0x202   : > { %v3250_v34 = vsel %vm3089_vm6, %v3205_v17, 0.0  ;;  %v4467_v54 = vadd.f32 %v2978_v25, %v1896_v56 }
 0x203   : > { %v3251_v28 = vadd.f32 %v3250_v34, %v3249_v18  ;;  %3107 = vst.msk [vmem:[%s5949_s16 + $0x88] sm:$0xff] %vm3089_vm6, %v4466_v21  ;;  %v3152_v27 = vadd.f32 %v3151_v14, %v3150_v61  ;;  %v3208_v30 = vmul.f32 %v4466_v21, %v4466_v21  ;;  %v3155_v40 = vsel %vm3089_vm6, %v4466_v21, 0.0 }
 0x204   : > { %3106 = vst.msk [vmem:[%s5949_s16 + $0x80] sm:$0xff] %vm3089_vm6, %v4467_v54  ;;  %v3153_v58 = vsel %vm3089_vm6, %v4467_v54, 0.0  ;;  %v3207_v44 = vmul.f32 %v4467_v54, %v4467_v54  ;;  %v4232_v50 = vpop.f32.mrb[20].mxu1  ;;  %v4429_v26 = vpop.f32.mrb[18].mxu0 }
 0x205   : > { %v3154_v62 = vadd.f32 %v3153_v58, %v3152_v27  ;;  %v3253_v57 = vadd.f32 %v3252_v3, %v3251_v28  ;;  %v4468_v9 = vadd.f32 %v4429_v26, %v4229_v24  ;;  %v1916_v13 = vpop.f32.mrb[21].mxu1  ;;  %v2988_v2 = vpop.f32.mrb[19].mxu0  ;;  %v3256_v45 = vsel %vm3089_vm6, %v3208_v30, 0.0 }
 0x206   : > { %v3254_v38 = vsel %vm3089_vm6, %v3207_v44, 0.0  ;;  %v4469_v19 = vadd.f32 %v2988_v2, %v1906_v37 }
 0x207   : > { %v3255_v52 = vadd.f32 %v3254_v38, %v3253_v57  ;;  %3109 = vst.msk [vmem:[%s5949_s16 + $0x98] sm:$0xff] %vm3089_vm6, %v4468_v9  ;;  %v3156_v10 = vadd.f32 %v3155_v40, %v3154_v62  ;;  %v3210_v31 = vmul.f32 %v4468_v9, %v4468_v9  ;;  %v3159_v41 = vsel %vm3089_vm6, %v4468_v9, 0.0 }
 0x208   : > { %3108 = vst.msk [vmem:[%s5949_s16 + $0x90] sm:$0xff] %vm3089_vm6, %v4469_v19  ;;  %v3157_v53 = vsel %vm3089_vm6, %v4469_v19, 0.0  ;;  %v3209_v8 = vmul.f32 %v4469_v19, %v4469_v19  ;;  %v4235_v23 = vpop.f32.mrb[22].mxu1  ;;  %v4432_v22 = vpop.f32.mrb[20].mxu0 }
 0x209   : > { %v3158_v60 = vadd.f32 %v3157_v53, %v3156_v10  ;;  %v3257_v5 = vadd.f32 %v3256_v45, %v3255_v52  ;;  %v4470_v15 = vadd.f32 %v4432_v22, %v4232_v50  ;;  %v1926_v43 = vpop.f32.mrb[23].mxu1  ;;  %v2998_v63 = vpop.f32.mrb[21].mxu0  ;;  %v3260_v55 = vsel %vm3089_vm6, %v3210_v31, 0.0 }
 0x20a   : > { %v3258_v6 = vsel %vm3089_vm6, %v3209_v8, 0.0  ;;  %v4471_v42 = vadd.f32 %v2998_v63, %v1916_v13 }
 0x20b   : > { %v3259_v46 = vadd.f32 %v3258_v6, %v3257_v5  ;;  %3111 = vst.msk [vmem:[%s5949_s16 + $0xa8] sm:$0xff] %vm3089_vm6, %v4470_v15  ;;  %v3160_v47 = vadd.f32 %v3159_v41, %v3158_v60  ;;  %v3212_v0 = vmul.f32 %v4470_v15, %v4470_v15  ;;  %v3163_v35 = vsel %vm3089_vm6, %v4470_v15, 0.0 }
 0x20c   : > { %3110 = vst.msk [vmem:[%s5949_s16 + $0xa0] sm:$0xff] %vm3089_vm6, %v4471_v42  ;;  %v3161_v1 = vsel %vm3089_vm6, %v4471_v42, 0.0  ;;  %v3211_v20 = vmul.f32 %v4471_v42, %v4471_v42  ;;  %v4238_v11 = vpop.f32.mrb[24].mxu1  ;;  %v4435_v12 = vpop.f32.mrb[22].mxu0 }
 0x20d   : > { %v3162_v32 = vadd.f32 %v3161_v1, %v3160_v47  ;;  %v3261_v51 = vadd.f32 %v3260_v55, %v3259_v46  ;;  %v4472_v29 = vadd.f32 %v4435_v12, %v4235_v23  ;;  %v1936_v56 = vpop.f32.mrb[25].mxu1  ;;  %v3008_v33 = vpop.f32.mrb[23].mxu0  ;;  %v3264_v7 = vsel %vm3089_vm6, %v3212_v0, 0.0 }
 0x20e   : > { %v3262_v36 = vsel %vm3089_vm6, %v3211_v20, 0.0  ;;  %v4473_v48 = vadd.f32 %v3008_v33, %v1926_v43 }
 0x20f   : > { %v3263_v49 = vadd.f32 %v3262_v36, %v3261_v51  ;;  %3113 = vst.msk [vmem:[%s5949_s16 + $0xb8] sm:$0xff] %vm3089_vm6, %v4472_v29  ;;  %v3164_v4 = vadd.f32 %v3163_v35, %v3162_v32  ;;  %v3214_v16 = vmul.f32 %v4472_v29, %v4472_v29  ;;  %v3167_v14 = vsel %vm3089_vm6, %v4472_v29, 0.0 }
 0x210   : > { %3112 = vst.msk [vmem:[%s5949_s16 + $0xb0] sm:$0xff] %vm3089_vm6, %v4473_v48  ;;  %v3165_v39 = vsel %vm3089_vm6, %v4473_v48, 0.0  ;;  %v3213_v17 = vmul.f32 %v4473_v48, %v4473_v48  ;;  %v4241_v24 = vpop.f32.mrb[26].mxu1  ;;  %v4438_v59 = vpop.f32.mrb[24].mxu0 }
 0x211   : > { %v3166_v61 = vadd.f32 %v3165_v39, %v3164_v4  ;;  %v3265_v18 = vadd.f32 %v3264_v7, %v3263_v49  ;;  %v4474_v21 = vadd.f32 %v4438_v59, %v4238_v11  ;;  %v1946_v37 = vpop.f32.mrb[27].mxu1  ;;  %v3018_v25 = vpop.f32.mrb[25].mxu0  ;;  %v3268_v3 = vsel %vm3089_vm6, %v3214_v16, 0.0 }
 0x212   : > { %v3266_v34 = vsel %vm3089_vm6, %v3213_v17, 0.0  ;;  %v4475_v54 = vadd.f32 %v3018_v25, %v1936_v56 }
 0x213   : > { %v3267_v28 = vadd.f32 %v3266_v34, %v3265_v18  ;;  %3115 = vst.msk [vmem:[%s5949_s16 + $0xc8] sm:$0xff] %vm3089_vm6, %v4474_v21  ;;  %v3168_v27 = vadd.f32 %v3167_v14, %v3166_v61  ;;  %v3216_v30 = vmul.f32 %v4474_v21, %v4474_v21  ;;  %v3171_v40 = vsel %vm3089_vm6, %v4474_v21, 0.0 }
 0x214   : > { %3114 = vst.msk [vmem:[%s5949_s16 + $0xc0] sm:$0xff] %vm3089_vm6, %v4475_v54  ;;  %v3169_v58 = vsel %vm3089_vm6, %v4475_v54, 0.0  ;;  %v3215_v44 = vmul.f32 %v4475_v54, %v4475_v54  ;;  %v4244_v50 = vpop.f32.mrb[28].mxu1  ;;  %v4441_v26 = vpop.f32.mrb[26].mxu0 }
 0x215   : > { %v3170_v62 = vadd.f32 %v3169_v58, %v3168_v27  ;;  %v3269_v57 = vadd.f32 %v3268_v3, %v3267_v28  ;;  %v4476_v9 = vadd.f32 %v4441_v26, %v4241_v24  ;;  %v1956_v13 = vpop.f32.mrb[29].mxu1  ;;  %v3028_v2 = vpop.f32.mrb[27].mxu0  ;;  %v3272_v45 = vsel %vm3089_vm6, %v3216_v30, 0.0 }
 0x216   : > { %v3270_v38 = vsel %vm3089_vm6, %v3215_v44, 0.0  ;;  %v4477_v19 = vadd.f32 %v3028_v2, %v1946_v37 }
 0x217   : > { %v3271_v52 = vadd.f32 %v3270_v38, %v3269_v57  ;;  %3117 = vst.msk [vmem:[%s5949_s16 + $0xd8] sm:$0xff] %vm3089_vm6, %v4476_v9  ;;  %v3172_v10 = vadd.f32 %v3171_v40, %v3170_v62  ;;  %v3218_v31 = vmul.f32 %v4476_v9, %v4476_v9  ;;  %v3175_v41 = vsel %vm3089_vm6, %v4476_v9, 0.0 }
 0x218   : > { %3116 = vst.msk [vmem:[%s5949_s16 + $0xd0] sm:$0xff] %vm3089_vm6, %v4477_v19  ;;  %v3173_v53 = vsel %vm3089_vm6, %v4477_v19, 0.0  ;;  %v3217_v8 = vmul.f32 %v4477_v19, %v4477_v19  ;;  %v4247_v23 = vpop.f32.mrb[30].mxu1  ;;  %v4444_v22 = vpop.f32.mrb[28].mxu0 }
 0x219   : > { %v3174_v60 = vadd.f32 %v3173_v53, %v3172_v10  ;;  %v3273_v5 = vadd.f32 %v3272_v45, %v3271_v52  ;;  %v4478_v15 = vadd.f32 %v4444_v22, %v4244_v50  ;;  %v1966_v43 = vpop.f32.mrb[31].mxu1  ;;  %v3038_v63 = vpop.f32.mrb[29].mxu0  ;;  %v3276_v55 = vsel %vm3089_vm6, %v3218_v31, 0.0 }
 0x21a   : > { %v3274_v6 = vsel %vm3089_vm6, %v3217_v8, 0.0  ;;  %v4479_v42 = vadd.f32 %v3038_v63, %v1956_v13 }
 0x21b   : > { %v3275_v46 = vadd.f32 %v3274_v6, %v3273_v5  ;;  %3119 = vst.msk [vmem:[%s5949_s16 + $0xe8] sm:$0xff] %vm3089_vm6, %v4478_v15  ;;  %v3176_v47 = vadd.f32 %v3175_v41, %v3174_v60  ;;  %v3220_v0 = vmul.f32 %v4478_v15, %v4478_v15  ;;  %v3179_v56 = vsel %vm3089_vm6, %v4478_v15, 0.0 }
 0x21c   : > { %3118 = vst.msk [vmem:[%s5949_s16 + $0xe0] sm:$0xff] %vm3089_vm6, %v4479_v42  ;;  %v3177_v1 = vsel %vm3089_vm6, %v4479_v42, 0.0  ;;  %v3219_v20 = vmul.f32 %v4479_v42, %v4479_v42  ;;  %v4447_v11 = vpop.f32.mrb[30].mxu0 }
 0x21d   : > { %v3178_v12 = vadd.f32 %v3177_v1, %v3176_v47  ;;  %v3277_v32 = vadd.f32 %v3276_v55, %v3275_v46  ;;  %v4480_v51 = vadd.f32 %v4447_v11, %v4247_v23  ;;  %v3048_v29 = vpop.f32.mrb[31].mxu0  ;;  %v3280_v7 = vsel %vm3089_vm6, %v3220_v0, 0.0 }
 0x21e   : > { %v3278_v33 = vsel %vm3089_vm6, %v3219_v20, 0.0  ;;  %v4481_v35 = vadd.f32 %v3048_v29, %v1966_v43 }
 0x21f   : > { %v3279_v36 = vadd.f32 %v3278_v33, %v3277_v32  ;;  %3121 = vst.msk [vmem:[%s5949_s16 + $0xf8] sm:$0xff] %vm3089_vm6, %v4480_v51  ;;  %v3183_v48 = vsel %vm3089_vm6, %v4480_v51, 0.0  ;;  %v3222_v49 = vmul.f32 %v4480_v51, %v4480_v51  ;;  %v3180_v4 = vadd.f32 %v3179_v56, %v3178_v12 }
 0x220   : > { %3120 = vst.msk [vmem:[%s5949_s16 + $0xf0] sm:$0xff] %vm3089_vm6, %v4481_v35  ;;  %v3181_v16 = vsel %vm3089_vm6, %v4481_v35, 0.0  ;;  %v3221_v39 = vmul.f32 %v4481_v35, %v4481_v35 }
 0x221   : > { %v3284_v17 = vsel %vm3089_vm6, %v3222_v49, 0.0  ;;  %v3182_v24 = vadd.f32 %v3181_v16, %v3180_v4  ;;  %v3281_v59 = vadd.f32 %v3280_v7, %v3279_v36 }
 0x222   : > { %v3282_v61 = vsel %vm3089_vm6, %v3221_v39, 0.0 }
 0x223   : > { %v3184_v18 = vadd.f32 %v3183_v48, %v3182_v24  ;;  %v3283_v21 = vadd.f32 %v3282_v61, %v3281_v59 }
 0x225   : > { %v3185_v37 = vrot.slane %v3184_v18, 4  ;;  %v3285_v25 = vadd.f32 %v3284_v17, %v3283_v21 }
 0x227   : > { %v3186_v14 = vadd.f32 %v3185_v37, %v3184_v18  ;;  %v3286_v34 = vrot.slane %v3285_v25, 4 }
 0x229   : > { %v3187_v54 = vrot.slane %v3186_v14, 2  ;;  %v3287_v28 = vadd.f32 %v3286_v34, %v3285_v25 }
 0x22b   : > { %v3188_v27 = vadd.f32 %v3187_v54, %v3186_v14  ;;  %v3288_v3 = vrot.slane %v3287_v28, 2 }
 0x22d   : > { %v3189_v30 = vrot.slane %v3188_v27, 1  ;;  %v3289_v58 = vadd.f32 %v3288_v3, %v3287_v28 }
 0x22f   : > { %v3290_v44 = vrot.slane %v3289_v58, 1  ;;  %v3190_v50 = vadd.f32 %v3189_v30, %v3188_v27 }
 0x231   : > { %v3291_v26 = vadd.f32 %v3290_v44, %v3289_v58 }
 0x233   : > { %v3293_v62 = vsel %vm3292_vm7, %v3190_v50, %v3291_v26 }
 0x234   : > { %3295 = vst.msk [vmem:[%s181_s20] sm:$0x3] %vm3294_vm8, %v3293_v62 }
 0x235 PF: > { %s14_s12 = sadd.s32 1, %s4722_s12  }
 0x236   : > { %p11_p4 = scmp.ge.s32.totalorder %s14_s12, 4  }
 0x238   :  { %13 = sbr.rel (!%p11_p4) target bundleno = 1 (0x1), region = 80 }

// kernel: double_conv_forward.4
= control target key start
LH: loop header
LB: loop body
LE: loop exit
PB: predicated region body
PF: predicated region fallthrough
CT: control target
= control target key end

     0   :  { %s4843_s15 = smov 0   ;;  %s6249_s0 = inlined_call_operand.vmem [shape: f32[2,8], index: 0, kind: input, shape index: {}]   ;;  %s6250_s1 = inlined_call_operand.vmem [shape: f32[2,16,16,8], index: 1, kind: input, shape index: {}]   ;;  %s6251_s2 = inlined_call_operand.vmem [shape: f32[9,8,8], index: 2, kind: input, shape index: {}]   ;;  %s6252_s3 = inlined_call_operand.vmem [shape: f32[2,16,16,8], index: 3, kind: output, shape index: {0}]   ;;  %s6253_s4 = inlined_call_operand.vmem [shape: f32[2,2,8], index: 4, kind: output, shape index: {1}]  }
   0x1 LB: > { %s3484_s16 = sadd.s32 4294967295, %s4815_s15   ;;  %p3488_p0 = scmp.ge.s32.totalorder %s4815_s15, 1  ;;  %s4815_s15 = sphi %s4843_s15, %s15_s15  }
   0x2   : > { %p165_p1 = scmp.lt.s32.totalorder %s4815_s15, 3 }
   0x4   : > { %p166_p2 = pnand %p3488_p0, %p165_p1 }
   0x6   : > { %169 = sbr.rel (%p166_p2) target bundleno = 566 (0x236), region = 32 }
   0xd   : > { %v3494_v0 = vld [vmem:[%s6251_s2 + $0x8] sm:$0xff]  ;;  %vm346_vm0 = vcmask 64512   ;;  %vm349_vm1 = vcmask 58368   ;;  %v3625_v1 = vld [vmem:[%s6251_s2 + $0x20] sm:$0xff]  ;;  %v4817_v2 = vmov 0.0   ;;  %p4865_p3 = scmp.lt.s32.totalorder %s3484_s16, 1  ;;  %v242_v3 = vlaneseq }
   0xe   : > { %4091 = vmatprep.subr.mxu1 %v3494_v0  ;;  %347 = vst.msk [vmem:[#allocation2] sm:$0xff] %vm346_vm0, %v4817_v2  ;;  %348 = vst.msk [vmem:[#allocation2 + $0x8] sm:$0xff] %vm346_vm0, %v4817_v2  ;;  %4291 = vmatprep.subr.mxu0 %v3625_v1  ;;  %vm356_vm2 = vcmask 57344   ;;  %v4872_v4 = vld [vmem:[%s6251_s2] sm:$0xff]  ;;  %v4877_v5 = vld [vmem:[%s6251_s2 + $0x28] sm:$0xff]  ;;  %vm524_vm3 = vcmask 1046528  }
   0xf   : > { %352 = vst.msk [vmem:[#allocation2 + $0x198] sm:$0xff] %vm346_vm0, %v4817_v2  ;;  %353 = vst.msk [vmem:[#allocation2 + $0x1a0] sm:$0xff] %vm346_vm0, %v4817_v2  ;;  %4092 = vmatpush3.msra.mxu1 %v3494_v0  ;;  %4292 = vmatpush3.msra.mxu0 %v3625_v1  ;;  %s6420_s16 = smov (!%p4865_p3, %s3484_s16), 1  ;;  %v243_v6 = vshrl.u32 %v242_v3, 7  ;;  %v241_v7 = vld [vmem:[%s6249_s0] sm:$0x3] }
  0x10   : > { %350 = vst.msk [vmem:[#allocation2 + $0x10] sm:$0x3] %vm349_vm1, %v4817_v2  ;;  %354 = vst.msk [vmem:[#allocation2 + $0x1a8] sm:$0x3] %vm349_vm1, %v4817_v2  ;;  %4141 = vmatprep.subr.mxu1 %v4872_v4  ;;  %4341 = vmatprep.subr.mxu0 %v4877_v5  ;;  %s3792_s28 = sshll.u32 %s6420_s16, 8  ;;  %v4968_v39 = vld [vmem:[%s6251_s2 + $0x10] sm:$0xff] }
  0x11   : > { %357 = vst.msk [vmem:[#allocation2 + $0x18] sm:$0x1] %vm356_vm2, %v4817_v2  ;;  %358 = vst.msk [vmem:[#allocation2 + $0x30] sm:$0x1] %vm356_vm2, %v4817_v2  ;;  %v244_v8 = vsub.s32 0, %v243_v6  ;;  %v280_v9 = vsub.s32 1, %v243_v6  ;;  %s4928_s5 = scalar_lea.vmem %s6250_s1, %s3792_s28  ;;  %s6103_s22 = scalar_lea.vmem %s6252_s3, %s3792_s28 }
  0x12   : > { %359 = vst.msk [vmem:[#allocation2 + $0x48] sm:$0x1] %vm356_vm2, %v4817_v2  ;;  %360 = vst.msk [vmem:[#allocation2 + $0x60] sm:$0x1] %vm356_vm2, %v4817_v2  ;;  %v209_v10 = vld [vmem:[%s4928_s5] sm:$0xff]  ;;  %v210_v11 = vld [vmem:[%s4928_s5 + $0x8] sm:$0xff] }
  0x13   : > { %361 = vst.msk [vmem:[#allocation2 + $0x78] sm:$0x1] %vm356_vm2, %v4817_v2  ;;  %362 = vst.msk [vmem:[#allocation2 + $0x90] sm:$0x1] %vm356_vm2, %v4817_v2  ;;  %v4932_v12 = vrot.slane %v241_v7, %v244_v8  ;;  %v211_v13 = vld [vmem:[%s4928_s5 + $0x10] sm:$0xff]  ;;  %v4941_v17 = vrot.slane %v241_v7, %v280_v9  ;;  %v212_v21 = vld [vmem:[%s4928_s5 + $0x18] sm:$0xff] }
  0x14   : > { %363 = vst.msk [vmem:[#allocation2 + $0xa8] sm:$0x1] %vm356_vm2, %v4817_v2  ;;  %364 = vst.msk [vmem:[#allocation2 + $0xc0] sm:$0x1] %vm356_vm2, %v4817_v2  ;;  %v213_v22 = vld [vmem:[%s4928_s5 + $0x20] sm:$0xff]  ;;  %v214_v27 = vld [vmem:[%s4928_s5 + $0x28] sm:$0xff] }
  0x15   : > { %365 = vst.msk [vmem:[#allocation2 + $0xd8] sm:$0x1] %vm356_vm2, %v4817_v2  ;;  %366 = vst.msk [vmem:[#allocation2 + $0xf0] sm:$0x1] %vm356_vm2, %v4817_v2  ;;  %v4935_v14 = vld [vmem:[#allocation2] sm:$0xff]  ;;  %v4937_v15 = vld [vmem:[#allocation2 + $0x8] sm:$0xff]  ;;  %v246_v23 = vmul.f32 %v4932_v12, %v209_v10  ;;  %v247_v24 = vmul.f32 %v4932_v12, %v210_v11  ;;  %v248_v25 = vmul.f32 %v4932_v12, %v211_v13 }
  0x16   : > { %367 = vst.msk [vmem:[#allocation2 + $0x108] sm:$0x1] %vm356_vm2, %v4817_v2  ;;  %368 = vst.msk [vmem:[#allocation2 + $0x120] sm:$0x1] %vm356_vm2, %v4817_v2  ;;  %v525_v18 = vrot.slane %v4935_v14, 1  ;;  %v526_v19 = vrot.slane %v4937_v15, 1  ;;  %v249_v26 = vmul.f32 %v4932_v12, %v212_v21  ;;  %v250_v32 = vmul.f32 %v4932_v12, %v213_v22 }
  0x17   : > { %369 = vst.msk [vmem:[#allocation2 + $0x138] sm:$0x1] %vm356_vm2, %v4817_v2  ;;  %370 = vst.msk [vmem:[#allocation2 + $0x150] sm:$0x1] %vm356_vm2, %v4817_v2  ;;  %v4939_v16 = vld [vmem:[#allocation2 + $0x10] sm:$0x3]  ;;  %v251_v33 = vmul.f32 %v4932_v12, %v214_v27  ;;  %v282_v34 = vadd.f32 %v4941_v17, %v246_v23  ;;  %v283_v35 = vadd.f32 %v4941_v17, %v247_v24 }
  0x18   : > { %371 = vst.msk [vmem:[#allocation2 + $0x168] sm:$0x1] %vm356_vm2, %v4817_v2  ;;  %372 = vst.msk [vmem:[#allocation2 + $0x180] sm:$0x1] %vm356_vm2, %v4817_v2  ;;  %v528_v20 = vrot.slane %v4939_v16, 1  ;;  %v215_v28 = vld [vmem:[%s4928_s5 + $0x30] sm:$0xff]  ;;  %v527_v30 = vsel %vm524_vm3, %v525_v18, %v526_v19  ;;  %v284_v36 = vadd.f32 %v4941_v17, %v248_v25  ;;  %v285_v37 = vadd.f32 %v4941_v17, %v249_v26 }
  0x19   : > { %373 = vst.msk [vmem:[#allocation2 + $0x29] sm:$0x1] %vm356_vm2, %v4817_v2  ;;  %374 = vst.msk [vmem:[#allocation2 + $0x41] sm:$0x1] %vm356_vm2, %v4817_v2  ;;  %v216_v29 = vld [vmem:[%s4928_s5 + $0x38] sm:$0xff]  ;;  %4093 = vmatprep.mubr.msk.f32.mxu1 %vm346_vm0, %v527_v30  ;;  %v217_v38 = vld [vmem:[%s4928_s5 + $0x40] sm:$0xff]  ;;  %v286_v40 = vadd.f32 %v4941_v17, %v250_v32  ;;  %v287_v41 = vadd.f32 %v4941_v17, %v251_v33  ;;  %v252_v42 = vmul.f32 %v4932_v12, %v215_v28 }
  0x1a   : > { %375 = vst.msk [vmem:[#allocation2 + $0x59] sm:$0x1] %vm356_vm2, %v4817_v2  ;;  %376 = vst.msk [vmem:[#allocation2 + $0x71] sm:$0x1] %vm356_vm2, %v4817_v2  ;;  %v529_v31 = vsel %vm524_vm3, %v526_v19, %v528_v20  ;;  %v253_v43 = vmul.f32 %v4932_v12, %v216_v29  ;;  %v218_v44 = vld [vmem:[%s4928_s5 + $0x48] sm:$0xff]  ;;  %v219_v45 = vld [vmem:[%s4928_s5 + $0x50] sm:$0xff]  ;;  %v254_v57 = vmul.f32 %v4932_v12, %v217_v38 }
  0x1b   : > { %377 = vst.msk [vmem:[#allocation2 + $0x89] sm:$0x1] %vm356_vm2, %v4817_v2  ;;  %378 = vst.msk [vmem:[#allocation2 + $0xa1] sm:$0x1] %vm356_vm2, %v4817_v2  ;;  %4094 = vmatmul.mubr.msk.f32.vlgmr.msra.gmra.mrb[0].mxu1 %vm346_vm0, %v529_v31  ;;  %v220_v46 = vld [vmem:[%s4928_s5 + $0x58] sm:$0xff]  ;;  %v314_v47 = vmax.f32 %v282_v34, 0.0  ;;  %v288_v55 = vadd.f32 %v4941_v17, %v252_v42  ;;  %v255_v58 = vmul.f32 %v4932_v12, %v218_v44 }
  0x1c   : > { %379 = vst.msk [vmem:[#allocation2 + $0xb9] sm:$0x1] %vm356_vm2, %v4817_v2  ;;  %380 = vst.msk [vmem:[#allocation2 + $0xd1] sm:$0x1] %vm356_vm2, %v4817_v2  ;;  %v315_v48 = vmax.f32 %v283_v35, 0.0  ;;  %4142 = vmatpush3.msra.mxu1 %v4872_v4  ;;  %v316_v49 = vmax.f32 %v284_v36, 0.0  ;;  %v289_v56 = vadd.f32 %v4941_v17, %v253_v43  ;;  %v256_v59 = vmul.f32 %v4932_v12, %v219_v45 }
  0x1d   : > { %381 = vst.msk [vmem:[#allocation2 + $0xe9] sm:$0x1] %vm356_vm2, %v4817_v2  ;;  %382 = vst.msk [vmem:[#allocation2 + $0x101] sm:$0x1] %vm356_vm2, %v4817_v2  ;;  %v317_v50 = vmax.f32 %v285_v37, 0.0  ;;  %v221_v51 = vld [vmem:[%s4928_s5 + $0x60] sm:$0xff]  ;;  %4191 = vmatprep.subr.mxu1 %v4968_v39  ;;  %v257_v60 = vmul.f32 %v4932_v12, %v220_v46  ;;  %v290_v3 = vadd.f32 %v4941_v17, %v254_v57 }
  0x1e   : > { %383 = vst.msk [vmem:[#allocation2 + $0x119] sm:$0x1] %vm356_vm2, %v4817_v2  ;;  %384 = vst.msk [vmem:[#allocation2 + $0x131] sm:$0x1] %vm356_vm2, %v4817_v2  ;;  %v222_v52 = vld [vmem:[%s4928_s5 + $0x68] sm:$0xff]  ;;  %v318_v53 = vmax.f32 %v286_v40, 0.0  ;;  %v258_v1 = vmul.f32 %v4932_v12, %v221_v51  ;;  %v291_v4 = vadd.f32 %v4941_v17, %v255_v58  ;;  %v292_v6 = vadd.f32 %v4941_v17, %v256_v59 }
  0x1f   : > { %385 = vst.msk [vmem:[#allocation2 + $0x149] sm:$0x1] %vm356_vm2, %v4817_v2  ;;  %386 = vst.msk [vmem:[#allocation2 + $0x161] sm:$0x1] %vm356_vm2, %v4817_v2  ;;  %v319_v54 = vmax.f32 %v287_v41, 0.0  ;;  %v223_v61 = vld [vmem:[%s4928_s5 + $0x70] sm:$0xff]  ;;  %v293_v7 = vadd.f32 %v4941_v17, %v257_v60 }
  0x20   : > { %387 = vst.msk [vmem:[#allocation2 + $0x179] sm:$0x1] %vm356_vm2, %v4817_v2  ;;  %388 = vst.msk [vmem:[#allocation2 + $0x191] sm:$0x1] %vm356_vm2, %v4817_v2  ;;  %v224_v62 = vld [vmem:[%s4928_s5 + $0x78] sm:$0xff]  ;;  %v320_v63 = vmax.f32 %v288_v55, 0.0  ;;  %v259_v2 = vmul.f32 %v4932_v12, %v222_v52  ;;  %v294_v8 = vadd.f32 %v4941_v17, %v258_v1  ;;  %v260_v10 = vmul.f32 %v4932_v12, %v223_v61 }
  0x21   : > { %6322 = vst [vmem:[#allocation3_spill] sm:$0xff] %v4939_v16  ;;  %389 = vst.msk [vmem:[#allocation2 + $0x19] sm:$0xff] %vm346_vm0, %v314_v47  ;;  %v321_v0 = vmax.f32 %v289_v56, 0.0  ;;  %v261_v11 = vmul.f32 %v4932_v12, %v224_v62  ;;  %v225_v13 = vld [vmem:[%s4928_s5 + $0x80] sm:$0xff]  ;;  %v226_v18 = vld [vmem:[%s4928_s5 + $0x88] sm:$0xff]  ;;  %v322_v19 = vmax.f32 %v290_v3, 0.0 }
  0x22   : > { %390 = vst.msk [vmem:[#allocation2 + $0x21] sm:$0xff] %vm346_vm0, %v315_v48  ;;  %391 = vst.msk [vmem:[#allocation2 + $0x31] sm:$0xff] %vm346_vm0, %v316_v49  ;;  %v295_v9 = vadd.f32 %v4941_v17, %v259_v2  ;;  %v323_v20 = vmax.f32 %v291_v4, 0.0  ;;  %v324_v21 = vmax.f32 %v292_v6, 0.0  ;;  %v325_v22 = vmax.f32 %v293_v7, 0.0  ;;  %v227_v40 = vld [vmem:[%s4928_s5 + $0x90] sm:$0xff] }
  0x23   : > { %392 = vst.msk [vmem:[#allocation2 + $0x39] sm:$0xff] %vm346_vm0, %v317_v50  ;;  %393 = vst.msk [vmem:[#allocation2 + $0x49] sm:$0xff] %vm346_vm0, %v318_v53  ;;  %v326_v23 = vmax.f32 %v294_v8, 0.0  ;;  %v296_v25 = vadd.f32 %v4941_v17, %v260_v10  ;;  %v297_v26 = vadd.f32 %v4941_v17, %v261_v11  ;;  %v262_v27 = vmul.f32 %v4932_v12, %v225_v13  ;;  %v5065_v57 = vld [vmem:[%s6251_s2 + $0x30] sm:$0xff]  ;;  %v228_v59 = vld [vmem:[%s4928_s5 + $0x98] sm:$0xff]  ;;  %s3493_s23 = sshll.u32 %s6420_s16, 1 }
  0x24   : > { %394 = vst.msk [vmem:[#allocation2 + $0x51] sm:$0xff] %vm346_vm0, %v319_v54  ;;  %395 = vst.msk [vmem:[#allocation2 + $0x61] sm:$0xff] %vm346_vm0, %v320_v63  ;;  %v327_v24 = vmax.f32 %v295_v9, 0.0  ;;  %v263_v28 = vmul.f32 %v4932_v12, %v226_v18  ;;  %v264_v60 = vmul.f32 %v4932_v12, %v227_v40  ;;  %v229_v3 = vld [vmem:[%s4928_s5 + $0xa0] sm:$0xff]  ;;  %v265_v7 = vmul.f32 %v4932_v12, %v228_v59  ;;  %v230_v8 = vld [vmem:[%s4928_s5 + $0xa8] sm:$0xff]  ;;  %s208_s26 = scalar_lea.vmem %s6253_s4, %s3493_s23 }
  0x25   : > { %396 = vst.msk [vmem:[#allocation2 + $0x69] sm:$0xff] %vm346_vm0, %v321_v0  ;;  %397 = vst.msk [vmem:[#allocation2 + $0x79] sm:$0xff] %vm346_vm0, %v322_v19  ;;  %v328_v32 = vmax.f32 %v296_v25, 0.0  ;;  %v329_v33 = vmax.f32 %v297_v26, 0.0  ;;  %v298_v46 = vadd.f32 %v4941_v17, %v262_v27  ;;  %v266_v13 = vmul.f32 %v4932_v12, %v229_v3 }
  0x26   : > { %398 = vst.msk [vmem:[#allocation2 + $0x81] sm:$0xff] %vm346_vm0, %v323_v20  ;;  %399 = vst.msk [vmem:[#allocation2 + $0x91] sm:$0xff] %vm346_vm0, %v324_v21  ;;  %v299_v47 = vadd.f32 %v4941_v17, %v263_v28  ;;  %v300_v9 = vadd.f32 %v4941_v17, %v264_v60  ;;  %v301_v25 = vadd.f32 %v4941_v17, %v265_v7  ;;  %vm1185_vm4 = vcmask 1045504  }
  0x27   : > { %400 = vst.msk [vmem:[#allocation2 + $0x99] sm:$0xff] %vm346_vm0, %v325_v22  ;;  %401 = vst.msk [vmem:[#allocation2 + $0xa9] sm:$0xff] %vm346_vm0, %v326_v23  ;;  %v330_v58 = vmax.f32 %v298_v46, 0.0  ;;  %v267_v23 = vmul.f32 %v4932_v12, %v230_v8  ;;  %vm3395_vm5 = vcmask 1040384  }
  0x28   : > { %v5018_v29 = vld [vmem:[#allocation2 + $0x18] sm:$0xff]  ;;  %402 = vst.msk [vmem:[#allocation2 + $0xb1] sm:$0xff] %vm346_vm0, %v327_v24  ;;  %403 = vst.msk [vmem:[#allocation2 + $0xc1] sm:$0xff] %vm346_vm0, %v328_v32  ;;  %v331_v63 = vmax.f32 %v299_v47, 0.0  ;;  %v332_v26 = vmax.f32 %v300_v9, 0.0  ;;  %v231_v47 = vld [vmem:[%s4928_s5 + $0xb0] sm:$0xff] }
  0x29   : > { %6323 = vst [vmem:[#allocation4_spill] sm:$0xff] %v5018_v29  ;;  %v5020_v30 = vld [vmem:[#allocation2 + $0x20] sm:$0xff]  ;;  %v5022_v31 = vld [vmem:[#allocation2 + $0x28] sm:$0x3]  ;;  %v530_v34 = vrot.slane %v5018_v29, 1  ;;  %v5029_v37 = vld [vmem:[#allocation2 + $0x30] sm:$0xff]  ;;  %v303_v46 = vadd.f32 %v4941_v17, %v267_v23 }
  0x2a   : > { %6324 = vst [vmem:[#allocation5_spill] sm:$0xff] %v5020_v30  ;;  %v531_v35 = vrot.slane %v5020_v30, 1  ;;  %v533_v36 = vrot.slane %v5022_v31, 1  ;;  %v5031_v38 = vld [vmem:[#allocation2 + $0x38] sm:$0xff]  ;;  %v535_v41 = vrot.slane %v5029_v37, 1  ;;  %v5038_v44 = vld [vmem:[#allocation2 + $0x48] sm:$0xff] }
  0x2b   : > { %v536_v42 = vrot.slane %v5031_v38, 1  ;;  %v5036_v43 = vld [vmem:[#allocation2 + $0x40] sm:$0x3]  ;;  %v5040_v45 = vld [vmem:[#allocation2 + $0x50] sm:$0xff]  ;;  %404 = vst.msk [vmem:[#allocation2 + $0xc9] sm:$0xff] %vm346_vm0, %v329_v33  ;;  %v540_v51 = vrot.slane %v5038_v44, 1 }
  0x2c   : > { %v532_v48 = vsel %vm524_vm3, %v530_v34, %v531_v35  ;;  %v534_v49 = vsel %vm524_vm3, %v531_v35, %v533_v36  ;;  %v538_v50 = vrot.slane %v5036_v43, 1  ;;  %v5050_v52 = vld [vmem:[#allocation2 + $0x58] sm:$0x3]  ;;  %v541_v54 = vrot.slane %v5040_v45, 1  ;;  %v5058_v55 = vld [vmem:[#allocation2 + $0x60] sm:$0xff]  ;;  %v5060_v56 = vld [vmem:[#allocation2 + $0x68] sm:$0xff] }
  0x2d   : > { %4096 = vmatprep.mubr.msk.f32.mxu1 %vm346_vm0, %v532_v48  ;;  %4293 = vmatprep.mubr.msk.f32.mxu0 %vm346_vm0, %v532_v48  ;;  %v5055_v53 = vsel %vm524_vm3, %v535_v41, %v536_v42  ;;  %v543_v62 = vrot.slane %v5050_v52, 1  ;;  %v545_v1 = vrot.slane %v5058_v55, 1  ;;  %v5085_v2 = vld [vmem:[#allocation2 + $0x70] sm:$0x3]  ;;  %405 = vst.msk [vmem:[#allocation2 + $0xd9] sm:$0xff] %vm346_vm0, %v330_v58  ;;  %v5090_v4 = vld [vmem:[#allocation2 + $0x78] sm:$0xff] }
  0x2e   : > { %6325 = vst [vmem:[#allocation6_spill] sm:$0xff] %v5055_v53  ;;  %4097 = vmatmul.mubr.msk.f32.gmra.mrb[2].mxu1 %vm346_vm0, %v534_v49  ;;  %4294 = vmatmul.mubr.msk.f32.vlgmr.msra.gmra.mrb[0].mxu0 %vm346_vm0, %v534_v49  ;;  %v5075_v61 = vsel %vm524_vm3, %v536_v42, %v538_v50  ;;  %v5081_v0 = vsel %vm524_vm3, %v540_v51, %v541_v54  ;;  %v5092_v6 = vld [vmem:[#allocation2 + $0x80] sm:$0xff]  ;;  %406 = vst.msk [vmem:[#allocation2 + $0xe1] sm:$0xff] %vm346_vm0, %v331_v63  ;;  %v548_v11 = vrot.slane %v5085_v2, 1  ;;  %v5116_v21 = vld [vmem:[#allocation2 + $0x88] sm:$0x3] }
  0x2f   : > { %4342 = vmatpush3.msra.mxu0 %v4877_v5  ;;  %4099 = vmatprep.mubr.msk.f32.mxu1 %vm346_vm0, %v5055_v53  ;;  %6326 = vst [vmem:[#allocation7_spill] sm:$0xff] %v5075_v61  ;;  %6327 = vst [vmem:[#allocation8_spill] sm:$0xff] %v5081_v0  ;;  %v546_v5 = vrot.slane %v5060_v56, 1  ;;  %v5107_v10 = vsel %vm524_vm3, %v541_v54, %v543_v62  ;;  %v550_v19 = vrot.slane %v5090_v4, 1  ;;  %v551_v20 = vrot.slane %v5092_v6, 1  ;;  %v5118_v22 = vld [vmem:[#allocation2 + $0x90] sm:$0xff] }
  0x30   : > { %4296 = vmatprep.mubr.msk.f32.mxu0 %vm346_vm0, %v5055_v53  ;;  %4391 = vmatprep.subr.mxu0 %v5065_v57  ;;  %6328 = vst [vmem:[#allocation9_spill] sm:$0xff] %v5107_v10  ;;  %v5121_v24 = vld [vmem:[#allocation2 + $0x98] sm:$0xff]  ;;  %v553_v28 = vrot.slane %v5116_v21, 1  ;;  %v555_v32 = vrot.slane %v5118_v22, 1  ;;  %v5137_v33 = vld [vmem:[#allocation2 + $0xa0] sm:$0x3]  ;;  %v302_v42 = vadd.f32 %v4941_v17, %v266_v13  ;;  %v268_v63 = vmul.f32 %v4932_v12, %v231_v47 }
  0x31   : > { %v5112_v18 = vsel %vm524_vm3, %v545_v1, %v546_v5  ;;  %v5133_v27 = vsel %vm524_vm3, %v546_v5, %v548_v11  ;;  %v333_v34 = vmax.f32 %v301_v25, 0.0  ;;  %407 = vst.msk [vmem:[#allocation2 + $0xf1] sm:$0xff] %vm346_vm0, %v332_v26  ;;  %v5141_v35 = vsel %vm524_vm3, %v550_v19, %v551_v20  ;;  %v5144_v40 = vld [vmem:[#allocation2 + $0xa8] sm:$0xff]  ;;  %v5146_v41 = vld [vmem:[#allocation2 + $0xb0] sm:$0xff]  ;;  %v232_v48 = vld [vmem:[%s4928_s5 + $0xb8] sm:$0xff] }
  0x32   : > { %4100 = vmatmul.mubr.msk.f32.gmra.mrb[4].mxu1 %vm346_vm0, %v5075_v61  ;;  %4297 = vmatmul.mubr.msk.f32.gmra.mrb[2].mxu0 %vm346_vm0, %v5075_v61  ;;  %6329 = vst [vmem:[#allocation10_spill] sm:$0xff] %v5112_v18  ;;  %6330 = vst [vmem:[#allocation11_spill] sm:$0xff] %v5133_v27  ;;  %v556_v36 = vrot.slane %v5121_v24, 1  ;;  %v558_v49 = vrot.slane %v5137_v33, 1  ;;  %v334_v50 = vmax.f32 %v302_v42, 0.0  ;;  %v335_v51 = vmax.f32 %v303_v46, 0.0 }
  0x33   : > { %4102 = vmatprep.mubr.msk.f32.mxu1 %vm346_vm0, %v5081_v0  ;;  %4299 = vmatprep.mubr.msk.f32.mxu0 %vm346_vm0, %v5081_v0  ;;  %6331 = vst [vmem:[#allocation12_spill] sm:$0xff] %v5141_v35  ;;  %408 = vst.msk [vmem:[#allocation2 + $0xf9] sm:$0xff] %vm346_vm0, %v333_v34  ;;  %v233_v54 = vld [vmem:[%s4928_s5 + $0xc0] sm:$0xff]  ;;  %v234_v58 = vld [vmem:[%s4928_s5 + $0xc8] sm:$0xff]  ;;  %v5165_v59 = vsel %vm524_vm3, %v551_v20, %v553_v28  ;;  %v560_v60 = vrot.slane %v5144_v40, 1  ;;  %v561_v62 = vrot.slane %v5146_v41, 1 }
  0x34   : > { %6332 = vst [vmem:[#allocation13_spill] sm:$0xff] %v5165_v59  ;;  %v5171_v1 = vsel %vm524_vm3, %v555_v32, %v556_v36  ;;  %v5173_v5 = vld [vmem:[#allocation2 + $0xb8] sm:$0x3]  ;;  %409 = vst.msk [vmem:[#allocation2 + $0x109] sm:$0xff] %vm346_vm0, %v334_v50  ;;  %v269_v3 = vmul.f32 %v4932_v12, %v232_v48  ;;  %v5178_v7 = vld [vmem:[#allocation2 + $0xc0] sm:$0xff]  ;;  %v304_v9 = vadd.f32 %v4941_v17, %v268_v63  ;;  %v1214_v53 = vrot.slane %v5116_v21, 2 }
  0x35   : > { %6333 = vst [vmem:[#allocation14_spill] sm:$0xff] %v5171_v1  ;;  %410 = vst.msk [vmem:[#allocation2 + $0x111] sm:$0xff] %vm346_vm0, %v335_v51  ;;  %v5180_v8 = vld [vmem:[#allocation2 + $0xc8] sm:$0xff]  ;;  %v270_v11 = vmul.f32 %v4932_v12, %v233_v54  ;;  %v271_v13 = vmul.f32 %v4932_v12, %v234_v58  ;;  %v5190_v19 = vsel %vm524_vm3, %v556_v36, %v558_v49  ;;  %v235_v23 = vld [vmem:[%s4928_s5 + $0xd0] sm:$0xff]  ;;  %v563_v26 = vrot.slane %v5173_v5, 1 }
  0x36   : > { %4103 = vmatmul.mubr.msk.f32.gmra.mrb[6].mxu1 %vm346_vm0, %v5107_v10  ;;  %4300 = vmatmul.mubr.msk.f32.gmra.mrb[4].mxu0 %vm346_vm0, %v5107_v10  ;;  %6334 = vst [vmem:[#allocation15_spill] sm:$0xff] %v5190_v19  ;;  %v305_v20 = vadd.f32 %v4941_v17, %v269_v3  ;;  %v5199_v25 = vsel %vm524_vm3, %v560_v60, %v561_v62  ;;  %v336_v28 = vmax.f32 %v304_v9, 0.0  ;;  %v236_v34 = vld [vmem:[%s4928_s5 + $0xd8] sm:$0xff]  ;;  %v565_v36 = vrot.slane %v5178_v7, 1  ;;  %v5206_v46 = vld [vmem:[#allocation2 + $0xd0] sm:$0x3] }
  0x37   : > { %4105 = vmatprep.mubr.msk.f32.mxu1 %vm346_vm0, %v5112_v18  ;;  %4302 = vmatprep.mubr.msk.f32.mxu0 %vm346_vm0, %v5112_v18  ;;  %6335 = vst [vmem:[#allocation16_spill] sm:$0xff] %v5199_v25  ;;  %v306_v32 = vadd.f32 %v4941_v17, %v270_v11  ;;  %v566_v42 = vrot.slane %v5180_v8, 1  ;;  %v307_v48 = vadd.f32 %v4941_v17, %v271_v13  ;;  %v5209_v49 = vld [vmem:[#allocation2 + $0xd8] sm:$0xff]  ;;  %v5211_v50 = vld [vmem:[#allocation2 + $0xe0] sm:$0xff]  ;;  %v1191_v58 = vrot.slane %v5018_v29, 2 }
  0x38   : > { %v337_v47 = vmax.f32 %v305_v20, 0.0  ;;  %411 = vst.msk [vmem:[#allocation2 + $0x121] sm:$0xff] %vm346_vm0, %v336_v28  ;;  %v272_v54 = vmul.f32 %v4932_v12, %v235_v23  ;;  %v273_v63 = vmul.f32 %v4932_v12, %v236_v34  ;;  %v237_v3 = vld [vmem:[%s4928_s5 + $0xe0] sm:$0xff]  ;;  %v5228_v9 = vsel %vm524_vm3, %v561_v62, %v563_v26  ;;  %v238_v23 = vld [vmem:[%s4928_s5 + $0xe8] sm:$0xff]  ;;  %v5244_v26 = vld [vmem:[#allocation2 + $0xf0] sm:$0xff] }
  0x39   : > { %v338_v51 = vmax.f32 %v306_v32, 0.0  ;;  %v339_v60 = vmax.f32 %v307_v48, 0.0  ;;  %6336 = vst [vmem:[#allocation17_spill] sm:$0xff] %v5228_v9  ;;  %v568_v11 = vrot.slane %v5206_v46, 1  ;;  %v1192_v13 = vrot.slane %v5020_v30, 2 }
  0x3a   : > { %4106 = vmatmul.mubr.msk.f32.gmra.mrb[8].mxu1 %vm346_vm0, %v5133_v27  ;;  %4303 = vmatmul.mubr.msk.f32.gmra.mrb[6].mxu0 %vm346_vm0, %v5133_v27  ;;  %412 = vst.msk [vmem:[#allocation2 + $0x129] sm:$0xff] %vm346_vm0, %v337_v47  ;;  %v308_v20 = vadd.f32 %v4941_v17, %v272_v54  ;;  %v5236_v28 = vsel %vm524_vm3, %v565_v36, %v566_v42  ;;  %v570_v32 = vrot.slane %v5209_v49, 1  ;;  %v571_v34 = vrot.slane %v5211_v50, 1  ;;  %v5240_v47 = vld [vmem:[#allocation2 + $0xe8] sm:$0x3]  ;;  %v5246_v48 = vld [vmem:[#allocation2 + $0xf8] sm:$0xff] }
  0x3b   : > { %4108 = vmatprep.mubr.msk.f32.mxu1 %vm346_vm0, %v5141_v35  ;;  %4305 = vmatprep.mubr.msk.f32.mxu0 %vm346_vm0, %v5141_v35  ;;  %413 = vst.msk [vmem:[#allocation2 + $0x139] sm:$0xff] %vm346_vm0, %v338_v51  ;;  %6337 = vst [vmem:[#allocation18_spill] sm:$0xff] %v5236_v28  ;;  %v309_v62 = vadd.f32 %v4941_v17, %v273_v63  ;;  %v274_v54 = vmul.f32 %v4932_v12, %v237_v3  ;;  %v1194_v36 = vrot.slane %v5022_v31, 2 }
  0x3c   : > { %414 = vst.msk [vmem:[#allocation2 + $0x141] sm:$0xff] %vm346_vm0, %v339_v60  ;;  %v340_v51 = vmax.f32 %v308_v20, 0.0  ;;  %v275_v60 = vmul.f32 %v4932_v12, %v238_v23  ;;  %v5260_v63 = vsel %vm524_vm3, %v566_v42, %v568_v11  ;;  %v5263_v31 = vsel %vm1185_vm4, %v1191_v58, %v1192_v13 }
  0x3d   : > { %6338 = vst [vmem:[#allocation19_spill] sm:$0xff] %v5260_v63  ;;  %6339 = vst [vmem:[#allocation20_spill] sm:$0xff] %v5263_v31  ;;  %v573_v3 = vrot.slane %v5240_v47, 1  ;;  %v310_v20 = vadd.f32 %v4941_v17, %v274_v54  ;;  %v5269_v23 = vsel %vm524_vm3, %v570_v32, %v571_v34  ;;  %v1196_v58 = vrot.slane %v5029_v37, 2  ;;  %v5281_v54 = vld [vmem:[#allocation2 + $0x110] sm:$0xff] }
  0x3e   : > { %4109 = vmatmul.mubr.msk.f32.gmra.mrb[10].mxu1 %vm346_vm0, %v5165_v59  ;;  %4306 = vmatmul.mubr.msk.f32.gmra.mrb[8].mxu0 %vm346_vm0, %v5165_v59  ;;  %415 = vst.msk [vmem:[#allocation2 + $0x151] sm:$0xff] %vm346_vm0, %v340_v51  ;;  %6340 = vst [vmem:[#allocation21_spill] sm:$0xff] %v5269_v23  ;;  %v311_v42 = vadd.f32 %v4941_v17, %v275_v60  ;;  %v1197_v11 = vrot.slane %v5031_v38, 2  ;;  %v5279_v51 = vld [vmem:[#allocation2 + $0x108] sm:$0xff]  ;;  %v1201_v59 = vrot.slane %v5038_v44, 2  ;;  %v1206_v27 = vrot.slane %v5058_v55, 2 }
  0x3f   : > { %4111 = vmatprep.mubr.msk.f32.mxu1 %vm346_vm0, %v5171_v1  ;;  %4308 = vmatprep.mubr.msk.f32.mxu0 %vm346_vm0, %v5171_v1  ;;  %v342_v32 = vmax.f32 %v310_v20, 0.0  ;;  %v5296_v20 = vsel %vm524_vm3, %v571_v34, %v573_v3  ;;  %v5313_v3 = vld [vmem:[#allocation2 + $0x120] sm:$0xff]  ;;  %v1211_v10 = vrot.slane %v5090_v4, 2 }
  0x40   : > { %v343_v60 = vmax.f32 %v311_v42, 0.0  ;;  %6342 = vst [vmem:[#allocation23_spill] sm:$0xff] %v5296_v20  ;;  %v5307_v42 = vld [vmem:[#allocation2 + $0x118] sm:$0x3]  ;;  %v5311_v34 = vsel %vm1185_vm4, %v1196_v58, %v1197_v11  ;;  %v1204_v58 = vrot.slane %v5050_v52, 2 }
  0x41   : > { %417 = vst.msk [vmem:[#allocation2 + $0x169] sm:$0xff] %vm346_vm0, %v342_v32  ;;  %6344 = vst [vmem:[#allocation25_spill] sm:$0xff] %v5311_v34 }
  0x42   : > { %4112 = vmatmul.mubr.msk.f32.gmra.mrb[12].mxu1 %vm346_vm0, %v5190_v19  ;;  %4309 = vmatmul.mubr.msk.f32.gmra.mrb[10].mxu0 %vm346_vm0, %v5190_v19  ;;  %v5288_v19 = vsel %vm1185_vm4, %v1192_v13, %v1194_v36  ;;  %v580_v13 = vrot.slane %v5279_v51, 1  ;;  %v581_v36 = vrot.slane %v5281_v54, 1  ;;  %418 = vst.msk [vmem:[#allocation2 + $0x171] sm:$0xff] %vm346_vm0, %v343_v60 }
  0x43   : > { %4114 = vmatprep.mubr.msk.f32.mxu1 %vm346_vm0, %v5199_v25  ;;  %4311 = vmatprep.mubr.msk.f32.mxu0 %vm346_vm0, %v5199_v25  ;;  %v341_v25 = vmax.f32 %v309_v62, 0.0  ;;  %v575_v62 = vrot.slane %v5244_v26, 1  ;;  %6341 = vst [vmem:[#allocation22_spill] sm:$0xff] %v5288_v19  ;;  %v5382_v61 = vld [vmem:[#allocation2 + $0x148] sm:$0x3] }
  0x44   : > { %v5344_v52 = vsel %vm524_vm3, %v580_v13, %v581_v36 }
  0x45   : > { %416 = vst.msk [vmem:[#allocation2 + $0x159] sm:$0xff] %vm346_vm0, %v341_v25  ;;  %v1199_v25 = vrot.slane %v5036_v43, 2  ;;  %6349 = vst [vmem:[#allocation30_spill] sm:$0xff] %v5344_v52 }
  0x46   : > { %4115 = vmatmul.mubr.msk.f32.gmra.mrb[14].mxu1 %vm346_vm0, %v5228_v9  ;;  %4312 = vmatmul.mubr.msk.f32.gmra.mrb[12].mxu0 %vm346_vm0, %v5228_v9  ;;  %v576_v9 = vrot.slane %v5246_v48, 1 }
  0x47   : > { %4117 = vmatprep.mubr.msk.f32.mxu1 %vm346_vm0, %v5236_v28  ;;  %4314 = vmatprep.mubr.msk.f32.mxu0 %vm346_vm0, %v5236_v28  ;;  %v5273_v28 = vld [vmem:[#allocation2 + $0x100] sm:$0x3]  ;;  %v5327_v32 = vsel %vm1185_vm4, %v1197_v11, %v1199_v25 }
  0x48   : > { %v578_v1 = vrot.slane %v5273_v28, 1  ;;  %v5303_v43 = vsel %vm524_vm3, %v575_v62, %v576_v9  ;;  %v5320_v62 = vld [vmem:[%s6251_s2 + $0x38] sm:$0xff]  ;;  %6346 = vst [vmem:[#allocation27_spill] sm:$0xff] %v5327_v32  ;;  %v5354_v25 = vld [vmem:[#allocation2 + $0x140] sm:$0xff]  ;;  %v5426_v16 = vld [vmem:[#allocation2 + $0x168] sm:$0xff] }
  0x49   : > { %6343 = vst [vmem:[#allocation24_spill] sm:$0xff] %v5303_v43  ;;  %6345 = vst [vmem:[#allocation26_spill] sm:$0xff] %v5320_v62  ;;  %v591_v0 = vrot.slane %v5354_v25, 1 }
  0x4a   : > { %4118 = vmatmul.mubr.msk.f32.gmra.mrb[16].mxu1 %vm346_vm0, %v5260_v63  ;;  %4315 = vmatmul.mubr.msk.f32.gmra.mrb[14].mxu0 %vm346_vm0, %v5260_v63  ;;  %v1202_v63 = vrot.slane %v5040_v45, 2  ;;  %v5334_v60 = vsel %vm524_vm3, %v576_v9, %v578_v1  ;;  %v1207_v1 = vrot.slane %v5060_v56, 2  ;;  %v5349_v9 = vld [vmem:[#allocation2 + $0x130] sm:$0x3] }
  0x4b   : > { %4120 = vmatprep.mubr.msk.f32.mxu1 %vm346_vm0, %v5269_v23  ;;  %4343 = vmatprep.mubr.msk.f32.mxu0 %vm346_vm0, %v5263_v31  ;;  %v5315_v23 = vld [vmem:[#allocation2 + $0x128] sm:$0xff]  ;;  %6347 = vst [vmem:[#allocation28_spill] sm:$0xff] %v5334_v60 }
  0x4c   : > { %v5337_v35 = vsel %vm1185_vm4, %v1201_v59, %v1202_v63  ;;  %v586_v11 = vrot.slane %v5315_v23, 1  ;;  %v5352_v59 = vld [vmem:[#allocation2 + $0x138] sm:$0xff]  ;;  %v5361_v13 = vsel %vm1185_vm4, %v1202_v63, %v1204_v58  ;;  %v1212_v63 = vrot.slane %v5092_v6, 2 }
  0x4d   : > { %6348 = vst [vmem:[#allocation29_spill] sm:$0xff] %v5337_v35  ;;  %6350 = vst [vmem:[#allocation31_spill] sm:$0xff] %v5361_v13 }
  0x4e   : > { %4121 = vmatmul.mubr.msk.f32.gmra.mrb[18].mxu1 %vm346_vm0, %v5296_v20  ;;  %4344 = vmatmul.mubr.msk.f32.vlgmr.msra.gmra.mrb[0].mxu0 %vm346_vm0, %v5288_v19  ;;  %v583_v20 = vrot.slane %v5307_v42, 1  ;;  %v593_v19 = vrot.slane %v5382_v61, 1 }
  0x4f   : > { %4392 = vmatpush3.msra.mxu0 %v5065_v57  ;;  %4123 = vmatprep.mubr.msk.f32.mxu1 %vm346_vm0, %v5303_v43  ;;  %v585_v57 = vrot.slane %v5313_v3, 1  ;;  %v1209_v43 = vrot.slane %v5085_v2, 2  ;;  %v5378_v2 = vsel %vm1185_vm4, %v1206_v27, %v1207_v1 }
  0x50   : > { %4346 = vmatprep.mubr.msk.f32.mxu0 %vm346_vm0, %v5311_v34  ;;  %4441 = vmatprep.subr.mxu0 %v5320_v62  ;;  %v5369_v18 = vsel %vm524_vm3, %v581_v36, %v583_v20  ;;  %6353 = vst [vmem:[#allocation34_spill] sm:$0xff] %v5378_v2  ;;  %v5384_v20 = vld [vmem:[#allocation2 + $0x150] sm:$0xff]  ;;  %v5386_v36 = vld [vmem:[#allocation2 + $0x158] sm:$0xff] }
  0x51   : > { %6351 = vst [vmem:[#allocation32_spill] sm:$0xff] %v5369_v18  ;;  %v5375_v58 = vsel %vm524_vm3, %v585_v57, %v586_v11  ;;  %v1217_v57 = vrot.slane %v5121_v24, 2  ;;  %v240_v34 = vld [vmem:[%s4928_s5 + $0xf8] sm:$0xff]  ;;  %v5398_v27 = vsel %vm1185_vm4, %v1207_v1, %v1209_v43  ;;  %v595_v31 = vrot.slane %v5384_v20, 1  ;;  %v5416_v1 = vld [vmem:[#allocation2 + $0x160] sm:$0x3] }
  0x52   : > { %4124 = vmatmul.mubr.msk.f32.gmra.mrb[20].mxu1 %vm346_vm0, %v5334_v60  ;;  %4347 = vmatmul.mubr.msk.f32.gmra.mrb[2].mxu0 %vm346_vm0, %v5327_v32  ;;  %v588_v60 = vrot.slane %v5349_v9, 1  ;;  %6352 = vst [vmem:[#allocation33_spill] sm:$0xff] %v5375_v58  ;;  %v239_v32 = vld [vmem:[%s4928_s5 + $0xf0] sm:$0xff]  ;;  %v5414_v43 = vsel %vm1185_vm4, %v1211_v10, %v1212_v63  ;;  %v1219_v10 = vrot.slane %v5137_v33, 2  ;;  %v598_v33 = vrot.slane %v5416_v1, 1 }
  0x53   : > { %4126 = vmatprep.mubr.msk.f32.mxu1 %vm346_vm0, %v5344_v52  ;;  %4349 = vmatprep.mubr.msk.f32.mxu0 %vm346_vm0, %v5337_v35  ;;  %v590_v52 = vrot.slane %v5352_v59, 1  ;;  %v1216_v35 = vrot.slane %v5118_v22, 2  ;;  %v5428_v62 = vld [vmem:[#allocation2 + $0x170] sm:$0xff] }
  0x54   : > { %v5405_v21 = vsel %vm524_vm3, %v586_v11, %v588_v60  ;;  %v5421_v60 = vsel %vm1185_vm4, %v1212_v63, %v1214_v53  ;;  %v600_v63 = vrot.slane %v5426_v16, 1 }
  0x55   : > { %6354 = vst [vmem:[#allocation35_spill] sm:$0xff] %v5405_v21  ;;  %v5424_v11 = vsel %vm1185_vm4, %v1216_v35, %v1217_v57  ;;  %v5443_v35 = vsel %vm524_vm3, %v591_v0, %v593_v19  ;;  %v5468_v19 = vsel %vm1185_vm4, %v1217_v57, %v1219_v10  ;;  %v1229_v57 = vrot.slane %v5206_v46, 2 }
  0x56   : > { %4127 = vmatmul.mubr.msk.f32.gmra.mrb[22].mxu1 %vm346_vm0, %v5369_v18  ;;  %4350 = vmatmul.mubr.msk.f32.gmra.mrb[4].mxu0 %vm346_vm0, %v5361_v13  ;;  %v596_v18 = vrot.slane %v5386_v36, 1  ;;  %v5411_v13 = vsel %vm524_vm3, %v590_v52, %v591_v0  ;;  %6356 = vst [vmem:[#allocation37_spill] sm:$0xff] %v5443_v35  ;;  %v1222_v52 = vrot.slane %v5146_v41, 2 }
  0x57   : > { %4129 = vmatprep.mubr.msk.f32.mxu1 %vm346_vm0, %v5375_v58  ;;  %4352 = vmatprep.mubr.msk.f32.mxu0 %vm346_vm0, %v5378_v2  ;;  %6355 = vst [vmem:[#allocation36_spill] sm:$0xff] %v5411_v13  ;;  %v276_v58 = vmul.f32 %v4932_v12, %v239_v32  ;;  %v277_v2 = vmul.f32 %v4932_v12, %v240_v34  ;;  %v1221_v12 = vrot.slane %v5144_v40, 2 }
  0x58   : > { %v5446_v32 = vsel %vm524_vm3, %v595_v31, %v596_v18  ;;  %v5465_v0 = vsel %vm524_vm3, %v596_v18, %v598_v33  ;;  %v1232_v33 = vrot.slane %v5211_v50, 2 }
  0x59   : > { %v312_v53 = vadd.f32 %v4941_v17, %v276_v58  ;;  %v313_v34 = vadd.f32 %v4941_v17, %v277_v2  ;;  %6357 = vst [vmem:[#allocation38_spill] sm:$0xff] %v5446_v32  ;;  %v601_v17 = vrot.slane %v5428_v62, 1  ;;  %v5452_v58 = vld [vmem:[#allocation2 + $0x178] sm:$0x3]  ;;  %6358 = vst [vmem:[#allocation39_spill] sm:$0xff] %v5465_v0 }
  0x5a   : > { %4130 = vmatmul.mubr.msk.f32.gmra.mrb[24].mxu1 %vm346_vm0, %v5405_v21  ;;  %4353 = vmatmul.mubr.msk.f32.gmra.mrb[6].mxu0 %vm346_vm0, %v5398_v27  ;;  %v603_v31 = vrot.slane %v5452_v58, 1 }
  0x5b   : > { %4132 = vmatprep.mubr.msk.f32.mxu1 %vm346_vm0, %v5411_v13  ;;  %4355 = vmatprep.mubr.msk.f32.mxu0 %vm346_vm0, %v5414_v43  ;;  %v344_v2 = vmax.f32 %v312_v53, 0.0  ;;  %v345_v13 = vmax.f32 %v313_v34, 0.0  ;;  %v1224_v53 = vrot.slane %v5173_v5, 2  ;;  %v5473_v34 = vsel %vm524_vm3, %v600_v63, %v601_v17 }
  0x5c   : > { %6359 = vst [vmem:[#allocation40_spill] sm:$0xff] %v5473_v34  ;;  %v5489_v18 = vsel %vm524_vm3, %v601_v17, %v603_v31  ;;  %v1236_v17 = vrot.slane %v5244_v26, 2  ;;  %v1237_v31 = vrot.slane %v5246_v48, 2 }
  0x5d   : > { %419 = vst.msk [vmem:[#allocation2 + $0x181] sm:$0xff] %vm346_vm0, %v344_v2  ;;  %420 = vst.msk [vmem:[#allocation2 + $0x189] sm:$0xff] %vm346_vm0, %v345_v13  ;;  %v5476_v13 = vsel %vm1185_vm4, %v1221_v12, %v1222_v52  ;;  %v1226_v2 = vrot.slane %v5178_v7, 2  ;;  %v5492_v5 = vsel %vm1185_vm4, %v1222_v52, %v1224_v53  ;;  %v1231_v12 = vrot.slane %v5209_v49, 2 }
  0x5e   : > { %4133 = vmatmul.mubr.msk.f32.gmra.mrb[26].mxu1 %vm346_vm0, %v5443_v35  ;;  %4356 = vmatmul.mubr.msk.f32.gmra.mrb[8].mxu0 %vm346_vm0, %v5421_v60  ;;  %6360 = vst [vmem:[#allocation41_spill] sm:$0xff] %v5489_v18  ;;  %v1234_v52 = vrot.slane %v5240_v47, 2  ;;  %v1239_v53 = vrot.slane %v5273_v28, 2  ;;  %v1244_v28 = vrot.slane %v5307_v42, 2 }
  0x5f   : > { %4135 = vmatprep.mubr.msk.f32.mxu1 %vm346_vm0, %v5446_v32  ;;  %4358 = vmatprep.mubr.msk.f32.mxu0 %vm346_vm0, %v5424_v11  ;;  %v1227_v32 = vrot.slane %v5180_v8, 2  ;;  %v5513_v63 = vsel %vm1185_vm4, %v1231_v12, %v1232_v33  ;;  %v1242_v12 = vrot.slane %v5281_v54, 2 }
  0x60   : > { %6363 = vst [vmem:[#allocation44_spill] sm:$0xff] %v5513_v63  ;;  %v5531_v47 = vsel %vm1185_vm4, %v1232_v33, %v1234_v52  ;;  %v1246_v52 = vrot.slane %v5313_v3, 2 }
  0x61   : > { %v5496_v10 = vsel %vm1185_vm4, %v1226_v2, %v1227_v32  ;;  %v5509_v46 = vsel %vm1185_vm4, %v1227_v32, %v1229_v57  ;;  %v5524_v32 = vld [vmem:[%s6251_s2 + $0x18] sm:$0xff]  ;;  %v5536_v2 = vsel %vm1185_vm4, %v1236_v17, %v1237_v31  ;;  %v1241_v57 = vrot.slane %v5279_v51, 2 }
  0x62   : > { %4136 = vmatmul.mubr.msk.f32.gmra.mrb[28].mxu1 %vm346_vm0, %v5465_v0  ;;  %4359 = vmatmul.mubr.msk.f32.gmra.mrb[10].mxu0 %vm346_vm0, %v5468_v19  ;;  %6361 = vst [vmem:[#allocation42_spill] sm:$0xff] %v5496_v10  ;;  %6362 = vst [vmem:[#allocation43_spill] sm:$0xff] %v5509_v46  ;;  %v1247_v17 = vrot.slane %v5315_v23, 2  ;;  %v5567_v42 = vsel %vm1185_vm4, %v1242_v12, %v1244_v28  ;;  %v1262_v0 = vrot.slane %v5428_v62, 2 }
  0x63   : > { %4138 = vmatprep.mubr.msk.f32.mxu1 %vm346_vm0, %v5473_v34  ;;  %4361 = vmatprep.mubr.msk.f32.mxu0 %vm346_vm0, %v5476_v13  ;;  %v5554_v33 = vsel %vm1185_vm4, %v1241_v57, %v1242_v12  ;;  %v1251_v57 = vrot.slane %v5352_v59, 2  ;;  %v1254_v12 = vrot.slane %v5382_v61, 2  ;;  %v1257_v34 = vrot.slane %v5386_v36, 2 }
  0x64   : > { %v5609_v35 = vld [vmem:[#allocation2 + $0x180] sm:$0xff]  ;;  %v5611_v21 = vld [vmem:[#allocation2 + $0x188] sm:$0xff] }
  0x66   : > { %4139 = vmatmul.mubr.msk.f32.gmra.mrb[30].mxu1 %vm346_vm0, %v5489_v18  ;;  %4362 = vmatmul.mubr.msk.f32.gmra.mrb[12].mxu0 %vm346_vm0, %v5492_v5  ;;  %v1252_v18 = vrot.slane %v5354_v25, 2 }
  0x67   : > { %4143 = vmatprep.mubr.msk.f32.mxu1 %vm346_vm0, %v4935_v14  ;;  %4364 = vmatprep.mubr.msk.f32.mxu0 %vm346_vm0, %v5496_v10 }
  0x68   : > { %v5588_v28 = vsel %vm1185_vm4, %v1251_v57, %v1252_v18  ;;  %v5601_v61 = vsel %vm1185_vm4, %v1252_v18, %v1254_v12  ;;  %v1261_v57 = vrot.slane %v5426_v16, 2  ;;  %v1264_v18 = vrot.slane %v5452_v58, 2 }
  0x6a   : > { %4144 = vmatmul.mubr.msk.f32.vlgmr.msra.gmra.mrb[0].mxu1 %vm346_vm0, %v4937_v15  ;;  %4365 = vmatmul.mubr.msk.f32.gmra.mrb[14].mxu0 %vm346_vm0, %v5509_v46  ;;  %v5626_v12 = vsel %vm1185_vm4, %v1261_v57, %v1262_v0  ;;  %v5641_v58 = vsel %vm1185_vm4, %v1262_v0, %v1264_v18  ;;  %v5669_v57 = vld [vmem:[%s6251_s2 + $0x40] sm:$0xff]  ;;  %v1186_v18 = vrot.slane %v4935_v14, 2 }
  0x6b   : > { %4146 = vmatprep.mubr.msk.f32.mxu1 %vm346_vm0, %v5018_v29  ;;  %4367 = vmatprep.mubr.msk.f32.mxu0 %vm346_vm0, %v5513_v63  ;;  %6366 = vst [vmem:[#allocation47_spill] sm:$0xff] %v5626_v12  ;;  %v5630_v29 = vld [vmem:[#allocation2 + $0x190] sm:$0x3]  ;;  %6367 = vst [vmem:[#allocation48_spill] sm:$0xff] %v5641_v58 }
  0x6c   : > { %4192 = vmatpush3.msra.mxu1 %v4968_v39  ;;  %v5550_v39 = vsel %vm1185_vm4, %v1237_v31, %v1239_v53  ;;  %v1249_v31 = vrot.slane %v5349_v9, 2  ;;  %v5571_v53 = vsel %vm1185_vm4, %v1246_v52, %v1247_v17  ;;  %v1256_v52 = vrot.slane %v5384_v20, 2 }
  0x6d   : > { %4241 = vmatprep.subr.mxu1 %v5524_v32 }
  0x6e   : > { %4147 = vmatmul.mubr.msk.f32.gmra.mrb[2].mxu1 %vm346_vm0, %v5020_v30  ;;  %4368 = vmatmul.mubr.msk.f32.gmra.mrb[16].mxu0 %vm346_vm0, %v5531_v47  ;;  %v5584_v9 = vsel %vm1185_vm4, %v1247_v17, %v1249_v31  ;;  %v1259_v17 = vrot.slane %v5416_v1, 2  ;;  %v5605_v31 = vsel %vm1185_vm4, %v1256_v52, %v1257_v34  ;;  %v2123_v52 = vrot.slane %v5609_v35, 2 }
  0x6f   : > { %4149 = vmatprep.mubr.msk.f32.mxu1 %vm346_vm0, %v5029_v37  ;;  %4370 = vmatprep.mubr.msk.f32.mxu0 %vm346_vm0, %v5536_v2  ;;  %6364 = vst [vmem:[#allocation45_spill] sm:$0xff] %v5605_v31  ;;  %v2124_v30 = vrot.slane %v5611_v21, 2 }
  0x70   : > { %v5622_v1 = vsel %vm1185_vm4, %v1257_v34, %v1259_v17  ;;  %v2126_v34 = vrot.slane %v5630_v29, 2 }
  0x71   : > { %6365 = vst [vmem:[#allocation46_spill] sm:$0xff] %v5622_v1  ;;  %v5645_v17 = vsel %vm1185_vm4, %v2123_v52, %v2124_v30  ;;  %v1187_v52 = vrot.slane %v4937_v15, 2  ;;  %v6372_v15 = vld [vmem:[#allocation20_spill] sm:$0xff] }
  0x72   : > { %4150 = vmatmul.mubr.msk.f32.gmra.mrb[4].mxu1 %vm346_vm0, %v5031_v38  ;;  %4371 = vmatmul.mubr.msk.f32.gmra.mrb[18].mxu0 %vm346_vm0, %v5550_v39  ;;  %6368 = vst [vmem:[#allocation49_spill] sm:$0xff] %v5645_v17  ;;  %v5656_v0 = vsel %vm1185_vm4, %v2124_v30, %v2126_v34  ;;  %v6370_v30 = vld [vmem:[#allocation26_spill] sm:$0xff]  ;;  %v6371_v34 = vld [vmem:[#allocation3_spill] sm:$0xff] }
  0x73   : > { %4152 = vmatprep.mubr.msk.f32.mxu1 %vm346_vm0, %v5038_v44  ;;  %4373 = vmatprep.mubr.msk.f32.mxu0 %vm346_vm0, %v5554_v33  ;;  %6369 = vst [vmem:[#allocation50_spill] sm:$0xff] %v5656_v0 }
  0x76   : > { %4153 = vmatmul.mubr.msk.f32.gmra.mrb[6].mxu1 %vm346_vm0, %v5040_v45  ;;  %4374 = vmatmul.mubr.msk.f32.gmra.mrb[20].mxu0 %vm346_vm0, %v5567_v42 }
  0x77   : > { %4155 = vmatprep.mubr.msk.f32.mxu1 %vm346_vm0, %v5058_v55  ;;  %4376 = vmatprep.mubr.msk.f32.mxu0 %vm346_vm0, %v5571_v53 }
  0x7a   : > { %4156 = vmatmul.mubr.msk.f32.gmra.mrb[8].mxu1 %vm346_vm0, %v5060_v56  ;;  %4377 = vmatmul.mubr.msk.f32.gmra.mrb[22].mxu0 %vm346_vm0, %v5584_v9 }
  0x7b   : > { %4158 = vmatprep.mubr.msk.f32.mxu1 %vm346_vm0, %v5090_v4  ;;  %4379 = vmatprep.mubr.msk.f32.mxu0 %vm346_vm0, %v5588_v28 }
  0x7e   : > { %4159 = vmatmul.mubr.msk.f32.gmra.mrb[10].mxu1 %vm346_vm0, %v5092_v6  ;;  %4380 = vmatmul.mubr.msk.f32.gmra.mrb[24].mxu0 %vm346_vm0, %v5601_v61 }
  0x7f   : > { %4161 = vmatprep.mubr.msk.f32.mxu1 %vm346_vm0, %v5118_v22  ;;  %4382 = vmatprep.mubr.msk.f32.mxu0 %vm346_vm0, %v5605_v31 }
  0x82   : > { %4162 = vmatmul.mubr.msk.f32.gmra.mrb[12].mxu1 %vm346_vm0, %v5121_v24  ;;  %4383 = vmatmul.mubr.msk.f32.gmra.mrb[26].mxu0 %vm346_vm0, %v5622_v1 }
  0x83   : > { %4164 = vmatprep.mubr.msk.f32.mxu1 %vm346_vm0, %v5144_v40  ;;  %4385 = vmatprep.mubr.msk.f32.mxu0 %vm346_vm0, %v5626_v12 }
  0x86   : > { %4165 = vmatmul.mubr.msk.f32.gmra.mrb[14].mxu1 %vm346_vm0, %v5146_v41  ;;  %4386 = vmatmul.mubr.msk.f32.gmra.mrb[28].mxu0 %vm346_vm0, %v5641_v58 }
  0x87   : > { %4167 = vmatprep.mubr.msk.f32.mxu1 %vm346_vm0, %v5178_v7  ;;  %4388 = vmatprep.mubr.msk.f32.mxu0 %vm346_vm0, %v5645_v17  ;;  %v6379_v17 = vld [vmem:[#allocation6_spill] sm:$0xff] }
  0x8a   : > { %4168 = vmatmul.mubr.msk.f32.gmra.mrb[16].mxu1 %vm346_vm0, %v5180_v8  ;;  %4389 = vmatmul.mubr.msk.f32.gmra.mrb[30].mxu0 %vm346_vm0, %v5656_v0  ;;  %v1188_v0 = vsel %vm1185_vm4, %v1186_v18, %v1187_v52  ;;  %v6373_v18 = vld [vmem:[#allocation22_spill] sm:$0xff] }
  0x8b   : > { %4170 = vmatprep.mubr.msk.f32.mxu1 %vm346_vm0, %v5209_v49  ;;  %4393 = vmatprep.mubr.msk.f32.mxu0 %vm346_vm0, %v5029_v37 }
  0x8e   : > { %4171 = vmatmul.mubr.msk.f32.gmra.mrb[18].mxu1 %vm346_vm0, %v5211_v50  ;;  %4394 = vmatmul.mubr.msk.f32.vlgmr.msra.gmra.mrb[0].mxu0 %vm346_vm0, %v5031_v38 }
  0x8f   : > { %4442 = vmatpush3.msra.mxu0 %v6370_v30  ;;  %4173 = vmatprep.mubr.msk.f32.mxu1 %vm346_vm0, %v5244_v26  ;;  %v1189_v30 = vrot.slane %v6371_v34, 2  ;;  %v6376_v34 = vld [vmem:[#allocation29_spill] sm:$0xff] }
  0x90   : > { %4396 = vmatprep.mubr.msk.f32.mxu0 %vm346_vm0, %v5038_v44  ;;  %4491 = vmatprep.subr.mxu0 %v5669_v57 }
  0x91   : > { %v1190_v14 = vsel %vm1185_vm4, %v1187_v52, %v1189_v30  ;;  %v6374_v52 = vld [vmem:[#allocation25_spill] sm:$0xff]  ;;  %v6377_v30 = vld [vmem:[#allocation31_spill] sm:$0xff] }
  0x92   : > { %4174 = vmatmul.mubr.msk.f32.gmra.mrb[20].mxu1 %vm346_vm0, %v5246_v48  ;;  %4397 = vmatmul.mubr.msk.f32.gmra.mrb[2].mxu0 %vm346_vm0, %v5040_v45 }
  0x93   : > { %4176 = vmatprep.mubr.msk.f32.mxu1 %vm346_vm0, %v5279_v51  ;;  %4399 = vmatprep.mubr.msk.f32.mxu0 %vm346_vm0, %v5058_v55 }
  0x96   : > { %4177 = vmatmul.mubr.msk.f32.gmra.mrb[22].mxu1 %vm346_vm0, %v5281_v54  ;;  %4400 = vmatmul.mubr.msk.f32.gmra.mrb[4].mxu0 %vm346_vm0, %v5060_v56 }
  0x97   : > { %4179 = vmatprep.mubr.msk.f32.mxu1 %vm346_vm0, %v5313_v3  ;;  %4402 = vmatprep.mubr.msk.f32.mxu0 %vm346_vm0, %v5090_v4 }
  0x9a   : > { %4180 = vmatmul.mubr.msk.f32.gmra.mrb[24].mxu1 %vm346_vm0, %v5315_v23  ;;  %4403 = vmatmul.mubr.msk.f32.gmra.mrb[6].mxu0 %vm346_vm0, %v5092_v6 }
  0x9b   : > { %4182 = vmatprep.mubr.msk.f32.mxu1 %vm346_vm0, %v5352_v59  ;;  %4405 = vmatprep.mubr.msk.f32.mxu0 %vm346_vm0, %v5118_v22 }
  0x9e   : > { %4183 = vmatmul.mubr.msk.f32.gmra.mrb[26].mxu1 %vm346_vm0, %v5354_v25  ;;  %4406 = vmatmul.mubr.msk.f32.gmra.mrb[8].mxu0 %vm346_vm0, %v5121_v24 }
  0x9f   : > { %4185 = vmatprep.mubr.msk.f32.mxu1 %vm346_vm0, %v5384_v20  ;;  %4408 = vmatprep.mubr.msk.f32.mxu0 %vm346_vm0, %v5144_v40 }
  0xa2   : > { %4186 = vmatmul.mubr.msk.f32.gmra.mrb[28].mxu1 %vm346_vm0, %v5386_v36  ;;  %4409 = vmatmul.mubr.msk.f32.gmra.mrb[10].mxu0 %vm346_vm0, %v5146_v41 }
  0xa3   : > { %4188 = vmatprep.mubr.msk.f32.mxu1 %vm346_vm0, %v5426_v16  ;;  %4411 = vmatprep.mubr.msk.f32.mxu0 %vm346_vm0, %v5178_v7 }
  0xa6   : > { %4189 = vmatmul.mubr.msk.f32.gmra.mrb[30].mxu1 %vm346_vm0, %v5428_v62  ;;  %4412 = vmatmul.mubr.msk.f32.gmra.mrb[12].mxu0 %vm346_vm0, %v5180_v8 }
  0xa7   : > { %4193 = vmatprep.mubr.msk.f32.mxu1 %vm346_vm0, %v1188_v0  ;;  %4414 = vmatprep.mubr.msk.f32.mxu0 %vm346_vm0, %v5209_v49  ;;  %v5744_v0 = vld [vmem:[%s6251_s2 + $0x20] sm:$0xff] }
  0xaa   : > { %4194 = vmatmul.mubr.msk.f32.vlgmr.msra.gmra.mrb[0].mxu1 %vm346_vm0, %v1190_v14  ;;  %4415 = vmatmul.mubr.msk.f32.gmra.mrb[14].mxu0 %vm346_vm0, %v5211_v50  ;;  %v6378_v14 = vld [vmem:[#allocation34_spill] sm:$0xff] }
  0xab   : > { %4196 = vmatprep.mubr.msk.f32.mxu1 %vm346_vm0, %v6372_v15  ;;  %4417 = vmatprep.mubr.msk.f32.mxu0 %vm346_vm0, %v5244_v26  ;;  %v5795_v15 = vld [vmem:[#allocation2 + $0x198] sm:$0xff] }
  0xac   : > { %4242 = vmatpush3.msra.mxu1 %v5524_v32  ;;  %v6375_v32 = vld [vmem:[#allocation27_spill] sm:$0xff] }
  0xad   : > { %4541 = vmatprep.subr.mxu1 %v5744_v0 }
  0xae   : > { %4197 = vmatmul.mubr.msk.f32.gmra.mrb[2].mxu1 %vm346_vm0, %v6373_v18  ;;  %4418 = vmatmul.mubr.msk.f32.gmra.mrb[16].mxu0 %vm346_vm0, %v5246_v48  ;;  %v5805_v18 = vld [vmem:[#allocation2 + $0x1a0] sm:$0xff] }
  0xaf   : > { %4199 = vmatprep.mubr.msk.f32.mxu1 %vm346_vm0, %v6374_v52  ;;  %4420 = vmatprep.mubr.msk.f32.mxu0 %vm346_vm0, %v5279_v51 }
  0xb2   : > { %4200 = vmatmul.mubr.msk.f32.gmra.mrb[4].mxu1 %vm346_vm0, %v6375_v32  ;;  %4421 = vmatmul.mubr.msk.f32.gmra.mrb[18].mxu0 %vm346_vm0, %v5281_v54 }
  0xb3   : > { %4202 = vmatprep.mubr.msk.f32.mxu1 %vm346_vm0, %v6376_v34  ;;  %4423 = vmatprep.mubr.msk.f32.mxu0 %vm346_vm0, %v5313_v3 }
  0xb6   : > { %4203 = vmatmul.mubr.msk.f32.gmra.mrb[6].mxu1 %vm346_vm0, %v6377_v30  ;;  %4424 = vmatmul.mubr.msk.f32.gmra.mrb[20].mxu0 %vm346_vm0, %v5315_v23 }
  0xb7   : > { %4205 = vmatprep.mubr.msk.f32.mxu1 %vm346_vm0, %v6378_v14  ;;  %4426 = vmatprep.mubr.msk.f32.mxu0 %vm346_vm0, %v5352_v59 }
  0xba   : > { %4206 = vmatmul.mubr.msk.f32.gmra.mrb[8].mxu1 %vm346_vm0, %v5398_v27  ;;  %4427 = vmatmul.mubr.msk.f32.gmra.mrb[22].mxu0 %vm346_vm0, %v5354_v25 }
  0xbb   : > { %4208 = vmatprep.mubr.msk.f32.mxu1 %vm346_vm0, %v5414_v43  ;;  %4429 = vmatprep.mubr.msk.f32.mxu0 %vm346_vm0, %v5384_v20 }
  0xbe   : > { %4209 = vmatmul.mubr.msk.f32.gmra.mrb[10].mxu1 %vm346_vm0, %v5421_v60  ;;  %4430 = vmatmul.mubr.msk.f32.gmra.mrb[24].mxu0 %vm346_vm0, %v5386_v36 }
  0xbf   : > { %4211 = vmatprep.mubr.msk.f32.mxu1 %vm346_vm0, %v5424_v11  ;;  %4432 = vmatprep.mubr.msk.f32.mxu0 %vm346_vm0, %v5426_v16 }
  0xc2   : > { %4212 = vmatmul.mubr.msk.f32.gmra.mrb[12].mxu1 %vm346_vm0, %v5468_v19  ;;  %4433 = vmatmul.mubr.msk.f32.gmra.mrb[26].mxu0 %vm346_vm0, %v5428_v62 }
  0xc3   : > { %4214 = vmatprep.mubr.msk.f32.mxu1 %vm346_vm0, %v5476_v13  ;;  %4435 = vmatprep.mubr.msk.f32.mxu0 %vm346_vm0, %v5609_v35 }
  0xc6   : > { %4215 = vmatmul.mubr.msk.f32.gmra.mrb[14].mxu1 %vm346_vm0, %v5492_v5  ;;  %4436 = vmatmul.mubr.msk.f32.gmra.mrb[28].mxu0 %vm346_vm0, %v5611_v21 }
  0xc7   : > { %4217 = vmatprep.mubr.msk.f32.mxu1 %vm346_vm0, %v5496_v10  ;;  %4438 = vmatprep.mubr.msk.f32.mxu0 %vm346_vm0, %v5795_v15  ;;  %v6380_v10 = vld [vmem:[#allocation7_spill] sm:$0xff] }
  0xca   : > { %4218 = vmatmul.mubr.msk.f32.gmra.mrb[16].mxu1 %vm346_vm0, %v5509_v46  ;;  %4439 = vmatmul.mubr.msk.f32.gmra.mrb[30].mxu0 %vm346_vm0, %v5805_v18  ;;  %v6381_v46 = vld [vmem:[#allocation8_spill] sm:$0xff] }
  0xcb   : > { %4220 = vmatprep.mubr.msk.f32.mxu1 %vm346_vm0, %v5513_v63  ;;  %4443 = vmatprep.mubr.msk.f32.mxu0 %vm346_vm0, %v6379_v17  ;;  %v6382_v63 = vld [vmem:[#allocation9_spill] sm:$0xff]  ;;  %v6383_v17 = vld [vmem:[#allocation10_spill] sm:$0xff] }
  0xce   : > { %4221 = vmatmul.mubr.msk.f32.gmra.mrb[18].mxu1 %vm346_vm0, %v5531_v47  ;;  %4444 = vmatmul.mubr.msk.f32.vlgmr.msra.gmra.mrb[0].mxu0 %vm346_vm0, %v6380_v10  ;;  %v6384_v10 = vld [vmem:[#allocation11_spill] sm:$0xff] }
  0xcf   : > { %4492 = vmatpush3.msra.mxu0 %v5669_v57  ;;  %4223 = vmatprep.mubr.msk.f32.mxu1 %vm346_vm0, %v5536_v2  ;;  %v6387_v57 = vld [vmem:[#allocation14_spill] sm:$0xff] }
  0xd0   : > { %4446 = vmatprep.mubr.msk.f32.mxu0 %vm346_vm0, %v6381_v46  ;;  %v6385_v46 = vld [vmem:[#allocation12_spill] sm:$0xff] }
  0xd2   : > { %4224 = vmatmul.mubr.msk.f32.gmra.mrb[20].mxu1 %vm346_vm0, %v5550_v39  ;;  %4447 = vmatmul.mubr.msk.f32.gmra.mrb[2].mxu0 %vm346_vm0, %v6382_v63  ;;  %v6386_v63 = vld [vmem:[#allocation13_spill] sm:$0xff] }
  0xd3   : > { %4226 = vmatprep.mubr.msk.f32.mxu1 %vm346_vm0, %v5554_v33  ;;  %4449 = vmatprep.mubr.msk.f32.mxu0 %vm346_vm0, %v6383_v17  ;;  %v6388_v17 = vld [vmem:[#allocation15_spill] sm:$0xff] }
  0xd6   : > { %4227 = vmatmul.mubr.msk.f32.gmra.mrb[22].mxu1 %vm346_vm0, %v5567_v42  ;;  %4450 = vmatmul.mubr.msk.f32.gmra.mrb[4].mxu0 %vm346_vm0, %v6384_v10  ;;  %v6389_v10 = vld [vmem:[#allocation16_spill] sm:$0xff] }
  0xd7   : > { %4229 = vmatprep.mubr.msk.f32.mxu1 %vm346_vm0, %v5571_v53  ;;  %4452 = vmatprep.mubr.msk.f32.mxu0 %vm346_vm0, %v6385_v46  ;;  %v6390_v46 = vld [vmem:[#allocation17_spill] sm:$0xff] }
  0xda   : > { %4230 = vmatmul.mubr.msk.f32.gmra.mrb[24].mxu1 %vm346_vm0, %v5584_v9  ;;  %4453 = vmatmul.mubr.msk.f32.gmra.mrb[6].mxu0 %vm346_vm0, %v6386_v63  ;;  %v6391_v63 = vld [vmem:[#allocation18_spill] sm:$0xff] }
  0xdb   : > { %4232 = vmatprep.mubr.msk.f32.mxu1 %vm346_vm0, %v5588_v28  ;;  %4455 = vmatprep.mubr.msk.f32.mxu0 %vm346_vm0, %v6387_v57  ;;  %v6392_v57 = vld [vmem:[#allocation19_spill] sm:$0xff] }
  0xde   : > { %4233 = vmatmul.mubr.msk.f32.gmra.mrb[26].mxu1 %vm346_vm0, %v5601_v61  ;;  %4456 = vmatmul.mubr.msk.f32.gmra.mrb[8].mxu0 %vm346_vm0, %v6388_v17  ;;  %v6393_v17 = vld [vmem:[#allocation4_spill] sm:$0xff] }
  0xdf   : > { %4235 = vmatprep.mubr.msk.f32.mxu1 %vm346_vm0, %v5605_v31  ;;  %4458 = vmatprep.mubr.msk.f32.mxu0 %vm346_vm0, %v6389_v10  ;;  %v6394_v10 = vld [vmem:[#allocation21_spill] sm:$0xff] }
  0xe2   : > { %4236 = vmatmul.mubr.msk.f32.gmra.mrb[28].mxu1 %vm346_vm0, %v5622_v1  ;;  %4459 = vmatmul.mubr.msk.f32.gmra.mrb[10].mxu0 %vm346_vm0, %v6390_v46  ;;  %v6395_v1 = vld [vmem:[#allocation5_spill] sm:$0xff]  ;;  %v6396_v46 = vld [vmem:[#allocation23_spill] sm:$0xff] }
  0xe3   : > { %4238 = vmatprep.mubr.msk.f32.mxu1 %vm346_vm0, %v5626_v12  ;;  %4461 = vmatprep.mubr.msk.f32.mxu0 %vm346_vm0, %v6391_v63  ;;  %v6397_v63 = vld [vmem:[#allocation24_spill] sm:$0xff]  ;;  %v2658_v12 = vrot.slane %v5805_v18, 1 }
  0xe6   : > { %4239 = vmatmul.mubr.msk.f32.gmra.mrb[30].mxu1 %vm346_vm0, %v5641_v58  ;;  %4462 = vmatmul.mubr.msk.f32.gmra.mrb[12].mxu0 %vm346_vm0, %v6392_v57  ;;  %v6398_v57 = vld [vmem:[#allocation28_spill] sm:$0xff]  ;;  %v2657_v58 = vrot.slane %v5795_v15, 1 }
  0xe7   : > { %4243 = vmatprep.mubr.msk.f32.mxu1 %vm346_vm0, %v6393_v17  ;;  %4464 = vmatprep.mubr.msk.f32.mxu0 %vm346_vm0, %v6394_v10  ;;  %v1856_v17 = vrot.slane %v5611_v21, 1 }
  0xea   : > { %4244 = vmatmul.mubr.msk.f32.vlgmr.msra.gmra.mrb[0].mxu1 %vm346_vm0, %v6395_v1  ;;  %4465 = vmatmul.mubr.msk.f32.gmra.mrb[14].mxu0 %vm346_vm0, %v6396_v46  ;;  %v6399_v1 = vld [vmem:[#allocation30_spill] sm:$0xff] }
  0xeb   : > { %4246 = vmatprep.mubr.msk.f32.mxu1 %vm346_vm0, %v5029_v37  ;;  %4467 = vmatprep.mubr.msk.f32.mxu0 %vm346_vm0, %v6397_v63  ;;  %v6400_v37 = vld [vmem:[#allocation32_spill] sm:$0xff] }
  0xec   : > { %4542 = vmatpush3.msra.mxu1 %v5744_v0  ;;  %v6401_v0 = vld [vmem:[#allocation33_spill] sm:$0xff] }
  0xee   : > { %4247 = vmatmul.mubr.msk.f32.gmra.mrb[2].mxu1 %vm346_vm0, %v5031_v38  ;;  %4468 = vmatmul.mubr.msk.f32.gmra.mrb[16].mxu0 %vm346_vm0, %v6398_v57  ;;  %v6402_v38 = vld [vmem:[#allocation35_spill] sm:$0xff] }
  0xef   : > { %4249 = vmatprep.mubr.msk.f32.mxu1 %vm346_vm0, %v5038_v44  ;;  %4470 = vmatprep.mubr.msk.f32.mxu0 %vm346_vm0, %v6399_v1  ;;  %v6403_v44 = vld [vmem:[#allocation36_spill] sm:$0xff] }
  0xf2   : > { %4250 = vmatmul.mubr.msk.f32.gmra.mrb[4].mxu1 %vm346_vm0, %v5040_v45  ;;  %4471 = vmatmul.mubr.msk.f32.gmra.mrb[18].mxu0 %vm346_vm0, %v6400_v37  ;;  %v6404_v45 = vld [vmem:[#allocation37_spill] sm:$0xff] }
  0xf3   : > { %4252 = vmatprep.mubr.msk.f32.mxu1 %vm346_vm0, %v5058_v55  ;;  %4473 = vmatprep.mubr.msk.f32.mxu0 %vm346_vm0, %v6401_v0  ;;  %v6405_v55 = vld [vmem:[#allocation38_spill] sm:$0xff] }
  0xf6   : > { %4253 = vmatmul.mubr.msk.f32.gmra.mrb[6].mxu1 %vm346_vm0, %v5060_v56  ;;  %4474 = vmatmul.mubr.msk.f32.gmra.mrb[20].mxu0 %vm346_vm0, %v6402_v38  ;;  %v1855_v56 = vrot.slane %v5609_v35, 1 }
  0xf7   : > { %4255 = vmatprep.mubr.msk.f32.mxu1 %vm346_vm0, %v5090_v4  ;;  %4476 = vmatprep.mubr.msk.f32.mxu0 %vm346_vm0, %v6403_v44  ;;  %v6406_v4 = vld [vmem:[#allocation39_spill] sm:$0xff] }
  0xf8   : > { %v5927_v31 = vsel %vm524_vm3, %v1855_v56, %v1856_v17  ;;  %v2659_v56 = vsel %vm524_vm3, %v2657_v58, %v2658_v12 }
  0xfa   : > { %4256 = vmatmul.mubr.msk.f32.gmra.mrb[8].mxu1 %vm346_vm0, %v5092_v6  ;;  %4477 = vmatmul.mubr.msk.f32.gmra.mrb[22].mxu0 %vm346_vm0, %v6404_v45  ;;  %v6407_v6 = vld [vmem:[#allocation40_spill] sm:$0xff] }
  0xfb   : > { %4258 = vmatprep.mubr.msk.f32.mxu1 %vm346_vm0, %v5118_v22  ;;  %4479 = vmatprep.mubr.msk.f32.mxu0 %vm346_vm0, %v6405_v55  ;;  %v1858_v22 = vrot.slane %v5630_v29, 1  ;;  %v5929_v55 = vld [vmem:[#allocation2 + $0x1a8] sm:$0x3] }
  0xfd   : > { %v5940_v29 = vsel %vm524_vm3, %v1856_v17, %v1858_v22 }
  0xfe   : > { %4259 = vmatmul.mubr.msk.f32.gmra.mrb[10].mxu1 %vm346_vm0, %v5121_v24  ;;  %4480 = vmatmul.mubr.msk.f32.gmra.mrb[24].mxu0 %vm346_vm0, %v6406_v4  ;;  %v6408_v24 = vld [vmem:[#allocation41_spill] sm:$0xff] }
  0xff   : > { %4261 = vmatprep.mubr.msk.f32.mxu1 %vm346_vm0, %v5144_v40  ;;  %4482 = vmatprep.mubr.msk.f32.mxu0 %vm346_vm0, %v6407_v6  ;;  %v2660_v40 = vrot.slane %v5929_v55, 1 }
 0x102   : > { %4262 = vmatmul.mubr.msk.f32.gmra.mrb[12].mxu1 %vm346_vm0, %v5146_v41  ;;  %4483 = vmatmul.mubr.msk.f32.gmra.mrb[26].mxu0 %vm346_vm0, %v6408_v24  ;;  %v2661_v41 = vsel %vm524_vm3, %v2658_v12, %v2660_v40 }
 0x103   : > { %4264 = vmatprep.mubr.msk.f32.mxu1 %vm346_vm0, %v5178_v7  ;;  %4485 = vmatprep.mubr.msk.f32.mxu0 %vm346_vm0, %v5927_v31  ;;  %v6409_v7 = vld [vmem:[#allocation42_spill] sm:$0xff] }
 0x106   : > { %4265 = vmatmul.mubr.msk.f32.gmra.mrb[14].mxu1 %vm346_vm0, %v5180_v8  ;;  %4486 = vmatmul.mubr.msk.f32.gmra.mrb[28].mxu0 %vm346_vm0, %v5940_v29  ;;  %v6410_v8 = vld [vmem:[#allocation43_spill] sm:$0xff] }
 0x107   : > { %4267 = vmatprep.mubr.msk.f32.mxu1 %vm346_vm0, %v5209_v49  ;;  %4488 = vmatprep.mubr.msk.f32.mxu0 %vm346_vm0, %v2659_v56  ;;  %v6412_v49 = vld [vmem:[#allocation38_spill] sm:$0xff] }
 0x10a   : > { %4268 = vmatmul.mubr.msk.f32.gmra.mrb[16].mxu1 %vm346_vm0, %v5211_v50  ;;  %4489 = vmatmul.mubr.msk.f32.gmra.mrb[30].mxu0 %vm346_vm0, %v2661_v41  ;;  %v6413_v50 = vld [vmem:[#allocation45_spill] sm:$0xff] }
 0x10b   : > { %4270 = vmatprep.mubr.msk.f32.mxu1 %vm346_vm0, %v5244_v26  ;;  %4493 = vmatprep.mubr.msk.f32.mxu0 %vm346_vm0, %v6374_v52  ;;  %v6414_v26 = vld [vmem:[#allocation46_spill] sm:$0xff] }
 0x10e   : > { %4271 = vmatmul.mubr.msk.f32.gmra.mrb[18].mxu1 %vm346_vm0, %v5246_v48  ;;  %4494 = vmatmul.mubr.msk.f32.vlgmr.msra.gmra.mrb[0].mxu0 %vm346_vm0, %v6375_v32  ;;  %v6415_v48 = vld [vmem:[#allocation47_spill] sm:$0xff] }
 0x10f   : > { %4273 = vmatprep.mubr.msk.f32.mxu1 %vm346_vm0, %v5279_v51  ;;  %4496 = vmatprep.mubr.msk.f32.mxu0 %vm346_vm0, %v6376_v34  ;;  %v2926_v51 = vrot.slane %v5805_v18, 2 }
 0x112   : > { %4274 = vmatmul.mubr.msk.f32.gmra.mrb[20].mxu1 %vm346_vm0, %v5281_v54  ;;  %4497 = vmatmul.mubr.msk.f32.gmra.mrb[2].mxu0 %vm346_vm0, %v6377_v30  ;;  %v6416_v54 = vld [vmem:[#allocation48_spill] sm:$0xff] }
 0x113   : > { %4276 = vmatprep.mubr.msk.f32.mxu1 %vm346_vm0, %v5313_v3  ;;  %4499 = vmatprep.mubr.msk.f32.mxu0 %vm346_vm0, %v6378_v14  ;;  %v6417_v3 = vld [vmem:[#allocation49_spill] sm:$0xff] }
 0x116   : > { %4277 = vmatmul.mubr.msk.f32.gmra.mrb[22].mxu1 %vm346_vm0, %v5315_v23  ;;  %4500 = vmatmul.mubr.msk.f32.gmra.mrb[4].mxu0 %vm346_vm0, %v5398_v27  ;;  %v2925_v23 = vrot.slane %v5795_v15, 2 }
 0x117   : > { %4279 = vmatprep.mubr.msk.f32.mxu1 %vm346_vm0, %v5352_v59  ;;  %4502 = vmatprep.mubr.msk.f32.mxu0 %vm346_vm0, %v5414_v43 }
 0x118   : > { %v2927_v59 = vsel %vm1185_vm4, %v2925_v23, %v2926_v51 }
 0x11a   : > { %4280 = vmatmul.mubr.msk.f32.gmra.mrb[24].mxu1 %vm346_vm0, %v5354_v25  ;;  %4503 = vmatmul.mubr.msk.f32.gmra.mrb[6].mxu0 %vm346_vm0, %v5421_v60  ;;  %v6418_v25 = vld [vmem:[#allocation50_spill] sm:$0xff] }
 0x11b   : > { %4282 = vmatprep.mubr.msk.f32.mxu1 %vm346_vm0, %v5384_v20  ;;  %4505 = vmatprep.mubr.msk.f32.mxu0 %vm346_vm0, %v5424_v11 }
 0x11e   : > { %4283 = vmatmul.mubr.msk.f32.gmra.mrb[26].mxu1 %vm346_vm0, %v5386_v36  ;;  %4506 = vmatmul.mubr.msk.f32.gmra.mrb[8].mxu0 %vm346_vm0, %v5468_v19 }
 0x11f   : > { %4285 = vmatprep.mubr.msk.f32.mxu1 %vm346_vm0, %v5426_v16  ;;  %4508 = vmatprep.mubr.msk.f32.mxu0 %vm346_vm0, %v5476_v13  ;;  %v6411_v16 = vld [vmem:[#allocation44_spill] sm:$0xff] }
 0x122   : > { %4286 = vmatmul.mubr.msk.f32.gmra.mrb[28].mxu1 %vm346_vm0, %v5428_v62  ;;  %4509 = vmatmul.mubr.msk.f32.gmra.mrb[10].mxu0 %vm346_vm0, %v5492_v5  ;;  %v2928_v62 = vrot.slane %v5929_v55, 2 }
 0x123   : > { %4288 = vmatprep.mubr.msk.f32.mxu1 %vm346_vm0, %v5609_v35  ;;  %4511 = vmatprep.mubr.msk.f32.mxu0 %vm346_vm0, %v6409_v7 }
 0x124   : > { %v2929_v20 = vsel %vm1185_vm4, %v2926_v51, %v2928_v62 }
 0x126   : > { %4289 = vmatmul.mubr.msk.f32.gmra.mrb[30].mxu1 %vm346_vm0, %v5611_v21  ;;  %4512 = vmatmul.mubr.msk.f32.gmra.mrb[12].mxu0 %vm346_vm0, %v6410_v8 }
 0x127   : > { %4317 = vmatprep.mubr.msk.f32.mxu1 %vm346_vm0, %v6394_v10  ;;  %4514 = vmatprep.mubr.msk.f32.mxu0 %vm346_vm0, %v6411_v16 }
 0x12a   : > { %4318 = vmatmul.mubr.msk.f32.vlgmr.msra.gmra.mrb[16].mxu1 %vm346_vm0, %v6396_v46  ;;  %4515 = vmatmul.mubr.msk.f32.gmra.mrb[14].mxu0 %vm346_vm0, %v5531_v47 }
 0x12b   : > { %4320 = vmatprep.mubr.msk.f32.mxu1 %vm346_vm0, %v6397_v63  ;;  %4517 = vmatprep.mubr.msk.f32.mxu0 %vm346_vm0, %v5536_v2 }
 0x12e   : > { %4321 = vmatmul.mubr.msk.f32.gmra.mrb[18].mxu1 %vm346_vm0, %v6398_v57  ;;  %4518 = vmatmul.mubr.msk.f32.gmra.mrb[16].mxu0 %vm346_vm0, %v5550_v39 }
 0x12f   : > { %4323 = vmatprep.mubr.msk.f32.mxu1 %vm346_vm0, %v6399_v1  ;;  %4520 = vmatprep.mubr.msk.f32.mxu0 %vm346_vm0, %v5554_v33 }
 0x132   : > { %4324 = vmatmul.mubr.msk.f32.gmra.mrb[20].mxu1 %vm346_vm0, %v6400_v37  ;;  %4521 = vmatmul.mubr.msk.f32.gmra.mrb[18].mxu0 %vm346_vm0, %v5567_v42 }
 0x133   : > { %4326 = vmatprep.mubr.msk.f32.mxu1 %vm346_vm0, %v6401_v0  ;;  %4523 = vmatprep.mubr.msk.f32.mxu0 %vm346_vm0, %v5571_v53 }
 0x136   : > { %4327 = vmatmul.mubr.msk.f32.gmra.mrb[22].mxu1 %vm346_vm0, %v6402_v38  ;;  %4524 = vmatmul.mubr.msk.f32.gmra.mrb[20].mxu0 %vm346_vm0, %v5584_v9 }
 0x137   : > { %4329 = vmatprep.mubr.msk.f32.mxu1 %vm346_vm0, %v6403_v44  ;;  %4526 = vmatprep.mubr.msk.f32.mxu0 %vm346_vm0, %v5588_v28 }
 0x13a   : > { %4330 = vmatmul.mubr.msk.f32.gmra.mrb[24].mxu1 %vm346_vm0, %v6404_v45  ;;  %4527 = vmatmul.mubr.msk.f32.gmra.mrb[22].mxu0 %vm346_vm0, %v5601_v61 }
 0x13b   : > { %4332 = vmatprep.mubr.msk.f32.mxu1 %vm346_vm0, %v6412_v49  ;;  %4529 = vmatprep.mubr.msk.f32.mxu0 %vm346_vm0, %v6413_v50 }
 0x13e   : > { %4333 = vmatmul.mubr.msk.f32.gmra.mrb[26].mxu1 %vm346_vm0, %v6406_v4  ;;  %4530 = vmatmul.mubr.msk.f32.gmra.mrb[24].mxu0 %vm346_vm0, %v6414_v26 }
 0x13f   : > { %4335 = vmatprep.mubr.msk.f32.mxu1 %vm346_vm0, %v6407_v6  ;;  %4532 = vmatprep.mubr.msk.f32.mxu0 %vm346_vm0, %v6415_v48 }
 0x142   : > { %4336 = vmatmul.mubr.msk.f32.gmra.mrb[28].mxu1 %vm346_vm0, %v6408_v24  ;;  %4533 = vmatmul.mubr.msk.f32.gmra.mrb[26].mxu0 %vm346_vm0, %v6416_v54 }
 0x143   : > { %4338 = vmatprep.mubr.msk.f32.mxu1 %vm346_vm0, %v5927_v31  ;;  %4535 = vmatprep.mubr.msk.f32.mxu0 %vm346_vm0, %v6417_v3 }
 0x146   : > { %4339 = vmatmul.mubr.msk.f32.gmra.mrb[30].mxu1 %vm346_vm0, %v5940_v29  ;;  %4536 = vmatmul.mubr.msk.f32.gmra.mrb[28].mxu0 %vm346_vm0, %v6418_v25 }
 0x147   : > { %4538 = vmatprep.mubr.msk.f32.mxu0 %vm346_vm0, %v2927_v59 }
 0x14a   : > { %4539 = vmatmul.mubr.msk.f32.gmra.mrb[30].mxu0 %vm346_vm0, %v2929_v20 }
 0x1bd   : > { %v4245_v36 = vpop.f32.mrb[0].mxu1 }
 0x1be   : > { %v1663_v27 = vpop.f32.mrb[1].mxu1 }
 0x1c1   : > { %v4248_v21 = vpop.f32.mrb[2].mxu1 }
 0x1c2   : > { %v1673_v43 = vpop.f32.mrb[3].mxu1 }
 0x1c5   : > { %v4251_v60 = vpop.f32.mrb[4].mxu1 }
 0x1c6   : > { %v1683_v11 = vpop.f32.mrb[5].mxu1 }
 0x1c9   : > { %v4254_v35 = vpop.f32.mrb[6].mxu1 }
 0x1ca   : > { %v1693_v19 = vpop.f32.mrb[7].mxu1 }
 0x1cd   : > { %v6082_v13 = vpop.f32.mrb[8].mxu1 }
 0x1ce   : > { %v6084_v5 = vpop.f32.mrb[9].mxu1 }
 0x1d1   : > { %v6086_v47 = vpop.f32.mrb[10].mxu1 }
 0x1d2   : > { %v6088_v2 = vpop.f32.mrb[11].mxu1 }
 0x1d5   : > { %v6090_v39 = vpop.f32.mrb[12].mxu1 }
 0x1d6   : > { %v6092_v33 = vpop.f32.mrb[13].mxu1 }
 0x1d9   : > { %v6094_v42 = vpop.f32.mrb[14].mxu1 }
 0x1da   : > { %v6096_v53 = vpop.f32.mrb[15].mxu1 }
 0x1e1   : > { %v4495_v9 = vpop.f32.mrb[0].mxu0 }
 0x1e2   : > { %v4543_v28 = vadd.f32 %v4495_v9, %v4245_v36  ;;  %v3002_v61 = vpop.f32.mrb[1].mxu0 }
 0x1e3   : > { %v4544_v31 = vadd.f32 %v3002_v61, %v1663_v27 }
 0x1e4   : > { %3194 = vst.msk [vmem:[%s6103_s22 + $0x8] sm:$0xff] %vm346_vm0, %v4543_v28  ;;  %v3226_v12 = vsel %vm346_vm0, %v4543_v28, 0.0  ;;  %v3295_v58 = vmul.f32 %v4543_v28, %v4543_v28 }
 0x1e5   : > { %3193 = vst.msk [vmem:[%s6103_s22] sm:$0xff] %vm346_vm0, %v4544_v31  ;;  %v3225_v52 = vsel %vm346_vm0, %v4544_v31, 0.0  ;;  %v3294_v32 = vmul.f32 %v4544_v31, %v4544_v31  ;;  %v4498_v34 = vpop.f32.mrb[2].mxu0 }
 0x1e6   : > { %v3327_v30 = vsel %vm346_vm0, %v3295_v58, 0.0  ;;  %v3227_v14 = vadd.f32 %v3226_v12, %v3225_v52  ;;  %v4545_v15 = vadd.f32 %v4498_v34, %v4248_v21  ;;  %v3012_v18 = vpop.f32.mrb[3].mxu0 }
 0x1e7   : > { %v3326_v10 = vsel %vm346_vm0, %v3294_v32, 0.0  ;;  %v4546_v46 = vadd.f32 %v3012_v18, %v1673_v43 }
 0x1e8   : > { %v3328_v63 = vadd.f32 %v3327_v30, %v3326_v10  ;;  %3196 = vst.msk [vmem:[%s6103_s22 + $0x18] sm:$0xff] %vm346_vm0, %v4545_v15  ;;  %v3297_v57 = vmul.f32 %v4545_v15, %v4545_v15  ;;  %v3230_v55 = vsel %vm346_vm0, %v4545_v15, 0.0 }
 0x1e9   : > { %3195 = vst.msk [vmem:[%s6103_s22 + $0x10] sm:$0xff] %vm346_vm0, %v4546_v46  ;;  %v3228_v1 = vsel %vm346_vm0, %v4546_v46, 0.0  ;;  %v3296_v37 = vmul.f32 %v4546_v46, %v4546_v46  ;;  %v4501_v0 = vpop.f32.mrb[4].mxu0 }
 0x1ea   : > { %v3229_v38 = vadd.f32 %v3228_v1, %v3227_v14  ;;  %v4547_v44 = vadd.f32 %v4501_v0, %v4251_v60  ;;  %v3022_v45 = vpop.f32.mrb[5].mxu0  ;;  %v3331_v24 = vsel %vm346_vm0, %v3297_v57, 0.0 }
 0x1eb   : > { %v3329_v17 = vsel %vm346_vm0, %v3296_v37, 0.0  ;;  %v4548_v4 = vadd.f32 %v3022_v45, %v1683_v11 }
 0x1ec   : > { %v3330_v6 = vadd.f32 %v3329_v17, %v3328_v63  ;;  %3198 = vst.msk [vmem:[%s6103_s22 + $0x28] sm:$0xff] %vm346_vm0, %v4547_v44  ;;  %v3231_v22 = vadd.f32 %v3230_v55, %v3229_v38  ;;  %v3299_v29 = vmul.f32 %v4547_v44, %v4547_v44  ;;  %v3234_v50 = vsel %vm346_vm0, %v4547_v44, 0.0 }
 0x1ed   : > { %3197 = vst.msk [vmem:[%s6103_s22 + $0x20] sm:$0xff] %vm346_vm0, %v4548_v4  ;;  %v3232_v40 = vsel %vm346_vm0, %v4548_v4, 0.0  ;;  %v3298_v56 = vmul.f32 %v4548_v4, %v4548_v4  ;;  %v4504_v41 = vpop.f32.mrb[6].mxu0 }
 0x1ee   : > { %v3233_v7 = vadd.f32 %v3232_v40, %v3231_v22  ;;  %v3332_v8 = vadd.f32 %v3331_v24, %v3330_v6  ;;  %v4549_v16 = vadd.f32 %v4504_v41, %v4254_v35  ;;  %v3032_v49 = vpop.f32.mrb[7].mxu0  ;;  %v3335_v54 = vsel %vm346_vm0, %v3299_v29, 0.0 }
 0x1ef   : > { %v3333_v26 = vsel %vm346_vm0, %v3298_v56, 0.0  ;;  %v4550_v48 = vadd.f32 %v3032_v49, %v1693_v19 }
 0x1f0   : > { %v3334_v23 = vadd.f32 %v3333_v26, %v3332_v8  ;;  %3200 = vst.msk [vmem:[%s6103_s22 + $0x38] sm:$0xff] %vm346_vm0, %v4549_v16  ;;  %v3235_v51 = vadd.f32 %v3234_v50, %v3233_v7  ;;  %v3301_v3 = vmul.f32 %v4549_v16, %v4549_v16  ;;  %v3238_v43 = vsel %vm346_vm0, %v4549_v16, 0.0 }
 0x1f1   : > { %3199 = vst.msk [vmem:[%s6103_s22 + $0x30] sm:$0xff] %vm346_vm0, %v4550_v48  ;;  %v3236_v62 = vsel %vm346_vm0, %v4550_v48, 0.0  ;;  %v3300_v59 = vmul.f32 %v4550_v48, %v4550_v48  ;;  %v4507_v25 = vpop.f32.mrb[8].mxu0 }
 0x1f2   : > { %v3237_v20 = vadd.f32 %v3236_v62, %v3235_v51  ;;  %v3336_v36 = vadd.f32 %v3335_v54, %v3334_v23  ;;  %v4551_v27 = vadd.f32 %v4507_v25, %v6082_v13  ;;  %v3042_v21 = vpop.f32.mrb[9].mxu0  ;;  %v3339_v9 = vsel %vm346_vm0, %v3301_v3, 0.0 }
 0x1f3   : > { %v3337_v60 = vsel %vm346_vm0, %v3300_v59, 0.0  ;;  %v4552_v11 = vadd.f32 %v3042_v21, %v6084_v5 }
 0x1f4   : > { %v3338_v35 = vadd.f32 %v3337_v60, %v3336_v36  ;;  %3202 = vst.msk [vmem:[%s6103_s22 + $0x48] sm:$0xff] %vm346_vm0, %v4551_v27  ;;  %v3239_v19 = vadd.f32 %v3238_v43, %v3237_v20  ;;  %v3303_v28 = vmul.f32 %v4551_v27, %v4551_v27  ;;  %v3242_v32 = vsel %vm346_vm0, %v4551_v27, 0.0 }
 0x1f5   : > { %3201 = vst.msk [vmem:[%s6103_s22 + $0x40] sm:$0xff] %vm346_vm0, %v4552_v11  ;;  %v3240_v13 = vsel %vm346_vm0, %v4552_v11, 0.0  ;;  %v3302_v61 = vmul.f32 %v4552_v11, %v4552_v11  ;;  %v4510_v31 = vpop.f32.mrb[10].mxu0 }
 0x1f6   : > { %v3241_v12 = vadd.f32 %v3240_v13, %v3239_v19  ;;  %v3340_v58 = vadd.f32 %v3339_v9, %v3338_v35  ;;  %v4553_v52 = vadd.f32 %v4510_v31, %v6086_v47  ;;  %v3052_v5 = vpop.f32.mrb[11].mxu0  ;;  %v3343_v18 = vsel %vm346_vm0, %v3303_v28, 0.0 }
 0x1f7   : > { %v3341_v34 = vsel %vm346_vm0, %v3302_v61, 0.0  ;;  %v4554_v30 = vadd.f32 %v3052_v5, %v6088_v2 }
 0x1f8   : > { %v3342_v14 = vadd.f32 %v3341_v34, %v3340_v58  ;;  %3204 = vst.msk [vmem:[%s6103_s22 + $0x58] sm:$0xff] %vm346_vm0, %v4553_v52  ;;  %v3243_v15 = vadd.f32 %v3242_v32, %v3241_v12  ;;  %v3305_v10 = vmul.f32 %v4553_v52, %v4553_v52  ;;  %v3246_v0 = vsel %vm346_vm0, %v4553_v52, 0.0 }
 0x1f9   : > { %3203 = vst.msk [vmem:[%s6103_s22 + $0x50] sm:$0xff] %vm346_vm0, %v4554_v30  ;;  %v3244_v47 = vsel %vm346_vm0, %v4554_v30, 0.0  ;;  %v3304_v46 = vmul.f32 %v4554_v30, %v4554_v30  ;;  %v4513_v63 = vpop.f32.mrb[12].mxu0 }
 0x1fa   : > { %v3245_v57 = vadd.f32 %v3244_v47, %v3243_v15  ;;  %v3344_v1 = vadd.f32 %v3343_v18, %v3342_v14  ;;  %v4555_v37 = vadd.f32 %v4513_v63, %v6090_v39  ;;  %v3062_v2 = vpop.f32.mrb[13].mxu0  ;;  %v3347_v17 = vsel %vm346_vm0, %v3305_v10, 0.0 }
 0x1fb   : > { %v3345_v38 = vsel %vm346_vm0, %v3304_v46, 0.0  ;;  %v4556_v44 = vadd.f32 %v3062_v2, %v6092_v33 }
 0x1fc   : > { %v3346_v45 = vadd.f32 %v3345_v38, %v3344_v1  ;;  %3206 = vst.msk [vmem:[%s6103_s22 + $0x68] sm:$0xff] %vm346_vm0, %v4555_v37  ;;  %v3247_v55 = vadd.f32 %v3246_v0, %v3245_v57  ;;  %v3307_v4 = vmul.f32 %v4555_v37, %v4555_v37  ;;  %v3250_v7 = vsel %vm346_vm0, %v4555_v37, 0.0 }
 0x1fd   : > { %3205 = vst.msk [vmem:[%s6103_s22 + $0x60] sm:$0xff] %vm346_vm0, %v4556_v44  ;;  %v3248_v6 = vsel %vm346_vm0, %v4556_v44, 0.0  ;;  %v3306_v39 = vmul.f32 %v4556_v44, %v4556_v44  ;;  %v4319_v22 = vpop.f32.mrb[16].mxu1  ;;  %v4516_v24 = vpop.f32.mrb[14].mxu0 }
 0x1fe   : > { %v3249_v29 = vadd.f32 %v3248_v6, %v3247_v55  ;;  %v3348_v40 = vadd.f32 %v3347_v17, %v3346_v45  ;;  %v4557_v33 = vadd.f32 %v4516_v24, %v6094_v42  ;;  %v2012_v56 = vpop.f32.mrb[17].mxu1  ;;  %v3072_v41 = vpop.f32.mrb[15].mxu0  ;;  %v3351_v26 = vsel %vm346_vm0, %v3307_v4, 0.0 }
 0x1ff   : > { %v3349_v8 = vsel %vm346_vm0, %v3306_v39, 0.0  ;;  %v4558_v16 = vadd.f32 %v3072_v41, %v6096_v53 }
 0x200   : > { %v3350_v49 = vadd.f32 %v3349_v8, %v3348_v40  ;;  %3208 = vst.msk [vmem:[%s6103_s22 + $0x78] sm:$0xff] %vm346_vm0, %v4557_v33  ;;  %v3251_v50 = vadd.f32 %v3250_v7, %v3249_v29  ;;  %v3309_v48 = vmul.f32 %v4557_v33, %v4557_v33  ;;  %v3254_v20 = vsel %vm346_vm0, %v4557_v33, 0.0 }
 0x201   : > { %3207 = vst.msk [vmem:[%s6103_s22 + $0x70] sm:$0xff] %vm346_vm0, %v4558_v16  ;;  %v3252_v42 = vsel %vm346_vm0, %v4558_v16, 0.0  ;;  %v3308_v23 = vmul.f32 %v4558_v16, %v4558_v16  ;;  %v4322_v51 = vpop.f32.mrb[18].mxu1  ;;  %v4519_v54 = vpop.f32.mrb[16].mxu0 }
 0x202   : > { %v3253_v3 = vadd.f32 %v3252_v42, %v3251_v50  ;;  %v3352_v62 = vadd.f32 %v3351_v26, %v3350_v49  ;;  %v4559_v59 = vadd.f32 %v4519_v54, %v4319_v22  ;;  %v2022_v53 = vpop.f32.mrb[19].mxu1  ;;  %v3082_v25 = vpop.f32.mrb[17].mxu0  ;;  %v3355_v60 = vsel %vm346_vm0, %v3309_v48, 0.0 }
 0x203   : > { %v3353_v36 = vsel %vm346_vm0, %v3308_v23, 0.0  ;;  %v4560_v27 = vadd.f32 %v3082_v25, %v2012_v56 }
 0x204   : > { %v3354_v21 = vadd.f32 %v3353_v36, %v3352_v62  ;;  %3210 = vst.msk [vmem:[%s6103_s22 + $0x88] sm:$0xff] %vm346_vm0, %v4559_v59  ;;  %v3255_v43 = vadd.f32 %v3254_v20, %v3253_v3  ;;  %v3311_v11 = vmul.f32 %v4559_v59, %v4559_v59  ;;  %v3258_v52 = vsel %vm346_vm0, %v4559_v59, 0.0 }
 0x205   : > { %3209 = vst.msk [vmem:[%s6103_s22 + $0x80] sm:$0xff] %vm346_vm0, %v4560_v27  ;;  %v3256_v35 = vsel %vm346_vm0, %v4560_v27, 0.0  ;;  %v3310_v19 = vmul.f32 %v4560_v27, %v4560_v27  ;;  %v4325_v9 = vpop.f32.mrb[20].mxu1  ;;  %v4522_v28 = vpop.f32.mrb[18].mxu0 }
 0x206   : > { %v3257_v13 = vadd.f32 %v3256_v35, %v3255_v43  ;;  %v3356_v61 = vadd.f32 %v3355_v60, %v3354_v21  ;;  %v4561_v31 = vadd.f32 %v4522_v28, %v4322_v51  ;;  %v2032_v12 = vpop.f32.mrb[21].mxu1  ;;  %v3092_v58 = vpop.f32.mrb[19].mxu0  ;;  %v3359_v14 = vsel %vm346_vm0, %v3311_v11, 0.0 }
 0x207   : > { %v3357_v5 = vsel %vm346_vm0, %v3310_v19, 0.0  ;;  %v4562_v32 = vadd.f32 %v3092_v58, %v2022_v53 }
 0x208   : > { %v3358_v34 = vadd.f32 %v3357_v5, %v3356_v61  ;;  %3212 = vst.msk [vmem:[%s6103_s22 + $0x98] sm:$0xff] %vm346_vm0, %v4561_v31  ;;  %v3259_v30 = vadd.f32 %v3258_v52, %v3257_v13  ;;  %v3313_v15 = vmul.f32 %v4561_v31, %v4561_v31  ;;  %v3262_v0 = vsel %vm346_vm0, %v4561_v31, 0.0 }
 0x209   : > { %3211 = vst.msk [vmem:[%s6103_s22 + $0x90] sm:$0xff] %vm346_vm0, %v4562_v32  ;;  %v3260_v18 = vsel %vm346_vm0, %v4562_v32, 0.0  ;;  %v3312_v10 = vmul.f32 %v4562_v32, %v4562_v32  ;;  %v4328_v47 = vpop.f32.mrb[22].mxu1  ;;  %v4525_v46 = vpop.f32.mrb[20].mxu0 }
 0x20a   : > { %v3261_v63 = vadd.f32 %v3260_v18, %v3259_v30  ;;  %v3360_v57 = vadd.f32 %v3359_v14, %v3358_v34  ;;  %v4563_v1 = vadd.f32 %v4525_v46, %v4325_v9  ;;  %v2042_v37 = vpop.f32.mrb[23].mxu1  ;;  %v3102_v2 = vpop.f32.mrb[21].mxu0  ;;  %v3363_v17 = vsel %vm346_vm0, %v3313_v15, 0.0 }
 0x20b   : > { %v3361_v38 = vsel %vm346_vm0, %v3312_v10, 0.0  ;;  %v4564_v44 = vadd.f32 %v3102_v2, %v2032_v12 }
 0x20c   : > { %v3362_v45 = vadd.f32 %v3361_v38, %v3360_v57  ;;  %3214 = vst.msk [vmem:[%s6103_s22 + $0xa8] sm:$0xff] %vm346_vm0, %v4563_v1  ;;  %v3263_v55 = vadd.f32 %v3262_v0, %v3261_v63  ;;  %v3315_v4 = vmul.f32 %v4563_v1, %v4563_v1  ;;  %v3266_v7 = vsel %vm346_vm0, %v4563_v1, 0.0 }
 0x20d   : > { %3213 = vst.msk [vmem:[%s6103_s22 + $0xa0] sm:$0xff] %vm346_vm0, %v4564_v44  ;;  %v3264_v6 = vsel %vm346_vm0, %v4564_v44, 0.0  ;;  %v3314_v39 = vmul.f32 %v4564_v44, %v4564_v44  ;;  %v4331_v22 = vpop.f32.mrb[24].mxu1  ;;  %v4528_v24 = vpop.f32.mrb[22].mxu0 }
 0x20e   : > { %v3265_v29 = vadd.f32 %v3264_v6, %v3263_v55  ;;  %v3364_v40 = vadd.f32 %v3363_v17, %v3362_v45  ;;  %v4565_v33 = vadd.f32 %v4528_v24, %v4328_v47  ;;  %v2052_v56 = vpop.f32.mrb[25].mxu1  ;;  %v3112_v41 = vpop.f32.mrb[23].mxu0  ;;  %v3367_v26 = vsel %vm346_vm0, %v3315_v4, 0.0 }
 0x20f   : > { %v3365_v8 = vsel %vm346_vm0, %v3314_v39, 0.0  ;;  %v4566_v16 = vadd.f32 %v3112_v41, %v2042_v37 }
 0x210   : > { %v3366_v49 = vadd.f32 %v3365_v8, %v3364_v40  ;;  %3216 = vst.msk [vmem:[%s6103_s22 + $0xb8] sm:$0xff] %vm346_vm0, %v4565_v33  ;;  %v3267_v50 = vadd.f32 %v3266_v7, %v3265_v29  ;;  %v3317_v48 = vmul.f32 %v4565_v33, %v4565_v33  ;;  %v3270_v20 = vsel %vm346_vm0, %v4565_v33, 0.0 }
 0x211   : > { %3215 = vst.msk [vmem:[%s6103_s22 + $0xb0] sm:$0xff] %vm346_vm0, %v4566_v16  ;;  %v3268_v42 = vsel %vm346_vm0, %v4566_v16, 0.0  ;;  %v3316_v23 = vmul.f32 %v4566_v16, %v4566_v16  ;;  %v4334_v51 = vpop.f32.mrb[26].mxu1  ;;  %v4531_v54 = vpop.f32.mrb[24].mxu0 }
 0x212   : > { %v3269_v3 = vadd.f32 %v3268_v42, %v3267_v50  ;;  %v3368_v62 = vadd.f32 %v3367_v26, %v3366_v49  ;;  %v4567_v59 = vadd.f32 %v4531_v54, %v4331_v22  ;;  %v2062_v53 = vpop.f32.mrb[27].mxu1  ;;  %v3122_v25 = vpop.f32.mrb[25].mxu0  ;;  %v3371_v60 = vsel %vm346_vm0, %v3317_v48, 0.0 }
 0x213   : > { %v3369_v36 = vsel %vm346_vm0, %v3316_v23, 0.0  ;;  %v4568_v27 = vadd.f32 %v3122_v25, %v2052_v56 }
 0x214   : > { %v3370_v21 = vadd.f32 %v3369_v36, %v3368_v62  ;;  %3218 = vst.msk [vmem:[%s6103_s22 + $0xc8] sm:$0xff] %vm346_vm0, %v4567_v59  ;;  %v3271_v43 = vadd.f32 %v3270_v20, %v3269_v3  ;;  %v3319_v11 = vmul.f32 %v4567_v59, %v4567_v59  ;;  %v3274_v52 = vsel %vm346_vm0, %v4567_v59, 0.0 }
 0x215   : > { %3217 = vst.msk [vmem:[%s6103_s22 + $0xc0] sm:$0xff] %vm346_vm0, %v4568_v27  ;;  %v3272_v35 = vsel %vm346_vm0, %v4568_v27, 0.0  ;;  %v3318_v19 = vmul.f32 %v4568_v27, %v4568_v27  ;;  %v4337_v9 = vpop.f32.mrb[28].mxu1  ;;  %v4534_v28 = vpop.f32.mrb[26].mxu0 }
 0x216   : > { %v3273_v13 = vadd.f32 %v3272_v35, %v3271_v43  ;;  %v3372_v61 = vadd.f32 %v3371_v60, %v3370_v21  ;;  %v4569_v31 = vadd.f32 %v4534_v28, %v4334_v51  ;;  %v2072_v12 = vpop.f32.mrb[29].mxu1  ;;  %v3132_v58 = vpop.f32.mrb[27].mxu0  ;;  %v3375_v14 = vsel %vm346_vm0, %v3319_v11, 0.0 }
 0x217   : > { %v3373_v5 = vsel %vm346_vm0, %v3318_v19, 0.0  ;;  %v4570_v32 = vadd.f32 %v3132_v58, %v2062_v53 }
 0x218   : > { %v3374_v34 = vadd.f32 %v3373_v5, %v3372_v61  ;;  %3220 = vst.msk [vmem:[%s6103_s22 + $0xd8] sm:$0xff] %vm346_vm0, %v4569_v31  ;;  %v3275_v30 = vadd.f32 %v3274_v52, %v3273_v13  ;;  %v3321_v15 = vmul.f32 %v4569_v31, %v4569_v31  ;;  %v3278_v0 = vsel %vm346_vm0, %v4569_v31, 0.0 }
 0x219   : > { %3219 = vst.msk [vmem:[%s6103_s22 + $0xd0] sm:$0xff] %vm346_vm0, %v4570_v32  ;;  %v3276_v18 = vsel %vm346_vm0, %v4570_v32, 0.0  ;;  %v3320_v10 = vmul.f32 %v4570_v32, %v4570_v32  ;;  %v4340_v47 = vpop.f32.mrb[30].mxu1  ;;  %v4537_v46 = vpop.f32.mrb[28].mxu0 }
 0x21a   : > { %v3277_v63 = vadd.f32 %v3276_v18, %v3275_v30  ;;  %v3376_v57 = vadd.f32 %v3375_v14, %v3374_v34  ;;  %v4571_v1 = vadd.f32 %v4537_v46, %v4337_v9  ;;  %v2082_v37 = vpop.f32.mrb[31].mxu1  ;;  %v3142_v2 = vpop.f32.mrb[29].mxu0  ;;  %v3379_v17 = vsel %vm346_vm0, %v3321_v15, 0.0 }
 0x21b   : > { %v3377_v38 = vsel %vm346_vm0, %v3320_v10, 0.0  ;;  %v4572_v44 = vadd.f32 %v3142_v2, %v2072_v12 }
 0x21c   : > { %v3378_v45 = vadd.f32 %v3377_v38, %v3376_v57  ;;  %3222 = vst.msk [vmem:[%s6103_s22 + $0xe8] sm:$0xff] %vm346_vm0, %v4571_v1  ;;  %v3279_v55 = vadd.f32 %v3278_v0, %v3277_v63  ;;  %v3323_v4 = vmul.f32 %v4571_v1, %v4571_v1  ;;  %v3282_v56 = vsel %vm346_vm0, %v4571_v1, 0.0 }
 0x21d   : > { %3221 = vst.msk [vmem:[%s6103_s22 + $0xe0] sm:$0xff] %vm346_vm0, %v4572_v44  ;;  %v3280_v6 = vsel %vm346_vm0, %v4572_v44, 0.0  ;;  %v3322_v39 = vmul.f32 %v4572_v44, %v4572_v44  ;;  %v4540_v22 = vpop.f32.mrb[30].mxu0 }
 0x21e   : > { %v3281_v24 = vadd.f32 %v3280_v6, %v3279_v55  ;;  %v3380_v29 = vadd.f32 %v3379_v17, %v3378_v45  ;;  %v4573_v40 = vadd.f32 %v4540_v22, %v4340_v47  ;;  %v3152_v33 = vpop.f32.mrb[31].mxu0  ;;  %v3383_v49 = vsel %vm346_vm0, %v3323_v4, 0.0 }
 0x21f   : > { %v3381_v41 = vsel %vm346_vm0, %v3322_v39, 0.0  ;;  %v4574_v7 = vadd.f32 %v3152_v33, %v2082_v37 }
 0x220   : > { %v3382_v8 = vadd.f32 %v3381_v41, %v3380_v29  ;;  %3224 = vst.msk [vmem:[%s6103_s22 + $0xf8] sm:$0xff] %vm346_vm0, %v4573_v40  ;;  %v3283_v16 = vadd.f32 %v3282_v56, %v3281_v24  ;;  %v3325_v50 = vmul.f32 %v4573_v40, %v4573_v40  ;;  %v3286_v51 = vsel %vm346_vm0, %v4573_v40, 0.0 }
 0x221   : > { %3223 = vst.msk [vmem:[%s6103_s22 + $0xf0] sm:$0xff] %vm346_vm0, %v4574_v7  ;;  %v3284_v26 = vsel %vm346_vm0, %v4574_v7, 0.0  ;;  %v3324_v48 = vmul.f32 %v4574_v7, %v4574_v7 }
 0x222   : > { %v3285_v42 = vadd.f32 %v3284_v26, %v3283_v16  ;;  %v3384_v23 = vadd.f32 %v3383_v49, %v3382_v8  ;;  %v3387_v59 = vsel %vm346_vm0, %v3325_v50, 0.0 }
 0x223   : > { %v3385_v54 = vsel %vm346_vm0, %v3324_v48, 0.0 }
 0x224   : > { %v3287_v3 = vadd.f32 %v3286_v51, %v3285_v42  ;;  %v3386_v62 = vadd.f32 %v3385_v54, %v3384_v23 }
 0x226   : > { %v3288_v53 = vrot.slane %v3287_v3, 4  ;;  %v3388_v25 = vadd.f32 %v3387_v59, %v3386_v62 }
 0x228   : > { %v3289_v20 = vadd.f32 %v3288_v53, %v3287_v3  ;;  %v3389_v36 = vrot.slane %v3388_v25, 4 }
 0x22a   : > { %v3290_v27 = vrot.slane %v3289_v20, 2  ;;  %v3390_v21 = vadd.f32 %v3389_v36, %v3388_v25 }
 0x22c   : > { %v3291_v43 = vadd.f32 %v3290_v27, %v3289_v20  ;;  %v3391_v60 = vrot.slane %v3390_v21, 2 }
 0x22e   : > { %v3292_v11 = vrot.slane %v3291_v43, 1  ;;  %v3392_v35 = vadd.f32 %v3391_v60, %v3390_v21 }
 0x230   : > { %v3393_v19 = vrot.slane %v3392_v35, 1  ;;  %v3293_v9 = vadd.f32 %v3292_v11, %v3291_v43 }
 0x232   : > { %v3394_v28 = vadd.f32 %v3393_v19, %v3392_v35 }
 0x234   : > { %v3396_v13 = vsel %vm3395_vm5, %v3293_v9, %v3394_v28 }
 0x235   : > { %3397 = vst.msk [vmem:[%s208_s26] sm:$0x3] %vm349_vm1, %v3396_v13 }
 0x236 PF: > { %s15_s15 = sadd.s32 1, %s4815_s15  }
 0x237   : > { %p12_p4 = scmp.ge.s32.totalorder %s15_s15, 4  }
 0x239   :  { %14 = sbr.rel (!%p12_p4) target bundleno = 1 (0x1), region = 84 }

</bundles_post_ra>
